<compile_context>
chip_gen: v6e
topology: v6e:2x2x1
jax: 0.10.0
libtpu: 0.0.40
codegen_flags: <defaults>
</compile_context>

<pallas_src>
import jax
import jax.numpy as jnp
from jax.experimental import pallas as pl
from jax.experimental.pallas import tpu as pltpu

SEQ_LEN = 15  # fixed by the module: Dense expects out_dim * 15 features


def lstm_block_kernel(x_ref, w_ih_ref, w_hh_ref, b_ref, wd_ref, bd_ref,
                      out_ref, gx_ref):
    """Single-layer unidirectional LSTM + tanh + Dense + tanh, all in-kernel.

    The kernel is latency-bound on a 15-step serial recurrence, so per-step
    work on the critical chain is minimized:
      * one EUP transcendental pass per step: sigmoid is folded into tanh via
        sigmoid(x) = 0.5*tanh(x/2) + 0.5 with hoisted per-lane constants,
      * two XLU rolls per step (one roll reused for both the g and o chunks),
      * the Dense layer is accumulated per step OFF the recurrence chain
        (no post-loop (1,480)@(480,32) latency tail, no flat scratch / masked
        width-32 stores),
      * the hoisted input projection is staged through VMEM so the per-step
        row read is a plain vector load, not an in-vreg sublane extraction.

    x_ref   : (SEQ_LEN, in_dim)   input sequence
    w_ih_ref: (in_dim, 4H)        input->gate weights (PyTorch gate order i,f,g,o)
    w_hh_ref: (4H, 4H)            hidden->gate weights, zero except rows [H,2H)
                                  so the 4H-wide hidden state (live lanes
                                  [H,2H)) feeds the MXU with no lane slice
    b_ref   : (1, 4H)             combined bias (b_ih + b_hh)
    wd_ref  : (SEQ_LEN, 4H, H)    Dense weight per step, zero except rows [H,2H)
    bd_ref  : (1, H)              Dense bias
    out_ref : (1, H)              final output
    gx_ref  : (SEQ_LEN, 4H)       VMEM scratch: hoisted input projection + bias
    """
    H = out_ref.shape[1]
    H4 = 4 * H

    # Hoisted input projection with the bias folded in, staged in VMEM so
    # each step re-reads its row with an ordinary (idle-slot) vector load.
    gx_ref[...] = (jnp.dot(x_ref[...], w_ih_ref[...],
                           preferred_element_type=jnp.float32) + b_ref[...])

    # Hoisted per-lane constants for the single-tanh gate activation:
    #   act = tanh(gates * s) * s + a
    #       == sigmoid(gates) on the i|f|o lanes (s=0.5, a=0.5)
    #       == tanh(gates)    on the g lanes     (s=1.0, a=0.0)
    lane = jax.lax.broadcasted_iota(jnp.int32, (1, H4), 1)
    g_mask = (lane >= 2 * H) & (lane < 3 * H)
    s = jnp.where(g_mask, jnp.float32(1.0), jnp.float32(0.5))
    a = jnp.where(g_mask, jnp.float32(0.0), jnp.float32(0.5))

    # Full-width (4H) state with live lanes [H,2H) (the f-gate lanes), so
    # f*c needs no roll.  The remaining lanes carry bounded garbage
    # (|c_garbage| <= SEQ_LEN, since every gate activation is in [-1,1]) that
    # only ever multiplies the zero rows of w_hh / wd, so it never leaks.
    h = jnp.zeros((1, H4), jnp.float32)
    c = jnp.zeros((1, H4), jnp.float32)
    acc = jnp.zeros((1, H), jnp.float32)   # Dense accumulator (off-chain)

    # SEQ_LEN is small and static -> unrolled recurrence.
    for t in range(SEQ_LEN):
        # (1,4H) = [i|f|g|o]; w_hh is zero outside rows [H,2H) so the garbage
        # lanes of h never contribute.
        gates = gx_ref[t:t + 1, :] + jnp.dot(
            h, w_hh_ref[...], preferred_element_type=jnp.float32)
        act = jnp.tanh(gates * s) * s + a      # single EUP pass per step
        # roll(x, sh)[j] = x[(j - sh) mod 4H]  (np.roll semantics).
        # r2 carries g at lanes [0,H) and o at lanes [H,2H): one roll, two uses.
        r2 = pltpu.roll(act, shift=2 * H, axis=1)
        ig = pltpu.roll(act * r2, shift=H, axis=1)   # i*g aligned to [H,2H)
        c = act * c + ig                       # lanes [H,2H): f*c + i*g
        h = r2 * jnp.tanh(c)                   # lanes [H,2H): o*tanh(c)
        # Dense folded into the loop: wd_ref[t] is zero outside rows [H,2H),
        # so tanh(h) is fed full-width (no lane slice).  This tanh + matmul
        # do not feed the next step, i.e. they sit off the critical chain.
        acc = acc + jnp.dot(jnp.tanh(h), wd_ref[t],
                            preferred_element_type=jnp.float32)

    # Dense bias + final tanh.
    out_ref[...] = jnp.tanh(acc + bd_ref[...])


def lstm_block_forward(x, w_ih, w_hh, b, w_dense, b_dense):
    H = w_dense.shape[1]
    # Host-side packing:
    #  * w_hh zero-padded to (4H, 4H) with its rows placed at [H,2H) so the
    #    4H-wide hidden state (live lanes [H,2H)) feeds the MXU directly.
    #  * w_dense reshaped per time-step and zero-padded the same way so the
    #    Dense layer accumulates per step without any lane slicing.
    w_hh_pad = jnp.zeros((4 * H, 4 * H), jnp.float32).at[H:2 * H, :].set(w_hh)
    wd_pad = jnp.zeros((SEQ_LEN, 4 * H, H), jnp.float32).at[:, H:2 * H, :].set(
        w_dense.reshape(SEQ_LEN, H, H))
    vmem = pl.BlockSpec(memory_space=pltpu.MemorySpace.VMEM)
    # Whole problem (~1 MiB incl. layout padding) is VMEM-resident; no grid,
    # no pipelining, no cross-core split: the recurrence is strictly serial.
    return pl.pallas_call(
        lstm_block_kernel,
        out_shape=jax.ShapeDtypeStruct((1, H), jnp.float32),
        in_specs=[vmem] * 6,
        out_specs=vmem,
        scratch_shapes=[pltpu.VMEM((SEQ_LEN, 4 * H), jnp.float32)],
    )(x, w_ih, w_hh_pad, b, wd_pad, b_dense)


def lstm_block_reference(x, w_ih, w_hh, b, w_dense, b_dense):
    """Pure-JAX reference of the LSTM_Block forward (batch=1)."""
    H = w_dense.shape[1]

    def step(carry, x_t):
        h, c = carry
        gates = x_t @ w_ih + h @ w_hh + b[0]
        i_g = jax.nn.sigmoid(gates[0 * H:1 * H])
        f_g = jax.nn.sigmoid(gates[1 * H:2 * H])
        g_g = jnp.tanh(gates[2 * H:3 * H])
        o_g = jax.nn.sigmoid(gates[3 * H:4 * H])
        c = f_g * c + i_g * g_g
        h = o_g * jnp.tanh(c)
        return (h, c), jnp.tanh(h)

    (_, _), hs = jax.lax.scan(
        step, (jnp.zeros(H, jnp.float32), jnp.zeros(H, jnp.float32)), x)
    return jnp.tanh(hs.reshape(1, -1) @ w_dense + b_dense)


def init_params(key, in_dim, out_dim):
    """Deterministic uniform(-1/sqrt(H), 1/sqrt(H)) init, like PyTorch defaults."""
    H = out_dim
    k = 1.0 / jnp.sqrt(jnp.float32(H))
    ks = jax.random.split(key, 6)
    w_ih = jax.random.uniform(ks[0], (in_dim, 4 * H), jnp.float32, -k, k)
    w_hh = jax.random.uniform(ks[1], (H, 4 * H), jnp.float32, -k, k)
    b_ih = jax.random.uniform(ks[2], (1, 4 * H), jnp.float32, -k, k)
    b_hh = jax.random.uniform(ks[3], (1, 4 * H), jnp.float32, -k, k)
    b = b_ih + b_hh
    kd = 1.0 / jnp.sqrt(jnp.float32(SEQ_LEN * H))
    w_dense = jax.random.uniform(ks[4], (SEQ_LEN * H, H), jnp.float32, -kd, kd)
    b_dense = jax.random.uniform(ks[5], (1, H), jnp.float32, -kd, kd)
    return w_ih, w_hh, b, w_dense, b_dense


if __name__ == "__main__":
    in_dim, out_dim = 16, 32
    key = jax.random.PRNGKey(0)
    kx, kp = jax.random.split(key)
    x = jax.random.normal(kx, (SEQ_LEN, in_dim), jnp.float32)
    params = init_params(kp, in_dim, out_dim)

    out = lstm_block_forward(x, *params)
    out = jax.block_until_ready(out)
    assert out.shape == (1, out_dim)
    assert bool(jnp.all(jnp.isfinite(out)))

    # Sanity check against a pure-JAX reference (loose tol: MXU f32 path vs
    # XLA highest-precision matmuls; structural errors would be O(0.1)).
    with jax.default_matmul_precision("highest"):
        ref = lstm_block_reference(x, *params)
    max_err = float(jnp.max(jnp.abs(out - ref)))
    assert max_err < 1e-2, max_err

    print("KERNEL_OK")
</pallas_src>

<mosaic_0001>
module attributes {stable_mosaic.version = 11 : i64} {
  func.func @lstm_block_kernel(%arg0: memref<15x16xf32, #tpu.memory_space<vmem>>, %arg1: memref<16x128xf32, #tpu.memory_space<vmem>>, %arg2: memref<128x128xf32, #tpu.memory_space<vmem>>, %arg3: memref<1x128xf32, #tpu.memory_space<vmem>>, %arg4: memref<15x128x32xf32, #tpu.memory_space<vmem>>, %arg5: memref<1x32xf32, #tpu.memory_space<vmem>>, %arg6: memref<1x32xf32, #tpu.memory_space<vmem>>, %arg7: memref<15x128xf32, #tpu.memory_space<vmem>>) attributes {dimension_semantics = [], scalar_prefetch = 0 : i64, scratch_operands = 1 : i64, tpu.core_type = #tpu.core_type<tc>} {
    %c0 = arith.constant 0 : index
    %c0_0 = arith.constant 0 : index
    %0 = vector.load %arg0[%c0, %c0_0] : memref<15x16xf32, #tpu.memory_space<vmem>>, vector<15x16xf32>
    %c0_1 = arith.constant 0 : index
    %c0_2 = arith.constant 0 : index
    %1 = vector.load %arg1[%c0_1, %c0_2] : memref<16x128xf32, #tpu.memory_space<vmem>>, vector<16x128xf32>
    %cst = arith.constant dense<0.000000e+00> : vector<15x128xf32>
    %2 = tpu.matmul %0, %1, %cst {dimension_numbers = #tpu.dot_dimension_numbers<[1], [0], [0], [1], [0, 0, 1, 1], [], []>} : vector<15x16xf32>, vector<16x128xf32>, vector<15x128xf32> -> vector<15x128xf32>
    %c0_3 = arith.constant 0 : index
    %c0_4 = arith.constant 0 : index
    %3 = vector.load %arg3[%c0_3, %c0_4] : memref<1x128xf32, #tpu.memory_space<vmem>>, vector<1x128xf32>
    %4 = vector.broadcast %3 : vector<1x128xf32> to vector<15x128xf32>
    %5 = arith.addf %2, %4 : vector<15x128xf32>
    %c0_5 = arith.constant 0 : index
    %c0_6 = arith.constant 0 : index
    %6 = vector.load %arg7[%c0_5, %c0_6] : memref<15x128xf32, #tpu.memory_space<vmem>>, vector<15x128xf32>
    tpu.vector_store %arg7[%c0_5, %c0_6], %5 {strides = array<i32>} : memref<15x128xf32, #tpu.memory_space<vmem>>, vector<15x128xf32>,
    %7 = tpu.iota {dimensions = array<i32: 1>} : vector<1x128xi32>
    %c64_i32 = arith.constant 64 : i32
    %8 = vector.broadcast %c64_i32 : i32 to vector<1x128xi32>
    %9 = arith.cmpi sge, %7, %8 : vector<1x128xi32>
    %c96_i32 = arith.constant 96 : i32
    %10 = vector.broadcast %c96_i32 : i32 to vector<1x128xi32>
    %11 = arith.cmpi slt, %7, %10 : vector<1x128xi32>
    %12 = arith.andi %9, %11 : vector<1x128xi1>
    %cst_7 = arith.constant 1.000000e+00 : f32
    %cst_8 = arith.constant 5.000000e-01 : f32
    %13 = vector.broadcast %cst_7 : f32 to vector<1x128xf32>
    %14 = vector.broadcast %cst_8 : f32 to vector<1x128xf32>
    %15 = arith.select %12, %13, %14 : vector<1x128xi1>, vector<1x128xf32>
    %cst_9 = arith.constant 0.000000e+00 : f32
    %cst_10 = arith.constant 5.000000e-01 : f32
    %16 = vector.broadcast %cst_9 : f32 to vector<1x128xf32>
    %17 = vector.broadcast %cst_10 : f32 to vector<1x128xf32>
    %18 = arith.select %12, %16, %17 : vector<1x128xi1>, vector<1x128xf32>
    %cst_11 = arith.constant 0.000000e+00 : f32
    %19 = vector.broadcast %cst_11 : f32 to vector<1x128xf32>
    %cst_12 = arith.constant 0.000000e+00 : f32
    %20 = vector.broadcast %cst_12 : f32 to vector<1x128xf32>
    %cst_13 = arith.constant 0.000000e+00 : f32
    %21 = vector.broadcast %cst_13 : f32 to vector<1x32xf32>
    %c0_14 = arith.constant 0 : index
    %c0_15 = arith.constant 0 : index
    %22 = vector.load %arg7[%c0_14, %c0_15] : memref<15x128xf32, #tpu.memory_space<vmem>>, vector<1x128xf32>
    %c0_16 = arith.constant 0 : index
    %c0_17 = arith.constant 0 : index
    %23 = vector.load %arg2[%c0_16, %c0_17] : memref<128x128xf32, #tpu.memory_space<vmem>>, vector<128x128xf32>
    %cst_18 = arith.constant dense<0.000000e+00> : vector<1x128xf32>
    %24 = tpu.matmul %19, %23, %cst_18 {dimension_numbers = #tpu.dot_dimension_numbers<[1], [0], [0], [1], [0, 0, 1, 1], [], []>} : vector<1x128xf32>, vector<128x128xf32>, vector<1x128xf32> -> vector<1x128xf32>
    %25 = arith.addf %22, %24 : vector<1x128xf32>
    %26 = arith.mulf %25, %15 : vector<1x128xf32>
    %27 = math.tanh %26 : vector<1x128xf32>
    %28 = arith.mulf %27, %15 : vector<1x128xf32>
    %29 = arith.addf %28, %18 : vector<1x128xf32>
    %c64_i32_19 = arith.constant 64 : i32
    %30 = tpu.dynamic_rotate %29 by %c64_i32_19 dim 1 : vector<1x128xf32>, i32 -> vector<1x128xf32>
    %31 = arith.mulf %29, %30 : vector<1x128xf32>
    %c32_i32 = arith.constant 32 : i32
    %32 = tpu.dynamic_rotate %31 by %c32_i32 dim 1 : vector<1x128xf32>, i32 -> vector<1x128xf32>
    %33 = arith.mulf %29, %20 : vector<1x128xf32>
    %34 = arith.addf %33, %32 : vector<1x128xf32>
    %35 = math.tanh %34 : vector<1x128xf32>
    %36 = arith.mulf %30, %35 : vector<1x128xf32>
    %37 = math.tanh %36 : vector<1x128xf32>
    %c0_20 = arith.constant 0 : index
    %c0_21 = arith.constant 0 : index
    %c0_22 = arith.constant 0 : index
    %38 = vector.load %arg4[%c0_20, %c0_21, %c0_22] : memref<15x128x32xf32, #tpu.memory_space<vmem>>, vector<1x128x32xf32>
    %39 = vector.shape_cast %38 : vector<1x128x32xf32> to vector<128x32xf32>
    %cst_23 = arith.constant dense<0.000000e+00> : vector<1x32xf32>
    %40 = tpu.matmul %37, %39, %cst_23 {dimension_numbers = #tpu.dot_dimension_numbers<[1], [0], [0], [1], [0, 0, 1, 1], [], []>} : vector<1x128xf32>, vector<128x32xf32>, vector<1x32xf32> -> vector<1x32xf32>
    %41 = arith.addf %21, %40 : vector<1x32xf32>
    %c1 = arith.constant 1 : index
    %c0_24 = arith.constant 0 : index
    %42 = vector.load %arg7[%c1, %c0_24] : memref<15x128xf32, #tpu.memory_space<vmem>>, vector<1x128xf32>
    %c0_25 = arith.constant 0 : index
    %c0_26 = arith.constant 0 : index
    %43 = vector.load %arg2[%c0_25, %c0_26] : memref<128x128xf32, #tpu.memory_space<vmem>>, vector<128x128xf32>
    %cst_27 = arith.constant dense<0.000000e+00> : vector<1x128xf32>
    %44 = tpu.matmul %36, %43, %cst_27 {dimension_numbers = #tpu.dot_dimension_numbers<[1], [0], [0], [1], [0, 0, 1, 1], [], []>} : vector<1x128xf32>, vector<128x128xf32>, vector<1x128xf32> -> vector<1x128xf32>
    %45 = arith.addf %42, %44 : vector<1x128xf32>
    %46 = arith.mulf %45, %15 : vector<1x128xf32>
    %47 = math.tanh %46 : vector<1x128xf32>
    %48 = arith.mulf %47, %15 : vector<1x128xf32>
    %49 = arith.addf %48, %18 : vector<1x128xf32>
    %c64_i32_28 = arith.constant 64 : i32
    %50 = tpu.dynamic_rotate %49 by %c64_i32_28 dim 1 : vector<1x128xf32>, i32 -> vector<1x128xf32>
    %51 = arith.mulf %49, %50 : vector<1x128xf32>
    %c32_i32_29 = arith.constant 32 : i32
    %52 = tpu.dynamic_rotate %51 by %c32_i32_29 dim 1 : vector<1x128xf32>, i32 -> vector<1x128xf32>
    %53 = arith.mulf %49, %34 : vector<1x128xf32>
    %54 = arith.addf %53, %52 : vector<1x128xf32>
    %55 = math.tanh %54 : vector<1x128xf32>
    %56 = arith.mulf %50, %55 : vector<1x128xf32>
    %57 = math.tanh %56 : vector<1x128xf32>
    %c1_30 = arith.constant 1 : index
    %c0_31 = arith.constant 0 : index
    %c0_32 = arith.constant 0 : index
    %58 = vector.load %arg4[%c1_30, %c0_31, %c0_32] : memref<15x128x32xf32, #tpu.memory_space<vmem>>, vector<1x128x32xf32>
    %59 = vector.shape_cast %58 : vector<1x128x32xf32> to vector<128x32xf32>
    %cst_33 = arith.constant dense<0.000000e+00> : vector<1x32xf32>
    %60 = tpu.matmul %57, %59, %cst_33 {dimension_numbers = #tpu.dot_dimension_numbers<[1], [0], [0], [1], [0, 0, 1, 1], [], []>} : vector<1x128xf32>, vector<128x32xf32>, vector<1x32xf32> -> vector<1x32xf32>
    %61 = arith.addf %41, %60 : vector<1x32xf32>
    %c2 = arith.constant 2 : index
    %c0_34 = arith.constant 0 : index
    %62 = vector.load %arg7[%c2, %c0_34] : memref<15x128xf32, #tpu.memory_space<vmem>>, vector<1x128xf32>
    %c0_35 = arith.constant 0 : index
    %c0_36 = arith.constant 0 : index
    %63 = vector.load %arg2[%c0_35, %c0_36] : memref<128x128xf32, #tpu.memory_space<vmem>>, vector<128x128xf32>
    %cst_37 = arith.constant dense<0.000000e+00> : vector<1x128xf32>
    %64 = tpu.matmul %56, %63, %cst_37 {dimension_numbers = #tpu.dot_dimension_numbers<[1], [0], [0], [1], [0, 0, 1, 1], [], []>} : vector<1x128xf32>, vector<128x128xf32>, vector<1x128xf32> -> vector<1x128xf32>
    %65 = arith.addf %62, %64 : vector<1x128xf32>
    %66 = arith.mulf %65, %15 : vector<1x128xf32>
    %67 = math.tanh %66 : vector<1x128xf32>
    %68 = arith.mulf %67, %15 : vector<1x128xf32>
    %69 = arith.addf %68, %18 : vector<1x128xf32>
    %c64_i32_38 = arith.constant 64 : i32
    %70 = tpu.dynamic_rotate %69 by %c64_i32_38 dim 1 : vector<1x128xf32>, i32 -> vector<1x128xf32>
    %71 = arith.mulf %69, %70 : vector<1x128xf32>
    %c32_i32_39 = arith.constant 32 : i32
    %72 = tpu.dynamic_rotate %71 by %c32_i32_39 dim 1 : vector<1x128xf32>, i32 -> vector<1x128xf32>
    %73 = arith.mulf %69, %54 : vector<1x128xf32>
    %74 = arith.addf %73, %72 : vector<1x128xf32>
    %75 = math.tanh %74 : vector<1x128xf32>
    %76 = arith.mulf %70, %75 : vector<1x128xf32>
    %77 = math.tanh %76 : vector<1x128xf32>
    %c2_40 = arith.constant 2 : index
    %c0_41 = arith.constant 0 : index
    %c0_42 = arith.constant 0 : index
    %78 = vector.load %arg4[%c2_40, %c0_41, %c0_42] : memref<15x128x32xf32, #tpu.memory_space<vmem>>, vector<1x128x32xf32>
    %79 = vector.shape_cast %78 : vector<1x128x32xf32> to vector<128x32xf32>
    %cst_43 = arith.constant dense<0.000000e+00> : vector<1x32xf32>
    %80 = tpu.matmul %77, %79, %cst_43 {dimension_numbers = #tpu.dot_dimension_numbers<[1], [0], [0], [1], [0, 0, 1, 1], [], []>} : vector<1x128xf32>, vector<128x32xf32>, vector<1x32xf32> -> vector<1x32xf32>
    %81 = arith.addf %61, %80 : vector<1x32xf32>
    %c3 = arith.constant 3 : index
    %c0_44 = arith.constant 0 : index
    %82 = vector.load %arg7[%c3, %c0_44] : memref<15x128xf32, #tpu.memory_space<vmem>>, vector<1x128xf32>
    %c0_45 = arith.constant 0 : index
    %c0_46 = arith.constant 0 : index
    %83 = vector.load %arg2[%c0_45, %c0_46] : memref<128x128xf32, #tpu.memory_space<vmem>>, vector<128x128xf32>
    %cst_47 = arith.constant dense<0.000000e+00> : vector<1x128xf32>
    %84 = tpu.matmul %76, %83, %cst_47 {dimension_numbers = #tpu.dot_dimension_numbers<[1], [0], [0], [1], [0, 0, 1, 1], [], []>} : vector<1x128xf32>, vector<128x128xf32>, vector<1x128xf32> -> vector<1x128xf32>
    %85 = arith.addf %82, %84 : vector<1x128xf32>
    %86 = arith.mulf %85, %15 : vector<1x128xf32>
    %87 = math.tanh %86 : vector<1x128xf32>
    %88 = arith.mulf %87, %15 : vector<1x128xf32>
    %89 = arith.addf %88, %18 : vector<1x128xf32>
    %c64_i32_48 = arith.constant 64 : i32
    %90 = tpu.dynamic_rotate %89 by %c64_i32_48 dim 1 : vector<1x128xf32>, i32 -> vector<1x128xf32>
    %91 = arith.mulf %89, %90 : vector<1x128xf32>
    %c32_i32_49 = arith.constant 32 : i32
    %92 = tpu.dynamic_rotate %91 by %c32_i32_49 dim 1 : vector<1x128xf32>, i32 -> vector<1x128xf32>
    %93 = arith.mulf %89, %74 : vector<1x128xf32>
    %94 = arith.addf %93, %92 : vector<1x128xf32>
    %95 = math.tanh %94 : vector<1x128xf32>
    %96 = arith.mulf %90, %95 : vector<1x128xf32>
    %97 = math.tanh %96 : vector<1x128xf32>
    %c3_50 = arith.constant 3 : index
    %c0_51 = arith.constant 0 : index
    %c0_52 = arith.constant 0 : index
    %98 = vector.load %arg4[%c3_50, %c0_51, %c0_52] : memref<15x128x32xf32, #tpu.memory_space<vmem>>, vector<1x128x32xf32>
    %99 = vector.shape_cast %98 : vector<1x128x32xf32> to vector<128x32xf32>
    %cst_53 = arith.constant dense<0.000000e+00> : vector<1x32xf32>
    %100 = tpu.matmul %97, %99, %cst_53 {dimension_numbers = #tpu.dot_dimension_numbers<[1], [0], [0], [1], [0, 0, 1, 1], [], []>} : vector<1x128xf32>, vector<128x32xf32>, vector<1x32xf32> -> vector<1x32xf32>
    %101 = arith.addf %81, %100 : vector<1x32xf32>
    %c4 = arith.constant 4 : index
    %c0_54 = arith.constant 0 : index
    %102 = vector.load %arg7[%c4, %c0_54] : memref<15x128xf32, #tpu.memory_space<vmem>>, vector<1x128xf32>
    %c0_55 = arith.constant 0 : index
    %c0_56 = arith.constant 0 : index
    %103 = vector.load %arg2[%c0_55, %c0_56] : memref<128x128xf32, #tpu.memory_space<vmem>>, vector<128x128xf32>
    %cst_57 = arith.constant dense<0.000000e+00> : vector<1x128xf32>
    %104 = tpu.matmul %96, %103, %cst_57 {dimension_numbers = #tpu.dot_dimension_numbers<[1], [0], [0], [1], [0, 0, 1, 1], [], []>} : vector<1x128xf32>, vector<128x128xf32>, vector<1x128xf32> -> vector<1x128xf32>
    %105 = arith.addf %102, %104 : vector<1x128xf32>
    %106 = arith.mulf %105, %15 : vector<1x128xf32>
    %107 = math.tanh %106 : vector<1x128xf32>
    %108 = arith.mulf %107, %15 : vector<1x128xf32>
    %109 = arith.addf %108, %18 : vector<1x128xf32>
    %c64_i32_58 = arith.constant 64 : i32
    %110 = tpu.dynamic_rotate %109 by %c64_i32_58 dim 1 : vector<1x128xf32>, i32 -> vector<1x128xf32>
    %111 = arith.mulf %109, %110 : vector<1x128xf32>
    %c32_i32_59 = arith.constant 32 : i32
    %112 = tpu.dynamic_rotate %111 by %c32_i32_59 dim 1 : vector<1x128xf32>, i32 -> vector<1x128xf32>
    %113 = arith.mulf %109, %94 : vector<1x128xf32>
    %114 = arith.addf %113, %112 : vector<1x128xf32>
    %115 = math.tanh %114 : vector<1x128xf32>
    %116 = arith.mulf %110, %115 : vector<1x128xf32>
    %117 = math.tanh %116 : vector<1x128xf32>
    %c4_60 = arith.constant 4 : index
    %c0_61 = arith.constant 0 : index
    %c0_62 = arith.constant 0 : index
    %118 = vector.load %arg4[%c4_60, %c0_61, %c0_62] : memref<15x128x32xf32, #tpu.memory_space<vmem>>, vector<1x128x32xf32>
    %119 = vector.shape_cast %118 : vector<1x128x32xf32> to vector<128x32xf32>
    %cst_63 = arith.constant dense<0.000000e+00> : vector<1x32xf32>
    %120 = tpu.matmul %117, %119, %cst_63 {dimension_numbers = #tpu.dot_dimension_numbers<[1], [0], [0], [1], [0, 0, 1, 1], [], []>} : vector<1x128xf32>, vector<128x32xf32>, vector<1x32xf32> -> vector<1x32xf32>
    %121 = arith.addf %101, %120 : vector<1x32xf32>
    %c5 = arith.constant 5 : index
    %c0_64 = arith.constant 0 : index
    %122 = vector.load %arg7[%c5, %c0_64] : memref<15x128xf32, #tpu.memory_space<vmem>>, vector<1x128xf32>
    %c0_65 = arith.constant 0 : index
    %c0_66 = arith.constant 0 : index
    %123 = vector.load %arg2[%c0_65, %c0_66] : memref<128x128xf32, #tpu.memory_space<vmem>>, vector<128x128xf32>
    %cst_67 = arith.constant dense<0.000000e+00> : vector<1x128xf32>
    %124 = tpu.matmul %116, %123, %cst_67 {dimension_numbers = #tpu.dot_dimension_numbers<[1], [0], [0], [1], [0, 0, 1, 1], [], []>} : vector<1x128xf32>, vector<128x128xf32>, vector<1x128xf32> -> vector<1x128xf32>
    %125 = arith.addf %122, %124 : vector<1x128xf32>
    %126 = arith.mulf %125, %15 : vector<1x128xf32>
    %127 = math.tanh %126 : vector<1x128xf32>
    %128 = arith.mulf %127, %15 : vector<1x128xf32>
    %129 = arith.addf %128, %18 : vector<1x128xf32>
    %c64_i32_68 = arith.constant 64 : i32
    %130 = tpu.dynamic_rotate %129 by %c64_i32_68 dim 1 : vector<1x128xf32>, i32 -> vector<1x128xf32>
    %131 = arith.mulf %129, %130 : vector<1x128xf32>
    %c32_i32_69 = arith.constant 32 : i32
    %132 = tpu.dynamic_rotate %131 by %c32_i32_69 dim 1 : vector<1x128xf32>, i32 -> vector<1x128xf32>
    %133 = arith.mulf %129, %114 : vector<1x128xf32>
    %134 = arith.addf %133, %132 : vector<1x128xf32>
    %135 = math.tanh %134 : vector<1x128xf32>
    %136 = arith.mulf %130, %135 : vector<1x128xf32>
    %137 = math.tanh %136 : vector<1x128xf32>
    %c5_70 = arith.constant 5 : index
    %c0_71 = arith.constant 0 : index
    %c0_72 = arith.constant 0 : index
    %138 = vector.load %arg4[%c5_70, %c0_71, %c0_72] : memref<15x128x32xf32, #tpu.memory_space<vmem>>, vector<1x128x32xf32>
    %139 = vector.shape_cast %138 : vector<1x128x32xf32> to vector<128x32xf32>
    %cst_73 = arith.constant dense<0.000000e+00> : vector<1x32xf32>
    %140 = tpu.matmul %137, %139, %cst_73 {dimension_numbers = #tpu.dot_dimension_numbers<[1], [0], [0], [1], [0, 0, 1, 1], [], []>} : vector<1x128xf32>, vector<128x32xf32>, vector<1x32xf32> -> vector<1x32xf32>
    %141 = arith.addf %121, %140 : vector<1x32xf32>
    %c6 = arith.constant 6 : index
    %c0_74 = arith.constant 0 : index
    %142 = vector.load %arg7[%c6, %c0_74] : memref<15x128xf32, #tpu.memory_space<vmem>>, vector<1x128xf32>
    %c0_75 = arith.constant 0 : index
    %c0_76 = arith.constant 0 : index
    %143 = vector.load %arg2[%c0_75, %c0_76] : memref<128x128xf32, #tpu.memory_space<vmem>>, vector<128x128xf32>
    %cst_77 = arith.constant dense<0.000000e+00> : vector<1x128xf32>
    %144 = tpu.matmul %136, %143, %cst_77 {dimension_numbers = #tpu.dot_dimension_numbers<[1], [0], [0], [1], [0, 0, 1, 1], [], []>} : vector<1x128xf32>, vector<128x128xf32>, vector<1x128xf32> -> vector<1x128xf32>
    %145 = arith.addf %142, %144 : vector<1x128xf32>
    %146 = arith.mulf %145, %15 : vector<1x128xf32>
    %147 = math.tanh %146 : vector<1x128xf32>
    %148 = arith.mulf %147, %15 : vector<1x128xf32>
    %149 = arith.addf %148, %18 : vector<1x128xf32>
    %c64_i32_78 = arith.constant 64 : i32
    %150 = tpu.dynamic_rotate %149 by %c64_i32_78 dim 1 : vector<1x128xf32>, i32 -> vector<1x128xf32>
    %151 = arith.mulf %149, %150 : vector<1x128xf32>
    %c32_i32_79 = arith.constant 32 : i32
    %152 = tpu.dynamic_rotate %151 by %c32_i32_79 dim 1 : vector<1x128xf32>, i32 -> vector<1x128xf32>
    %153 = arith.mulf %149, %134 : vector<1x128xf32>
    %154 = arith.addf %153, %152 : vector<1x128xf32>
    %155 = math.tanh %154 : vector<1x128xf32>
    %156 = arith.mulf %150, %155 : vector<1x128xf32>
    %157 = math.tanh %156 : vector<1x128xf32>
    %c6_80 = arith.constant 6 : index
    %c0_81 = arith.constant 0 : index
    %c0_82 = arith.constant 0 : index
    %158 = vector.load %arg4[%c6_80, %c0_81, %c0_82] : memref<15x128x32xf32, #tpu.memory_space<vmem>>, vector<1x128x32xf32>
    %159 = vector.shape_cast %158 : vector<1x128x32xf32> to vector<128x32xf32>
    %cst_83 = arith.constant dense<0.000000e+00> : vector<1x32xf32>
    %160 = tpu.matmul %157, %159, %cst_83 {dimension_numbers = #tpu.dot_dimension_numbers<[1], [0], [0], [1], [0, 0, 1, 1], [], []>} : vector<1x128xf32>, vector<128x32xf32>, vector<1x32xf32> -> vector<1x32xf32>
    %161 = arith.addf %141, %160 : vector<1x32xf32>
    %c7 = arith.constant 7 : index
    %c0_84 = arith.constant 0 : index
    %162 = vector.load %arg7[%c7, %c0_84] : memref<15x128xf32, #tpu.memory_space<vmem>>, vector<1x128xf32>
    %c0_85 = arith.constant 0 : index
    %c0_86 = arith.constant 0 : index
    %163 = vector.load %arg2[%c0_85, %c0_86] : memref<128x128xf32, #tpu.memory_space<vmem>>, vector<128x128xf32>
    %cst_87 = arith.constant dense<0.000000e+00> : vector<1x128xf32>
    %164 = tpu.matmul %156, %163, %cst_87 {dimension_numbers = #tpu.dot_dimension_numbers<[1], [0], [0], [1], [0, 0, 1, 1], [], []>} : vector<1x128xf32>, vector<128x128xf32>, vector<1x128xf32> -> vector<1x128xf32>
    %165 = arith.addf %162, %164 : vector<1x128xf32>
    %166 = arith.mulf %165, %15 : vector<1x128xf32>
    %167 = math.tanh %166 : vector<1x128xf32>
    %168 = arith.mulf %167, %15 : vector<1x128xf32>
    %169 = arith.addf %168, %18 : vector<1x128xf32>
    %c64_i32_88 = arith.constant 64 : i32
    %170 = tpu.dynamic_rotate %169 by %c64_i32_88 dim 1 : vector<1x128xf32>, i32 -> vector<1x128xf32>
    %171 = arith.mulf %169, %170 : vector<1x128xf32>
    %c32_i32_89 = arith.constant 32 : i32
    %172 = tpu.dynamic_rotate %171 by %c32_i32_89 dim 1 : vector<1x128xf32>, i32 -> vector<1x128xf32>
    %173 = arith.mulf %169, %154 : vector<1x128xf32>
    %174 = arith.addf %173, %172 : vector<1x128xf32>
    %175 = math.tanh %174 : vector<1x128xf32>
    %176 = arith.mulf %170, %175 : vector<1x128xf32>
    %177 = math.tanh %176 : vector<1x128xf32>
    %c7_90 = arith.constant 7 : index
    %c0_91 = arith.constant 0 : index
    %c0_92 = arith.constant 0 : index
    %178 = vector.load %arg4[%c7_90, %c0_91, %c0_92] : memref<15x128x32xf32, #tpu.memory_space<vmem>>, vector<1x128x32xf32>
    %179 = vector.shape_cast %178 : vector<1x128x32xf32> to vector<128x32xf32>
    %cst_93 = arith.constant dense<0.000000e+00> : vector<1x32xf32>
    %180 = tpu.matmul %177, %179, %cst_93 {dimension_numbers = #tpu.dot_dimension_numbers<[1], [0], [0], [1], [0, 0, 1, 1], [], []>} : vector<1x128xf32>, vector<128x32xf32>, vector<1x32xf32> -> vector<1x32xf32>
    %181 = arith.addf %161, %180 : vector<1x32xf32>
    %c8 = arith.constant 8 : index
    %c0_94 = arith.constant 0 : index
    %182 = vector.load %arg7[%c8, %c0_94] : memref<15x128xf32, #tpu.memory_space<vmem>>, vector<1x128xf32>
    %c0_95 = arith.constant 0 : index
    %c0_96 = arith.constant 0 : index
    %183 = vector.load %arg2[%c0_95, %c0_96] : memref<128x128xf32, #tpu.memory_space<vmem>>, vector<128x128xf32>
    %cst_97 = arith.constant dense<0.000000e+00> : vector<1x128xf32>
    %184 = tpu.matmul %176, %183, %cst_97 {dimension_numbers = #tpu.dot_dimension_numbers<[1], [0], [0], [1], [0, 0, 1, 1], [], []>} : vector<1x128xf32>, vector<128x128xf32>, vector<1x128xf32> -> vector<1x128xf32>
    %185 = arith.addf %182, %184 : vector<1x128xf32>
    %186 = arith.mulf %185, %15 : vector<1x128xf32>
    %187 = math.tanh %186 : vector<1x128xf32>
    %188 = arith.mulf %187, %15 : vector<1x128xf32>
    %189 = arith.addf %188, %18 : vector<1x128xf32>
    %c64_i32_98 = arith.constant 64 : i32
    %190 = tpu.dynamic_rotate %189 by %c64_i32_98 dim 1 : vector<1x128xf32>, i32 -> vector<1x128xf32>
    %191 = arith.mulf %189, %190 : vector<1x128xf32>
    %c32_i32_99 = arith.constant 32 : i32
    %192 = tpu.dynamic_rotate %191 by %c32_i32_99 dim 1 : vector<1x128xf32>, i32 -> vector<1x128xf32>
    %193 = arith.mulf %189, %174 : vector<1x128xf32>
    %194 = arith.addf %193, %192 : vector<1x128xf32>
    %195 = math.tanh %194 : vector<1x128xf32>
    %196 = arith.mulf %190, %195 : vector<1x128xf32>
    %197 = math.tanh %196 : vector<1x128xf32>
    %c8_100 = arith.constant 8 : index
    %c0_101 = arith.constant 0 : index
    %c0_102 = arith.constant 0 : index
    %198 = vector.load %arg4[%c8_100, %c0_101, %c0_102] : memref<15x128x32xf32, #tpu.memory_space<vmem>>, vector<1x128x32xf32>
    %199 = vector.shape_cast %198 : vector<1x128x32xf32> to vector<128x32xf32>
    %cst_103 = arith.constant dense<0.000000e+00> : vector<1x32xf32>
    %200 = tpu.matmul %197, %199, %cst_103 {dimension_numbers = #tpu.dot_dimension_numbers<[1], [0], [0], [1], [0, 0, 1, 1], [], []>} : vector<1x128xf32>, vector<128x32xf32>, vector<1x32xf32> -> vector<1x32xf32>
    %201 = arith.addf %181, %200 : vector<1x32xf32>
    %c9 = arith.constant 9 : index
    %c0_104 = arith.constant 0 : index
    %202 = vector.load %arg7[%c9, %c0_104] : memref<15x128xf32, #tpu.memory_space<vmem>>, vector<1x128xf32>
    %c0_105 = arith.constant 0 : index
    %c0_106 = arith.constant 0 : index
    %203 = vector.load %arg2[%c0_105, %c0_106] : memref<128x128xf32, #tpu.memory_space<vmem>>, vector<128x128xf32>
    %cst_107 = arith.constant dense<0.000000e+00> : vector<1x128xf32>
    %204 = tpu.matmul %196, %203, %cst_107 {dimension_numbers = #tpu.dot_dimension_numbers<[1], [0], [0], [1], [0, 0, 1, 1], [], []>} : vector<1x128xf32>, vector<128x128xf32>, vector<1x128xf32> -> vector<1x128xf32>
    %205 = arith.addf %202, %204 : vector<1x128xf32>
    %206 = arith.mulf %205, %15 : vector<1x128xf32>
    %207 = math.tanh %206 : vector<1x128xf32>
    %208 = arith.mulf %207, %15 : vector<1x128xf32>
    %209 = arith.addf %208, %18 : vector<1x128xf32>
    %c64_i32_108 = arith.constant 64 : i32
    %210 = tpu.dynamic_rotate %209 by %c64_i32_108 dim 1 : vector<1x128xf32>, i32 -> vector<1x128xf32>
    %211 = arith.mulf %209, %210 : vector<1x128xf32>
    %c32_i32_109 = arith.constant 32 : i32
    %212 = tpu.dynamic_rotate %211 by %c32_i32_109 dim 1 : vector<1x128xf32>, i32 -> vector<1x128xf32>
    %213 = arith.mulf %209, %194 : vector<1x128xf32>
    %214 = arith.addf %213, %212 : vector<1x128xf32>
    %215 = math.tanh %214 : vector<1x128xf32>
    %216 = arith.mulf %210, %215 : vector<1x128xf32>
    %217 = math.tanh %216 : vector<1x128xf32>
    %c9_110 = arith.constant 9 : index
    %c0_111 = arith.constant 0 : index
    %c0_112 = arith.constant 0 : index
    %218 = vector.load %arg4[%c9_110, %c0_111, %c0_112] : memref<15x128x32xf32, #tpu.memory_space<vmem>>, vector<1x128x32xf32>
    %219 = vector.shape_cast %218 : vector<1x128x32xf32> to vector<128x32xf32>
    %cst_113 = arith.constant dense<0.000000e+00> : vector<1x32xf32>
    %220 = tpu.matmul %217, %219, %cst_113 {dimension_numbers = #tpu.dot_dimension_numbers<[1], [0], [0], [1], [0, 0, 1, 1], [], []>} : vector<1x128xf32>, vector<128x32xf32>, vector<1x32xf32> -> vector<1x32xf32>
    %221 = arith.addf %201, %220 : vector<1x32xf32>
    %c10 = arith.constant 10 : index
    %c0_114 = arith.constant 0 : index
    %222 = vector.load %arg7[%c10, %c0_114] : memref<15x128xf32, #tpu.memory_space<vmem>>, vector<1x128xf32>
    %c0_115 = arith.constant 0 : index
    %c0_116 = arith.constant 0 : index
    %223 = vector.load %arg2[%c0_115, %c0_116] : memref<128x128xf32, #tpu.memory_space<vmem>>, vector<128x128xf32>
    %cst_117 = arith.constant dense<0.000000e+00> : vector<1x128xf32>
    %224 = tpu.matmul %216, %223, %cst_117 {dimension_numbers = #tpu.dot_dimension_numbers<[1], [0], [0], [1], [0, 0, 1, 1], [], []>} : vector<1x128xf32>, vector<128x128xf32>, vector<1x128xf32> -> vector<1x128xf32>
    %225 = arith.addf %222, %224 : vector<1x128xf32>
    %226 = arith.mulf %225, %15 : vector<1x128xf32>
    %227 = math.tanh %226 : vector<1x128xf32>
    %228 = arith.mulf %227, %15 : vector<1x128xf32>
    %229 = arith.addf %228, %18 : vector<1x128xf32>
    %c64_i32_118 = arith.constant 64 : i32
    %230 = tpu.dynamic_rotate %229 by %c64_i32_118 dim 1 : vector<1x128xf32>, i32 -> vector<1x128xf32>
    %231 = arith.mulf %229, %230 : vector<1x128xf32>
    %c32_i32_119 = arith.constant 32 : i32
    %232 = tpu.dynamic_rotate %231 by %c32_i32_119 dim 1 : vector<1x128xf32>, i32 -> vector<1x128xf32>
    %233 = arith.mulf %229, %214 : vector<1x128xf32>
    %234 = arith.addf %233, %232 : vector<1x128xf32>
    %235 = math.tanh %234 : vector<1x128xf32>
    %236 = arith.mulf %230, %235 : vector<1x128xf32>
    %237 = math.tanh %236 : vector<1x128xf32>
    %c10_120 = arith.constant 10 : index
    %c0_121 = arith.constant 0 : index
    %c0_122 = arith.constant 0 : index
    %238 = vector.load %arg4[%c10_120, %c0_121, %c0_122] : memref<15x128x32xf32, #tpu.memory_space<vmem>>, vector<1x128x32xf32>
    %239 = vector.shape_cast %238 : vector<1x128x32xf32> to vector<128x32xf32>
    %cst_123 = arith.constant dense<0.000000e+00> : vector<1x32xf32>
    %240 = tpu.matmul %237, %239, %cst_123 {dimension_numbers = #tpu.dot_dimension_numbers<[1], [0], [0], [1], [0, 0, 1, 1], [], []>} : vector<1x128xf32>, vector<128x32xf32>, vector<1x32xf32> -> vector<1x32xf32>
    %241 = arith.addf %221, %240 : vector<1x32xf32>
    %c11 = arith.constant 11 : index
    %c0_124 = arith.constant 0 : index
    %242 = vector.load %arg7[%c11, %c0_124] : memref<15x128xf32, #tpu.memory_space<vmem>>, vector<1x128xf32>
    %c0_125 = arith.constant 0 : index
    %c0_126 = arith.constant 0 : index
    %243 = vector.load %arg2[%c0_125, %c0_126] : memref<128x128xf32, #tpu.memory_space<vmem>>, vector<128x128xf32>
    %cst_127 = arith.constant dense<0.000000e+00> : vector<1x128xf32>
    %244 = tpu.matmul %236, %243, %cst_127 {dimension_numbers = #tpu.dot_dimension_numbers<[1], [0], [0], [1], [0, 0, 1, 1], [], []>} : vector<1x128xf32>, vector<128x128xf32>, vector<1x128xf32> -> vector<1x128xf32>
    %245 = arith.addf %242, %244 : vector<1x128xf32>
    %246 = arith.mulf %245, %15 : vector<1x128xf32>
    %247 = math.tanh %246 : vector<1x128xf32>
    %248 = arith.mulf %247, %15 : vector<1x128xf32>
    %249 = arith.addf %248, %18 : vector<1x128xf32>
    %c64_i32_128 = arith.constant 64 : i32
    %250 = tpu.dynamic_rotate %249 by %c64_i32_128 dim 1 : vector<1x128xf32>, i32 -> vector<1x128xf32>
    %251 = arith.mulf %249, %250 : vector<1x128xf32>
    %c32_i32_129 = arith.constant 32 : i32
    %252 = tpu.dynamic_rotate %251 by %c32_i32_129 dim 1 : vector<1x128xf32>, i32 -> vector<1x128xf32>
    %253 = arith.mulf %249, %234 : vector<1x128xf32>
    %254 = arith.addf %253, %252 : vector<1x128xf32>
    %255 = math.tanh %254 : vector<1x128xf32>
    %256 = arith.mulf %250, %255 : vector<1x128xf32>
    %257 = math.tanh %256 : vector<1x128xf32>
    %c11_130 = arith.constant 11 : index
    %c0_131 = arith.constant 0 : index
    %c0_132 = arith.constant 0 : index
    %258 = vector.load %arg4[%c11_130, %c0_131, %c0_132] : memref<15x128x32xf32, #tpu.memory_space<vmem>>, vector<1x128x32xf32>
    %259 = vector.shape_cast %258 : vector<1x128x32xf32> to vector<128x32xf32>
    %cst_133 = arith.constant dense<0.000000e+00> : vector<1x32xf32>
    %260 = tpu.matmul %257, %259, %cst_133 {dimension_numbers = #tpu.dot_dimension_numbers<[1], [0], [0], [1], [0, 0, 1, 1], [], []>} : vector<1x128xf32>, vector<128x32xf32>, vector<1x32xf32> -> vector<1x32xf32>
    %261 = arith.addf %241, %260 : vector<1x32xf32>
    %c12 = arith.constant 12 : index
    %c0_134 = arith.constant 0 : index
    %262 = vector.load %arg7[%c12, %c0_134] : memref<15x128xf32, #tpu.memory_space<vmem>>, vector<1x128xf32>
    %c0_135 = arith.constant 0 : index
    %c0_136 = arith.constant 0 : index
    %263 = vector.load %arg2[%c0_135, %c0_136] : memref<128x128xf32, #tpu.memory_space<vmem>>, vector<128x128xf32>
    %cst_137 = arith.constant dense<0.000000e+00> : vector<1x128xf32>
    %264 = tpu.matmul %256, %263, %cst_137 {dimension_numbers = #tpu.dot_dimension_numbers<[1], [0], [0], [1], [0, 0, 1, 1], [], []>} : vector<1x128xf32>, vector<128x128xf32>, vector<1x128xf32> -> vector<1x128xf32>
    %265 = arith.addf %262, %264 : vector<1x128xf32>
    %266 = arith.mulf %265, %15 : vector<1x128xf32>
    %267 = math.tanh %266 : vector<1x128xf32>
    %268 = arith.mulf %267, %15 : vector<1x128xf32>
    %269 = arith.addf %268, %18 : vector<1x128xf32>
    %c64_i32_138 = arith.constant 64 : i32
    %270 = tpu.dynamic_rotate %269 by %c64_i32_138 dim 1 : vector<1x128xf32>, i32 -> vector<1x128xf32>
    %271 = arith.mulf %269, %270 : vector<1x128xf32>
    %c32_i32_139 = arith.constant 32 : i32
    %272 = tpu.dynamic_rotate %271 by %c32_i32_139 dim 1 : vector<1x128xf32>, i32 -> vector<1x128xf32>
    %273 = arith.mulf %269, %254 : vector<1x128xf32>
    %274 = arith.addf %273, %272 : vector<1x128xf32>
    %275 = math.tanh %274 : vector<1x128xf32>
    %276 = arith.mulf %270, %275 : vector<1x128xf32>
    %277 = math.tanh %276 : vector<1x128xf32>
    %c12_140 = arith.constant 12 : index
    %c0_141 = arith.constant 0 : index
    %c0_142 = arith.constant 0 : index
    %278 = vector.load %arg4[%c12_140, %c0_141, %c0_142] : memref<15x128x32xf32, #tpu.memory_space<vmem>>, vector<1x128x32xf32>
    %279 = vector.shape_cast %278 : vector<1x128x32xf32> to vector<128x32xf32>
    %cst_143 = arith.constant dense<0.000000e+00> : vector<1x32xf32>
    %280 = tpu.matmul %277, %279, %cst_143 {dimension_numbers = #tpu.dot_dimension_numbers<[1], [0], [0], [1], [0, 0, 1, 1], [], []>} : vector<1x128xf32>, vector<128x32xf32>, vector<1x32xf32> -> vector<1x32xf32>
    %281 = arith.addf %261, %280 : vector<1x32xf32>
    %c13 = arith.constant 13 : index
    %c0_144 = arith.constant 0 : index
    %282 = vector.load %arg7[%c13, %c0_144] : memref<15x128xf32, #tpu.memory_space<vmem>>, vector<1x128xf32>
    %c0_145 = arith.constant 0 : index
    %c0_146 = arith.constant 0 : index
    %283 = vector.load %arg2[%c0_145, %c0_146] : memref<128x128xf32, #tpu.memory_space<vmem>>, vector<128x128xf32>
    %cst_147 = arith.constant dense<0.000000e+00> : vector<1x128xf32>
    %284 = tpu.matmul %276, %283, %cst_147 {dimension_numbers = #tpu.dot_dimension_numbers<[1], [0], [0], [1], [0, 0, 1, 1], [], []>} : vector<1x128xf32>, vector<128x128xf32>, vector<1x128xf32> -> vector<1x128xf32>
    %285 = arith.addf %282, %284 : vector<1x128xf32>
    %286 = arith.mulf %285, %15 : vector<1x128xf32>
    %287 = math.tanh %286 : vector<1x128xf32>
    %288 = arith.mulf %287, %15 : vector<1x128xf32>
    %289 = arith.addf %288, %18 : vector<1x128xf32>
    %c64_i32_148 = arith.constant 64 : i32
    %290 = tpu.dynamic_rotate %289 by %c64_i32_148 dim 1 : vector<1x128xf32>, i32 -> vector<1x128xf32>
    %291 = arith.mulf %289, %290 : vector<1x128xf32>
    %c32_i32_149 = arith.constant 32 : i32
    %292 = tpu.dynamic_rotate %291 by %c32_i32_149 dim 1 : vector<1x128xf32>, i32 -> vector<1x128xf32>
    %293 = arith.mulf %289, %274 : vector<1x128xf32>
    %294 = arith.addf %293, %292 : vector<1x128xf32>
    %295 = math.tanh %294 : vector<1x128xf32>
    %296 = arith.mulf %290, %295 : vector<1x128xf32>
    %297 = math.tanh %296 : vector<1x128xf32>
    %c13_150 = arith.constant 13 : index
    %c0_151 = arith.constant 0 : index
    %c0_152 = arith.constant 0 : index
    %298 = vector.load %arg4[%c13_150, %c0_151, %c0_152] : memref<15x128x32xf32, #tpu.memory_space<vmem>>, vector<1x128x32xf32>
    %299 = vector.shape_cast %298 : vector<1x128x32xf32> to vector<128x32xf32>
    %cst_153 = arith.constant dense<0.000000e+00> : vector<1x32xf32>
    %300 = tpu.matmul %297, %299, %cst_153 {dimension_numbers = #tpu.dot_dimension_numbers<[1], [0], [0], [1], [0, 0, 1, 1], [], []>} : vector<1x128xf32>, vector<128x32xf32>, vector<1x32xf32> -> vector<1x32xf32>
    %301 = arith.addf %281, %300 : vector<1x32xf32>
    %c14 = arith.constant 14 : index
    %c0_154 = arith.constant 0 : index
    %302 = vector.load %arg7[%c14, %c0_154] : memref<15x128xf32, #tpu.memory_space<vmem>>, vector<1x128xf32>
    %c0_155 = arith.constant 0 : index
    %c0_156 = arith.constant 0 : index
    %303 = vector.load %arg2[%c0_155, %c0_156] : memref<128x128xf32, #tpu.memory_space<vmem>>, vector<128x128xf32>
    %cst_157 = arith.constant dense<0.000000e+00> : vector<1x128xf32>
    %304 = tpu.matmul %296, %303, %cst_157 {dimension_numbers = #tpu.dot_dimension_numbers<[1], [0], [0], [1], [0, 0, 1, 1], [], []>} : vector<1x128xf32>, vector<128x128xf32>, vector<1x128xf32> -> vector<1x128xf32>
    %305 = arith.addf %302, %304 : vector<1x128xf32>
    %306 = arith.mulf %305, %15 : vector<1x128xf32>
    %307 = math.tanh %306 : vector<1x128xf32>
    %308 = arith.mulf %307, %15 : vector<1x128xf32>
    %309 = arith.addf %308, %18 : vector<1x128xf32>
    %c64_i32_158 = arith.constant 64 : i32
    %310 = tpu.dynamic_rotate %309 by %c64_i32_158 dim 1 : vector<1x128xf32>, i32 -> vector<1x128xf32>
    %311 = arith.mulf %309, %310 : vector<1x128xf32>
    %c32_i32_159 = arith.constant 32 : i32
    %312 = tpu.dynamic_rotate %311 by %c32_i32_159 dim 1 : vector<1x128xf32>, i32 -> vector<1x128xf32>
    %313 = arith.mulf %309, %294 : vector<1x128xf32>
    %314 = arith.addf %313, %312 : vector<1x128xf32>
    %315 = math.tanh %314 : vector<1x128xf32>
    %316 = arith.mulf %310, %315 : vector<1x128xf32>
    %317 = math.tanh %316 : vector<1x128xf32>
    %c14_160 = arith.constant 14 : index
    %c0_161 = arith.constant 0 : index
    %c0_162 = arith.constant 0 : index
    %318 = vector.load %arg4[%c14_160, %c0_161, %c0_162] : memref<15x128x32xf32, #tpu.memory_space<vmem>>, vector<1x128x32xf32>
    %319 = vector.shape_cast %318 : vector<1x128x32xf32> to vector<128x32xf32>
    %cst_163 = arith.constant dense<0.000000e+00> : vector<1x32xf32>
    %320 = tpu.matmul %317, %319, %cst_163 {dimension_numbers = #tpu.dot_dimension_numbers<[1], [0], [0], [1], [0, 0, 1, 1], [], []>} : vector<1x128xf32>, vector<128x32xf32>, vector<1x32xf32> -> vector<1x32xf32>
    %321 = arith.addf %301, %320 : vector<1x32xf32>
    %c0_164 = arith.constant 0 : index
    %c0_165 = arith.constant 0 : index
    %322 = vector.load %arg5[%c0_164, %c0_165] : memref<1x32xf32, #tpu.memory_space<vmem>>, vector<1x32xf32>
    %323 = arith.addf %321, %322 : vector<1x32xf32>
    %324 = math.tanh %323 : vector<1x32xf32>
    %c0_166 = arith.constant 0 : index
    %c0_167 = arith.constant 0 : index
    %325 = vector.load %arg6[%c0_166, %c0_167] : memref<1x32xf32, #tpu.memory_space<vmem>>, vector<1x32xf32>
    tpu.vector_store %arg6[%c0_166, %c0_167], %324 {strides = array<i32>} : memref<1x32xf32, #tpu.memory_space<vmem>>, vector<1x32xf32>,
    return
  }
}

</mosaic_0001>

<bundles_post_ra>
// kernel: tpu_custom_call.1
= control target key start
LH: loop header
LB: loop body
LE: loop exit
PB: predicated region body
PF: predicated region fallthrough
CT: control target
= control target key end

     0   :  { %v4718_v1 = vmov 0.0   ;;  %vm4719_vm0 = vmmov 0   ;;  %vm35_vm1 = vcmask 130048   ;;  %s6698_s0 = inlined_call_operand.vmem [shape: f32[15,16], index: 0, kind: input, shape index: {}]   ;;  %s6699_s1 = inlined_call_operand.vmem [shape: f32[16,128], index: 1, kind: input, shape index: {}]   ;;  %s6700_s2 = inlined_call_operand.vmem [shape: f32[128,128], index: 2, kind: input, shape index: {}]   ;;  %s6701_s3 = inlined_call_operand.vmem [shape: f32[1,128], index: 3, kind: input, shape index: {}]   ;;  %s6702_s4 = inlined_call_operand.vmem [shape: f32[15,128,32], index: 4, kind: input, shape index: {}]   ;;  %s6703_s5 = inlined_call_operand.vmem [shape: f32[1,32], index: 5, kind: input, shape index: {}]   ;;  %s6704_s6 = inlined_call_operand.hbm [shape: f32[1,32], index: 6, kind: output, shape index: {}]  }
   0x1   :  { %v4762_v0 = vld [vmem:[%s6700_s2 + $0x78] sm:$0xff]  ;;  %3516 = vmatprep.subr.mxu1 %v4718_v1  ;;  %v4768_v2 = vld [vmem:[%s6700_s2 + $0x70] sm:$0xff]  ;;  %3548 = vmatprep.mubr.msk.f32.mxu1 %vm4719_vm0, %v4718_v1  ;;  %v27_v3 = vld [vmem:[%s6699_s1 + $0x8] sm:$0xff] }
   0x2   :  { %3517 = vmatpush3.msra.mxu1 %v4762_v0  ;;  %v4780_v4 = vld [vmem:[%s6700_s2 + $0x68] sm:$0xff]  ;;  %3509 = vmatprep.subr.mxu0 %v27_v3  ;;  %v26_v5 = vld [vmem:[%s6699_s1] sm:$0xff] }
   0x3   :  { %3518 = vmatprep.subr.mxu1 %v4718_v1  ;;  %3510 = vmatpush3.msra.mxu0 %v27_v3  ;;  %v24_v6 = vld [vmem:[%s6698_s0] sm:$0xff]  ;;  %v25_v8 = vld [vmem:[%s6698_s0 + $0x8] sm:$0x7f] }
   0x4   :  { %3519 = vmatpush3.msra.mxu1 %v4768_v2  ;;  %v4793_v7 = vld [vmem:[%s6700_s2 + $0x60] sm:$0xff]  ;;  %3511 = vmatprep.subr.mxu0 %v26_v5 }
   0x5   :  { %3520 = vmatprep.subr.mxu1 %v4718_v1  ;;  %3512 = vmatpush3.msra.mxu0 %v26_v5 }
   0x6   :  { %3521 = vmatpush3.msra.mxu1 %v4780_v4 }
   0x7   :  { %11 = vsyncpa [#allocation4], 0  ;;  %3522 = vmatprep.subr.mxu1 %v4718_v1  ;;  %v4803_v9 = vld [vmem:[%s6700_s2 + $0x58] sm:$0xff]  ;;  %3513 = vmatprep.mubr.msk.f32.mxu0 %vm35_vm1, %v24_v6  ;;  %v4810_v10 = vld [vmem:[%s6700_s2 + $0x50] sm:$0xff]  ;;  %v119_v26 = vlaneseq  ;;  %v4720_v28 = vmov 0.5   ;;  %s4722_s1 = smov 32  }
   0x8   :  { %3523 = vmatpush3.msra.mxu1 %v4793_v7  ;;  %3514 = vmatmul.mubr.msk.f32.vlgmr.msra.gmra.mxu0 %vm35_vm1, %v25_v8  ;;  %v4819_v11 = vld [vmem:[%s6700_s2 + $0x48] sm:$0xff]  ;;  %v4828_v12 = vld [vmem:[%s6700_s2 + $0x40] sm:$0xff]  ;;  %v4837_v13 = vld [vmem:[%s6700_s2 + $0x38] sm:$0xff]  ;;  %vm2752_vm5 = vcmask 253952  }
   0x9   :  { %3524 = vmatprep.subr.mxu1 %v4718_v1  ;;  %3551 = vmatprep.subr.mxu0 %v4718_v1  ;;  %v4846_v14 = vld [vmem:[%s6700_s2 + $0x30] sm:$0xff]  ;;  %v4855_v15 = vld [vmem:[%s6700_s2 + $0x28] sm:$0xff]  ;;  %v4864_v16 = vld [vmem:[%s6700_s2 + $0x20] sm:$0xff]  ;;  %v120_v27 = vand.u32 127, %v119_v26 }
   0xa   :  { %3525 = vmatpush3.msra.mxu1 %v4803_v9  ;;  %3552 = vmatpush3.msra.mxu0 %v4762_v0  ;;  %v4873_v17 = vld [vmem:[%s6700_s2 + $0x18] sm:$0xff]  ;;  %v4882_v18 = vld [vmem:[%s6700_s2 + $0x10] sm:$0xff]  ;;  %v4891_v19 = vld [vmem:[%s6700_s2 + $0x8] sm:$0xff] }
   0xb   :  { %3526 = vmatprep.subr.mxu1 %v4718_v1  ;;  %3553 = vmatprep.subr.mxu0 %v4718_v1  ;;  %v4900_v20 = vld [vmem:[%s6700_s2] sm:$0xff]  ;;  %vm121_vm2 = vcmp.ge.s32.totalorder %v120_v27, 64  ;;  %vm122_vm3 = vcmp.lt.s32.totalorder %v120_v27, 96  ;;  %v243_v46 = vld [vmem:[%s6702_s4 + $0x78] sm:$0xff]  ;;  %v242_v47 = vld [vmem:[%s6702_s4 + $0x70] sm:$0xff] }
   0xc   :  { %3527 = vmatpush3.msra.mxu1 %v4810_v10  ;;  %3554 = vmatpush3.msra.mxu0 %v4768_v2  ;;  %v2768_v21 = vld [vmem:[%s6701_s3] ss:$0 sm:$0xff]  ;;  %vm123_vm4 = vmand %vm121_vm2, %vm122_vm3  ;;  %s4721_s3 = smov 64   ;;  %v241_v48 = vld [vmem:[%s6702_s4 + $0x68] sm:$0xff] }
   0xd   :  { %3528 = vmatprep.subr.mxu1 %v4718_v1  ;;  %3555 = vmatprep.subr.mxu0 %v4718_v1  ;;  %v4927_v29 = vsel %vm123_vm4, 1.0, %v4720_v28  ;;  %v4930_v36 = vsel %vm123_vm4, 0.0, %v4720_v28  ;;  %v240_v49 = vld [vmem:[%s6702_s4 + $0x60] sm:$0xff]  ;;  %v239_v50 = vld [vmem:[%s6702_s4 + $0x58] sm:$0xff]  ;;  %v238_v51 = vld [vmem:[%s6702_s4 + $0x50] sm:$0xff] }
   0xe   :  { %3529 = vmatpush3.msra.mxu1 %v4819_v11  ;;  %3556 = vmatpush3.msra.mxu0 %v4780_v4  ;;  %v237_v52 = vld [vmem:[%s6702_s4 + $0x48] sm:$0xff]  ;;  %v236_v53 = vld [vmem:[%s6702_s4 + $0x40] sm:$0xff]  ;;  %v235_v54 = vld [vmem:[%s6702_s4 + $0x38] sm:$0xff] }
   0xf   :  { %3530 = vmatprep.subr.mxu1 %v4718_v1  ;;  %3557 = vmatprep.subr.mxu0 %v4718_v1  ;;  %v234_v55 = vld [vmem:[%s6702_s4 + $0x30] sm:$0xff]  ;;  %v233_v56 = vld [vmem:[%s6702_s4 + $0x28] sm:$0xff]  ;;  %v232_v57 = vld [vmem:[%s6702_s4 + $0x20] sm:$0xff] }
  0x10   :  { %3531 = vmatpush3.msra.mxu1 %v4828_v12  ;;  %3558 = vmatpush3.msra.mxu0 %v4793_v7  ;;  %v231_v58 = vld [vmem:[%s6702_s4 + $0x18] sm:$0xff]  ;;  %v230_v59 = vld [vmem:[%s6702_s4 + $0x10] sm:$0xff]  ;;  %v229_v60 = vld [vmem:[%s6702_s4 + $0x8] sm:$0xff] }
  0x11   :  { %3532 = vmatprep.subr.mxu1 %v4718_v1  ;;  %3559 = vmatprep.subr.mxu0 %v4718_v1  ;;  %v228_v61 = vld [vmem:[%s6702_s4] sm:$0xff]  ;;  %v2786_v26 = vld [vmem:[%s6702_s4 + $0xf8] sm:$0xff]  ;;  %v2785_v27 = vld [vmem:[%s6702_s4 + $0xf0] sm:$0xff] }
  0x12   :  { %3533 = vmatpush3.msra.mxu1 %v4837_v13  ;;  %3560 = vmatpush3.msra.mxu0 %v4803_v9  ;;  %v2784_v28 = vld [vmem:[%s6702_s4 + $0xe8] sm:$0xff] }
  0x13   :  { %3534 = vmatprep.subr.mxu1 %v4718_v1  ;;  %3561 = vmatprep.subr.mxu0 %v4718_v1 }
  0x14   :  { %3535 = vmatpush3.msra.mxu1 %v4846_v14  ;;  %3562 = vmatpush3.msra.mxu0 %v4810_v10 }
  0x15   :  { %3536 = vmatprep.subr.mxu1 %v4718_v1  ;;  %3563 = vmatprep.subr.mxu0 %v4718_v1 }
  0x16   :  { %3537 = vmatpush3.msra.mxu1 %v4855_v15  ;;  %3564 = vmatpush3.msra.mxu0 %v4819_v11 }
  0x17   :  { %3538 = vmatprep.subr.mxu1 %v4718_v1  ;;  %3565 = vmatprep.subr.mxu0 %v4718_v1 }
  0x18   :  { %3539 = vmatpush3.msra.mxu1 %v4864_v16  ;;  %3566 = vmatpush3.msra.mxu0 %v4828_v12 }
  0x19   :  { %3540 = vmatprep.subr.mxu1 %v4718_v1  ;;  %3567 = vmatprep.subr.mxu0 %v4718_v1 }
  0x1a   :  { %3541 = vmatpush3.msra.mxu1 %v4873_v17  ;;  %3568 = vmatpush3.msra.mxu0 %v4837_v13 }
  0x1b   :  { %3542 = vmatprep.subr.mxu1 %v4718_v1  ;;  %3569 = vmatprep.subr.mxu0 %v4718_v1 }
  0x1c   :  { %3543 = vmatpush3.msra.mxu1 %v4882_v18  ;;  %3570 = vmatpush3.msra.mxu0 %v4846_v14 }
  0x1d   :  { %3544 = vmatprep.subr.mxu1 %v4718_v1  ;;  %3571 = vmatprep.subr.mxu0 %v4718_v1 }
  0x1e   :  { %3545 = vmatpush3.msra.mxu1 %v4891_v19  ;;  %3572 = vmatpush3.msra.mxu0 %v4855_v15 }
  0x1f   :  { %3546 = vmatprep.subr.mxu1 %v4718_v1  ;;  %3573 = vmatprep.subr.mxu0 %v4718_v1 }
  0x20   :  { %3547 = vmatpush3.msra.mxu1 %v4900_v20  ;;  %3574 = vmatpush3.msra.mxu0 %v4864_v16 }
  0x21   :  { %3549 = vmatmul.mubr.f32.vlgmr.msra.gmra.mxu1 %v4718_v1  ;;  %3575 = vmatprep.subr.mxu0 %v4718_v1 }
  0x22   :  { %3576 = vmatpush3.msra.mxu0 %v4873_v17  ;;  %3583 = vmatprep.mubr.msk.f32.mxu0 %vm4719_vm0, %v4718_v1 }
  0x23   :  { %3577 = vmatprep.subr.mxu0 %v4718_v1  ;;  %3586 = vmatprep.subr.mxu1 %v4718_v1 }
  0x24   :  { %3578 = vmatpush3.msra.mxu0 %v4882_v18  ;;  %3618 = vmatprep.mubr.msk.f32.mxu1 %vm4719_vm0, %v4718_v1 }
  0x25   :  { %3579 = vmatprep.subr.mxu0 %v4718_v1  ;;  %3587 = vmatpush3.msra.mxu1 %v2786_v26  ;;  %v2794_v26 = vld [vmem:[%s6702_s4 + $0x138] sm:$0xff] }
  0x26   :  { %3580 = vmatpush3.msra.mxu0 %v4891_v19  ;;  %3588 = vmatprep.subr.mxu1 %v4718_v1 }
  0x27   :  { %3581 = vmatprep.subr.mxu0 %v4718_v1  ;;  %3589 = vmatpush3.msra.mxu1 %v2785_v27  ;;  %v2793_v27 = vld [vmem:[%s6702_s4 + $0x130] sm:$0xff] }
  0x28   :  { %3582 = vmatpush3.msra.mxu0 %v4900_v20  ;;  %3590 = vmatprep.subr.mxu1 %v4718_v1 }
  0x29   :  { %3621 = vmatprep.subr.mxu0 %v4718_v1  ;;  %3591 = vmatpush3.msra.mxu1 %v2784_v28  ;;  %v2792_v28 = vld [vmem:[%s6702_s4 + $0x128] sm:$0xff] }
  0x2a   :  { %3592 = vmatprep.subr.mxu1 %v4718_v1 }
  0xc8   :  { %v3515_v22 = vpop.f32.mrf.mxu0 }
  0xc9   :  { %v114_v23 = vadd.f32 %v3515_v22, %v2768_v21 }
  0xca   :  { %v108_v24 = vpop.f32.mrf.mxu0 }
  0xcb   :  { %118 = vst [vmem:[#allocation2 + $0x8] sm:$0x7f] %v114_v23  ;;  %v109_v25 = vadd.f32 %v2768_v21, %v108_v24 }
  0xcd   :  { %117 = vst [vmem:[#allocation2] sm:$0xff] %v109_v25 }
  0xd4   :  { %v126_v30 = vld [vmem:[#allocation2] sm:$0x1]  ;;  %v244_v63 = vld [vmem:[#allocation2 + $0x1] sm:$0x1] }
  0xe1   :  { %v209_v31 = vpop.f32.mrf.mxu1 }
  0xe2   :  { %v213_v32 = vadd.f32 %v209_v31, %v126_v30  ;;  %v2783_v30 = vld [vmem:[%s6702_s4 + $0xe0] sm:$0xff]  ;;  %v2782_v31 = vld [vmem:[%s6702_s4 + $0xd8] sm:$0xff] }
  0xe3   :  { %v3550_v33 = vpop.f32.mrf.mxu1  ;;  %3593 = vmatpush3.msra.mxu1 %v2783_v30  ;;  %v2791_v30 = vld [vmem:[%s6702_s4 + $0x120] sm:$0xff] }
  0xe4   :  { %v214_v34 = vmul.f32 %v213_v32, %v4927_v29  ;;  %3594 = vmatprep.subr.mxu1 %v4718_v1  ;;  %v2781_v33 = vld [vmem:[%s6702_s4 + $0xd0] sm:$0xff] }
  0xe5   :  { %3595 = vmatpush3.msra.mxu1 %v2782_v31  ;;  %v2790_v31 = vld [vmem:[%s6702_s4 + $0x118] sm:$0xff] }
  0xe6   :  { %4572 = vtanh.f32 %v214_v34  ;;  %3596 = vmatprep.subr.mxu1 %v4718_v1 }
  0xe7   :  { %3597 = vmatpush3.msra.mxu1 %v2781_v33  ;;  %v2788_v33 = vld [vmem:[%s6702_s4 + $0x108] sm:$0xff] }
  0xe8   :  { %3598 = vmatprep.subr.mxu1 %v4718_v1 }
  0xf3   :  { %v4573_v35 = vpop.eup %4572 }
  0xf4   :  { %v216_v37 = vmul.f32 %v4573_v35, %v4927_v29  ;;  %v2780_v35 = vld [vmem:[%s6702_s4 + $0xc8] sm:$0xff] }
  0xf5   :  { %3599 = vmatpush3.msra.mxu1 %v2780_v35 }
  0xf6   :  { %v217_v38 = vadd.f32 %v216_v37, %v4930_v36  ;;  %3600 = vmatprep.subr.mxu1 %v4718_v1  ;;  %v2779_v37 = vld [vmem:[%s6702_s4 + $0xc0] sm:$0xff] }
  0xf7   :  { %3601 = vmatpush3.msra.mxu1 %v2779_v37 }
  0xf8   :  { %218 = vrot.lane.b32.xlu0 %v217_v38, %s4721_s3  ;;  %v223_v41 = vmul.f32 0.0, %v217_v38  ;;  %3602 = vmatprep.subr.mxu1 %v4718_v1 }
 0x16a   :  { %v219_v39 = vpop.permute.xlu0 %218 }
 0x16b   :  { %v220_v40 = vmul.f32 %v219_v39, %v217_v38  ;;  %v2778_v38 = vld [vmem:[%s6702_s4 + $0xb8] sm:$0xff] }
 0x16c   :  { %3603 = vmatpush3.msra.mxu1 %v2778_v38 }
 0x16d   :  { %221 = vrot.lane.b32.xlu0 %v220_v40, %s4722_s1  ;;  %3604 = vmatprep.subr.mxu1 %v4718_v1  ;;  %v2776_v40 = vld [vmem:[%s6702_s4 + $0xa8] sm:$0xff] }
 0x1df   :  { %v222_v42 = vpop.permute.xlu0 %221 }
 0x1e0   :  { %v4936_v43 = vadd.f32 %v223_v41, %v222_v42  ;;  %v2775_v41 = vld [vmem:[%s6702_s4 + $0xa0] sm:$0xff]  ;;  %v2774_v42 = vld [vmem:[%s6702_s4 + $0x98] sm:$0xff] }
 0x1e2   :  { %4574 = vtanh.f32 %v4936_v43 }
 0x1ef   :  { %v4575_v44 = vpop.eup %4574 }
 0x1f0   :  { %v226_v45 = vmul.f32 %v4575_v44, %v219_v39  ;;  %v2777_v39 = vld [vmem:[%s6702_s4 + $0xb0] sm:$0xff] }
 0x1f1   :  { %3605 = vmatpush3.msra.mxu1 %v2777_v39  ;;  %v2773_v44 = vld [vmem:[%s6702_s4 + $0x90] sm:$0xff] }
 0x1f2   :  { %3584 = vmatmul.mubr.f32.vlgmr.msra.gmra.mxu0 %v226_v45  ;;  %4576 = vtanh.f32 %v226_v45  ;;  %3606 = vmatprep.subr.mxu1 %v4718_v1  ;;  %v2772_v45 = vld [vmem:[%s6702_s4 + $0x88] sm:$0xff] }
 0x1f3   :  { %3622 = vmatpush3.msra.mxu0 %v243_v46  ;;  %3653 = vmatprep.mubr.msk.f32.mxu0 %vm4719_vm0, %v4718_v1  ;;  %v2771_v46 = vld [vmem:[%s6702_s4 + $0x80] sm:$0xff] }
 0x1f4   :  { %3623 = vmatprep.subr.mxu0 %v4718_v1  ;;  %3607 = vmatpush3.msra.mxu1 %v2776_v40 }
 0x1f5   :  { %3624 = vmatpush3.msra.mxu0 %v242_v47  ;;  %3608 = vmatprep.subr.mxu1 %v4718_v1 }
 0x1f6   :  { %3625 = vmatprep.subr.mxu0 %v4718_v1  ;;  %3609 = vmatpush3.msra.mxu1 %v2775_v41 }
 0x1f7   :  { %3626 = vmatpush3.msra.mxu0 %v241_v48  ;;  %3610 = vmatprep.subr.mxu1 %v4718_v1 }
 0x1f8   :  { %3627 = vmatprep.subr.mxu0 %v4718_v1  ;;  %3611 = vmatpush3.msra.mxu1 %v2774_v42  ;;  %v661_v42 = vld [vmem:[#allocation2 + $0x3] sm:$0x1] }
 0x1f9   :  { %3628 = vmatpush3.msra.mxu0 %v240_v49  ;;  %3612 = vmatprep.subr.mxu1 %v4718_v1 }
 0x1fa   :  { %3629 = vmatprep.subr.mxu0 %v4718_v1  ;;  %3613 = vmatpush3.msra.mxu1 %v2773_v44 }
 0x1fb   :  { %3630 = vmatpush3.msra.mxu0 %v239_v50  ;;  %3614 = vmatprep.subr.mxu1 %v4718_v1 }
 0x1fc   :  { %3631 = vmatprep.subr.mxu0 %v4718_v1  ;;  %3615 = vmatpush3.msra.mxu1 %v2772_v45 }
 0x1fd   :  { %3632 = vmatpush3.msra.mxu0 %v238_v51  ;;  %3616 = vmatprep.subr.mxu1 %v4718_v1 }
 0x1fe   :  { %3633 = vmatprep.subr.mxu0 %v4718_v1  ;;  %3617 = vmatpush3.msra.mxu1 %v2771_v46 }
 0x1ff   :  { %3634 = vmatpush3.msra.mxu0 %v237_v52  ;;  %v4577_v62 = vpop.eup %4576  ;;  %3656 = vmatprep.subr.mxu1 %v4718_v1 }
 0x200   :  { %3635 = vmatprep.subr.mxu0 %v4718_v1 }
 0x201   :  { %3636 = vmatpush3.msra.mxu0 %v236_v53 }
 0x202   :  { %3637 = vmatprep.subr.mxu0 %v4718_v1 }
 0x203   :  { %3638 = vmatpush3.msra.mxu0 %v235_v54  ;;  %v487_v54 = vld [vmem:[#allocation2 + $0x2] sm:$0x1] }
 0x204   :  { %3639 = vmatprep.subr.mxu0 %v4718_v1 }
 0x205   :  { %3640 = vmatpush3.msra.mxu0 %v234_v55 }
 0x206   :  { %3641 = vmatprep.subr.mxu0 %v4718_v1 }
 0x207   :  { %3642 = vmatpush3.msra.mxu0 %v233_v56 }
 0x208   :  { %3643 = vmatprep.subr.mxu0 %v4718_v1 }
 0x209   :  { %3644 = vmatpush3.msra.mxu0 %v232_v57 }
 0x20a   :  { %3645 = vmatprep.subr.mxu0 %v4718_v1 }
 0x20b   :  { %3646 = vmatpush3.msra.mxu0 %v231_v58 }
 0x20c   :  { %3647 = vmatprep.subr.mxu0 %v4718_v1 }
 0x20d   :  { %3648 = vmatpush3.msra.mxu0 %v230_v59 }
 0x20e   :  { %3649 = vmatprep.subr.mxu0 %v4718_v1 }
 0x20f   :  { %3650 = vmatpush3.msra.mxu0 %v229_v60 }
 0x210   :  { %3651 = vmatprep.subr.mxu0 %v4718_v1 }
 0x211   :  { %3652 = vmatpush3.msra.mxu0 %v228_v61 }
 0x212   :  { %3654 = vmatmul.mubr.f32.vlgmr.msra.gmra.mxu0 %v4577_v62  ;;  %3691 = vmatprep.subr.mxu0 %v4718_v1  ;;  %v2802_v62 = vld [vmem:[%s6702_s4 + $0x178] sm:$0xff] }
 0x213   :  { %3723 = vmatprep.mubr.msk.f32.mxu0 %vm4719_vm0, %v4718_v1  ;;  %3692 = vmatpush3.msra.mxu0 %v2802_v62  ;;  %v2811_v62 = vld [vmem:[%s6702_s4 + $0x1c0] sm:$0xff] }
 0x214   :  { %3693 = vmatprep.subr.mxu0 %v4718_v1 }
 0x2b2   :  { %v311_v3 = vpop.f32.mrf.mxu0 }
 0x2b3   :  { %v315_v5 = vadd.f32 %v311_v3, %v244_v63  ;;  %v2801_v63 = vld [vmem:[%s6702_s4 + $0x170] sm:$0xff]  ;;  %v2800_v3 = vld [vmem:[%s6702_s4 + $0x168] sm:$0xff] }
 0x2b4   :  { %v3585_v6 = vpop.f32.mrf.mxu0  ;;  %3694 = vmatpush3.msra.mxu0 %v2801_v63  ;;  %v2810_v63 = vld [vmem:[%s6702_s4 + $0x1b8] sm:$0xff] }
 0x2b5   :  { %v316_v8 = vmul.f32 %v315_v5, %v4927_v29  ;;  %3695 = vmatprep.subr.mxu0 %v4718_v1  ;;  %v2799_v5 = vld [vmem:[%s6702_s4 + $0x160] sm:$0xff]  ;;  %v2798_v6 = vld [vmem:[%s6702_s4 + $0x158] sm:$0xff] }
 0x2b6   :  { %3696 = vmatpush3.msra.mxu0 %v2800_v3  ;;  %v2809_v3 = vld [vmem:[%s6702_s4 + $0x1b0] sm:$0xff] }
 0x2b7   :  { %4578 = vtanh.f32 %v316_v8  ;;  %3697 = vmatprep.subr.mxu0 %v4718_v1  ;;  %v2797_v8 = vld [vmem:[%s6702_s4 + $0x150] sm:$0xff] }
 0x2b8   :  { %3698 = vmatpush3.msra.mxu0 %v2799_v5  ;;  %v2808_v5 = vld [vmem:[%s6702_s4 + $0x1a8] sm:$0xff] }
 0x2b9   :  { %3699 = vmatprep.subr.mxu0 %v4718_v1 }
 0x2ba   :  { %3700 = vmatpush3.msra.mxu0 %v2798_v6  ;;  %v2807_v6 = vld [vmem:[%s6702_s4 + $0x1a0] sm:$0xff] }
 0x2bb   :  { %3701 = vmatprep.subr.mxu0 %v4718_v1 }
 0x2bc   :  { %3702 = vmatpush3.msra.mxu0 %v2797_v8  ;;  %v2806_v8 = vld [vmem:[%s6702_s4 + $0x198] sm:$0xff] }
 0x2bd   :  { %3703 = vmatprep.subr.mxu0 %v4718_v1 }
 0x2c4   :  { %v4579_v21 = vpop.eup %4578 }
 0x2c5   :  { %v318_v22 = vmul.f32 %v4579_v21, %v4927_v29 }
 0x2c7   :  { %v319_v23 = vadd.f32 %v318_v22, %v4930_v36  ;;  %v2796_v22 = vld [vmem:[%s6702_s4 + $0x148] sm:$0xff] }
 0x2c8   :  { %3704 = vmatpush3.msra.mxu0 %v2796_v22  ;;  %v2804_v22 = vld [vmem:[%s6702_s4 + $0x188] sm:$0xff] }
 0x2c9   :  { %320 = vrot.lane.b32.xlu1 %v319_v23, %s4721_s3  ;;  %v325_v47 = vmul.f32 %v319_v23, %v4936_v43  ;;  %3705 = vmatprep.subr.mxu0 %v4718_v1 }
 0x2d2   :  { %v5011_v24 = vpop.f32.mrf.mxu0 }
 0x2d4   :  { %v3655_v25 = vpop.f32.mrf.mxu0 }
 0x2d5   :  { %v2795_v25 = vld [vmem:[%s6702_s4 + $0x140] sm:$0xff] }
 0x2d6   :  { %3706 = vmatpush3.msra.mxu0 %v2795_v25 }
 0x2d7   :  { %3707 = vmatprep.subr.mxu0 %v4718_v1 }
 0x2d8   :  { %3708 = vmatpush3.msra.mxu0 %v2794_v26 }
 0x2d9   :  { %3709 = vmatprep.subr.mxu0 %v4718_v1 }
 0x2da   :  { %3710 = vmatpush3.msra.mxu0 %v2793_v27 }
 0x2db   :  { %3711 = vmatprep.subr.mxu0 %v4718_v1 }
 0x2dc   :  { %3712 = vmatpush3.msra.mxu0 %v2792_v28 }
 0x2dd   :  { %3713 = vmatprep.subr.mxu0 %v4718_v1 }
 0x2de   :  { %3714 = vmatpush3.msra.mxu0 %v2791_v30 }
 0x2df   :  { %3715 = vmatprep.subr.mxu0 %v4718_v1 }
 0x2e0   :  { %3716 = vmatpush3.msra.mxu0 %v2790_v31  ;;  %v2830_v31 = vld [vmem:[%s6702_s4 + $0x258] sm:$0xff] }
 0x2e1   :  { %3717 = vmatprep.subr.mxu0 %v4718_v1 }
 0x33b   :  { %v321_v32 = vpop.permute.xlu1 %320 }
 0x33c   :  { %v322_v34 = vmul.f32 %v321_v32, %v319_v23 }
 0x33e   :  { %323 = vrot.lane.b32.xlu1 %v322_v34, %s4722_s1  ;;  %v2787_v34 = vld [vmem:[%s6702_s4 + $0x100] sm:$0xff] }
 0x3b0   :  { %v324_v48 = vpop.permute.xlu1 %323 }
 0x3b1   :  { %v5079_v49 = vadd.f32 %v325_v47, %v324_v48 }
 0x3b3   :  { %4580 = vtanh.f32 %v5079_v49 }
 0x3c0   :  { %v4581_v50 = vpop.eup %4580 }
 0x3c1   :  { %v328_v51 = vmul.f32 %v4581_v50, %v321_v32  ;;  %v2789_v32 = vld [vmem:[%s6702_s4 + $0x110] sm:$0xff] }
 0x3c2   :  { %3718 = vmatpush3.msra.mxu0 %v2789_v32  ;;  %v2829_v32 = vld [vmem:[%s6702_s4 + $0x250] sm:$0xff] }
 0x3c3   :  { %4582 = vtanh.f32 %v328_v51  ;;  %3719 = vmatprep.subr.mxu0 %v4718_v1 }
 0x3c4   :  { %3720 = vmatpush3.msra.mxu0 %v2788_v33 }
 0x3c5   :  { %3721 = vmatprep.subr.mxu0 %v4718_v1 }
 0x3c6   :  { %3722 = vmatpush3.msra.mxu0 %v2787_v34  ;;  %v2828_v34 = vld [vmem:[%s6702_s4 + $0x248] sm:$0xff] }
 0x3c7   :  { %3761 = vmatprep.subr.mxu0 %v4718_v1 }
 0x3d0   :  { %v4583_v52 = vpop.eup %4582 }
 0x3d1   :  { %3619 = vmatmul.mubr.f32.vlgmr.msra.gmra.mxu1 %v4583_v52 }
 0x3d2   :  { %3657 = vmatpush3.msra.mxu1 %v4762_v0  ;;  %3688 = vmatprep.mubr.msk.f32.mxu1 %vm4719_vm0, %v4718_v1 }
 0x3d3   :  { %3658 = vmatprep.subr.mxu1 %v4718_v1 }
 0x3d4   :  { %3659 = vmatpush3.msra.mxu1 %v4768_v2 }
 0x3d5   :  { %3660 = vmatprep.subr.mxu1 %v4718_v1 }
 0x3d6   :  { %3661 = vmatpush3.msra.mxu1 %v4780_v4 }
 0x3d7   :  { %3662 = vmatprep.subr.mxu1 %v4718_v1 }
 0x3d8   :  { %3663 = vmatpush3.msra.mxu1 %v4793_v7 }
 0x3d9   :  { %3664 = vmatprep.subr.mxu1 %v4718_v1 }
 0x3da   :  { %3665 = vmatpush3.msra.mxu1 %v4803_v9 }
 0x3db   :  { %3666 = vmatprep.subr.mxu1 %v4718_v1 }
 0x3dc   :  { %3667 = vmatpush3.msra.mxu1 %v4810_v10 }
 0x3dd   :  { %3668 = vmatprep.subr.mxu1 %v4718_v1 }
 0x3de   :  { %3669 = vmatpush3.msra.mxu1 %v4819_v11 }
 0x3df   :  { %3670 = vmatprep.subr.mxu1 %v4718_v1 }
 0x3e0   :  { %3671 = vmatpush3.msra.mxu1 %v4828_v12 }
 0x3e1   :  { %3672 = vmatprep.subr.mxu1 %v4718_v1 }
 0x3e2   :  { %3673 = vmatpush3.msra.mxu1 %v4837_v13 }
 0x3e3   :  { %3674 = vmatprep.subr.mxu1 %v4718_v1 }
 0x3e4   :  { %3675 = vmatpush3.msra.mxu1 %v4846_v14 }
 0x3e5   :  { %3676 = vmatprep.subr.mxu1 %v4718_v1 }
 0x3e6   :  { %3677 = vmatpush3.msra.mxu1 %v4855_v15 }
 0x3e7   :  { %3678 = vmatprep.subr.mxu1 %v4718_v1 }
 0x3e8   :  { %3679 = vmatpush3.msra.mxu1 %v4864_v16 }
 0x3e9   :  { %3680 = vmatprep.subr.mxu1 %v4718_v1 }
 0x3ea   :  { %3681 = vmatpush3.msra.mxu1 %v4873_v17 }
 0x3eb   :  { %3682 = vmatprep.subr.mxu1 %v4718_v1 }
 0x3ec   :  { %3683 = vmatpush3.msra.mxu1 %v4882_v18 }
 0x3ed   :  { %3684 = vmatprep.subr.mxu1 %v4718_v1 }
 0x3ee   :  { %3685 = vmatpush3.msra.mxu1 %v4891_v19 }
 0x3ef   :  { %3686 = vmatprep.subr.mxu1 %v4718_v1 }
 0x3f0   :  { %3687 = vmatpush3.msra.mxu1 %v4900_v20 }
 0x3f1   :  { %3689 = vmatmul.mubr.f32.vlgmr.msra.gmra.mxu1 %v328_v51  ;;  %3726 = vmatprep.subr.mxu1 %v4718_v1 }
 0x3f2   :  { %3727 = vmatpush3.msra.mxu1 %v4762_v0  ;;  %3758 = vmatprep.mubr.msk.f32.mxu1 %vm4719_vm0, %v4718_v1 }
 0x3f3   :  { %3728 = vmatprep.subr.mxu1 %v4718_v1 }
 0x3f4   :  { %3729 = vmatpush3.msra.mxu1 %v4768_v2 }
 0x3f5   :  { %3730 = vmatprep.subr.mxu1 %v4718_v1 }
 0x3f6   :  { %3731 = vmatpush3.msra.mxu1 %v4780_v4 }
 0x3f7   :  { %3732 = vmatprep.subr.mxu1 %v4718_v1 }
 0x3f8   :  { %3733 = vmatpush3.msra.mxu1 %v4793_v7 }
 0x3f9   :  { %3734 = vmatprep.subr.mxu1 %v4718_v1 }
 0x3fa   :  { %3735 = vmatpush3.msra.mxu1 %v4803_v9 }
 0x3fb   :  { %3736 = vmatprep.subr.mxu1 %v4718_v1 }
 0x3fc   :  { %3737 = vmatpush3.msra.mxu1 %v4810_v10 }
 0x3fd   :  { %3738 = vmatprep.subr.mxu1 %v4718_v1 }
 0x3fe   :  { %3739 = vmatpush3.msra.mxu1 %v4819_v11 }
 0x3ff   :  { %3740 = vmatprep.subr.mxu1 %v4718_v1 }
 0x400   :  { %3741 = vmatpush3.msra.mxu1 %v4828_v12 }
 0x401   :  { %3742 = vmatprep.subr.mxu1 %v4718_v1 }
 0x402   :  { %3743 = vmatpush3.msra.mxu1 %v4837_v13 }
 0x403   :  { %3744 = vmatprep.subr.mxu1 %v4718_v1 }
 0x404   :  { %3745 = vmatpush3.msra.mxu1 %v4846_v14 }
 0x405   :  { %3746 = vmatprep.subr.mxu1 %v4718_v1 }
 0x406   :  { %3747 = vmatpush3.msra.mxu1 %v4855_v15 }
 0x407   :  { %3748 = vmatprep.subr.mxu1 %v4718_v1 }
 0x408   :  { %3749 = vmatpush3.msra.mxu1 %v4864_v16 }
 0x409   :  { %3750 = vmatprep.subr.mxu1 %v4718_v1 }
 0x40a   :  { %3751 = vmatpush3.msra.mxu1 %v4873_v17 }
 0x40b   :  { %3752 = vmatprep.subr.mxu1 %v4718_v1 }
 0x40c   :  { %3753 = vmatpush3.msra.mxu1 %v4882_v18 }
 0x40d   :  { %3754 = vmatprep.subr.mxu1 %v4718_v1 }
 0x40e   :  { %3755 = vmatpush3.msra.mxu1 %v4891_v19 }
 0x40f   :  { %3756 = vmatprep.subr.mxu1 %v4718_v1 }
 0x410   :  { %3757 = vmatpush3.msra.mxu1 %v4900_v20 }
 0x411   :  { %3796 = vmatprep.subr.mxu1 %v4718_v1 }
 0x491   :  { %v5150_v43 = vpop.f32.mrf.mxu1 }
 0x492   :  { %v484_v48 = vadd.f32 %v5011_v24, %v5150_v43  ;;  %v2817_v24 = vld [vmem:[%s6702_s4 + $0x1f0] sm:$0xff]  ;;  %v2816_v43 = vld [vmem:[%s6702_s4 + $0x1e8] sm:$0xff] }
 0x493   :  { %v3620_v53 = vpop.f32.mrf.mxu1 }
 0x4b1   :  { %v554_v55 = vpop.f32.mrf.mxu1 }
 0x4b2   :  { %v558_v56 = vadd.f32 %v554_v55, %v487_v54  ;;  %v2818_v55 = vld [vmem:[%s6702_s4 + $0x1f8] sm:$0xff] }
 0x4b3   :  { %v3690_v57 = vpop.f32.mrf.mxu1 }
 0x4b4   :  { %v559_v58 = vmul.f32 %v558_v56, %v4927_v29  ;;  %v2815_v56 = vld [vmem:[%s6702_s4 + $0x1e0] sm:$0xff]  ;;  %v2814_v57 = vld [vmem:[%s6702_s4 + $0x1d8] sm:$0xff] }
 0x4b6   :  { %4584 = vtanh.f32 %v559_v58  ;;  %v2813_v58 = vld [vmem:[%s6702_s4 + $0x1d0] sm:$0xff] }
 0x4c3   :  { %v4585_v59 = vpop.eup %4584 }
 0x4c4   :  { %v561_v60 = vmul.f32 %v4585_v59, %v4927_v29 }
 0x4c6   :  { %v562_v61 = vadd.f32 %v561_v60, %v4930_v36  ;;  %v2812_v60 = vld [vmem:[%s6702_s4 + $0x1c8] sm:$0xff] }
 0x4c8   :  { %563 = vrot.lane.b32.xlu0 %v562_v61, %s4721_s3  ;;  %v568_v35 = vmul.f32 %v562_v61, %v5079_v49 }
 0x53a   :  { %v564_v21 = vpop.permute.xlu0 %563 }
 0x53b   :  { %v565_v23 = vmul.f32 %v564_v21, %v562_v61 }
 0x53d   :  { %566 = vrot.lane.b32.xlu1 %v565_v23, %s4722_s1  ;;  %v2803_v23 = vld [vmem:[%s6702_s4 + $0x180] sm:$0xff] }
 0x5af   :  { %v567_v37 = vpop.permute.xlu1 %566 }
 0x5b0   :  { %v5222_v38 = vadd.f32 %v568_v35, %v567_v37  ;;  %v2827_v37 = vld [vmem:[%s6702_s4 + $0x240] sm:$0xff] }
 0x5b2   :  { %4586 = vtanh.f32 %v5222_v38 }
 0x5bf   :  { %v4587_v39 = vpop.eup %4586 }
 0x5c0   :  { %v571_v40 = vmul.f32 %v4587_v39, %v564_v21  ;;  %v2805_v21 = vld [vmem:[%s6702_s4 + $0x190] sm:$0xff] }
 0x5c1   :  { %v2825_v39 = vld [vmem:[%s6702_s4 + $0x230] sm:$0xff] }
 0x5c2   :  { %4588 = vtanh.f32 %v571_v40  ;;  %3759 = vmatmul.mubr.f32.vlgmr.msra.gmra.mxu1 %v571_v40  ;;  %v2824_v40 = vld [vmem:[%s6702_s4 + $0x228] sm:$0xff] }
 0x5c3   :  { %3797 = vmatpush3.msra.mxu1 %v4762_v0  ;;  %3828 = vmatprep.mubr.msk.f32.mxu1 %vm4719_vm0, %v4718_v1 }
 0x5c4   :  { %3798 = vmatprep.subr.mxu1 %v4718_v1 }
 0x5c5   :  { %3799 = vmatpush3.msra.mxu1 %v4768_v2 }
 0x5c6   :  { %3800 = vmatprep.subr.mxu1 %v4718_v1 }
 0x5c7   :  { %3801 = vmatpush3.msra.mxu1 %v4780_v4 }
 0x5c8   :  { %3802 = vmatprep.subr.mxu1 %v4718_v1 }
 0x5c9   :  { %3803 = vmatpush3.msra.mxu1 %v4793_v7 }
 0x5ca   :  { %3804 = vmatprep.subr.mxu1 %v4718_v1 }
 0x5cb   :  { %3805 = vmatpush3.msra.mxu1 %v4803_v9 }
 0x5cc   :  { %3806 = vmatprep.subr.mxu1 %v4718_v1 }
 0x5cd   :  { %3807 = vmatpush3.msra.mxu1 %v4810_v10 }
 0x5ce   :  { %3808 = vmatprep.subr.mxu1 %v4718_v1 }
 0x5cf   :  { %v4589_v41 = vpop.eup %4588  ;;  %3809 = vmatpush3.msra.mxu1 %v4819_v11 }
 0x5d0   :  { %3724 = vmatmul.mubr.f32.vlgmr.msra.gmra.mxu0 %v4589_v41  ;;  %3810 = vmatprep.subr.mxu1 %v4718_v1  ;;  %v2823_v41 = vld [vmem:[%s6702_s4 + $0x220] sm:$0xff] }
 0x5d1   :  { %3811 = vmatpush3.msra.mxu1 %v4828_v12  ;;  %3793 = vmatprep.mubr.msk.f32.mxu0 %vm4719_vm0, %v4718_v1 }
 0x5d2   :  { %3812 = vmatprep.subr.mxu1 %v4718_v1  ;;  %3762 = vmatpush3.msra.mxu0 %v2818_v55  ;;  %v5476_v55 = vld [vmem:[%s6700_s2 + $0x60] sm:$0xff] }
 0x5d3   :  { %3813 = vmatpush3.msra.mxu1 %v4837_v13  ;;  %3763 = vmatprep.subr.mxu0 %v4718_v1 }
 0x5d4   :  { %3814 = vmatprep.subr.mxu1 %v4718_v1  ;;  %3764 = vmatpush3.msra.mxu0 %v2817_v24  ;;  %v5483_v24 = vld [vmem:[%s6700_s2 + $0x58] sm:$0xff] }
 0x5d5   :  { %3815 = vmatpush3.msra.mxu1 %v4846_v14  ;;  %3765 = vmatprep.subr.mxu0 %v4718_v1 }
 0x5d6   :  { %3816 = vmatprep.subr.mxu1 %v4718_v1  ;;  %3766 = vmatpush3.msra.mxu0 %v2816_v43  ;;  %v5490_v43 = vld [vmem:[%s6700_s2 + $0x50] sm:$0xff] }
 0x5d7   :  { %3817 = vmatpush3.msra.mxu1 %v4855_v15  ;;  %3767 = vmatprep.subr.mxu0 %v4718_v1 }
 0x5d8   :  { %3818 = vmatprep.subr.mxu1 %v4718_v1  ;;  %3768 = vmatpush3.msra.mxu0 %v2815_v56 }
 0x5d9   :  { %3819 = vmatpush3.msra.mxu1 %v4864_v16  ;;  %3769 = vmatprep.subr.mxu0 %v4718_v1 }
 0x5da   :  { %3820 = vmatprep.subr.mxu1 %v4718_v1  ;;  %3770 = vmatpush3.msra.mxu0 %v2814_v57  ;;  %v5497_v57 = vld [vmem:[%s6700_s2 + $0x48] sm:$0xff] }
 0x5db   :  { %3821 = vmatpush3.msra.mxu1 %v4873_v17  ;;  %3771 = vmatprep.subr.mxu0 %v4718_v1 }
 0x5dc   :  { %3822 = vmatprep.subr.mxu1 %v4718_v1  ;;  %3772 = vmatpush3.msra.mxu0 %v2813_v58  ;;  %v5504_v58 = vld [vmem:[%s6700_s2 + $0x40] sm:$0xff] }
 0x5dd   :  { %3823 = vmatpush3.msra.mxu1 %v4882_v18  ;;  %3773 = vmatprep.subr.mxu0 %v4718_v1 }
 0x5de   :  { %3824 = vmatprep.subr.mxu1 %v4718_v1  ;;  %3774 = vmatpush3.msra.mxu0 %v2812_v60  ;;  %v5520_v60 = vld [vmem:[%s6700_s2 + $0x30] sm:$0xff] }
 0x5df   :  { %3825 = vmatpush3.msra.mxu1 %v4891_v19  ;;  %3775 = vmatprep.subr.mxu0 %v4718_v1 }
 0x5e0   :  { %3826 = vmatprep.subr.mxu1 %v4718_v1  ;;  %3776 = vmatpush3.msra.mxu0 %v2811_v62  ;;  %v5534_v62 = vld [vmem:[%s6700_s2 + $0x20] sm:$0xff] }
 0x5e1   :  { %3827 = vmatpush3.msra.mxu1 %v4900_v20  ;;  %3777 = vmatprep.subr.mxu0 %v4718_v1 }
 0x5e2   :  { %3866 = vmatprep.subr.mxu1 %v4718_v1  ;;  %3778 = vmatpush3.msra.mxu0 %v2810_v63  ;;  %v5541_v63 = vld [vmem:[%s6700_s2 + $0x18] sm:$0xff] }
 0x5e3   :  { %3779 = vmatprep.subr.mxu0 %v4718_v1 }
 0x5e4   :  { %3780 = vmatpush3.msra.mxu0 %v2809_v3  ;;  %v5548_v3 = vld [vmem:[%s6700_s2 + $0x10] sm:$0xff] }
 0x5e5   :  { %3781 = vmatprep.subr.mxu0 %v4718_v1 }
 0x5e6   :  { %3782 = vmatpush3.msra.mxu0 %v2808_v5  ;;  %v5555_v5 = vld [vmem:[%s6700_s2 + $0x8] sm:$0xff] }
 0x5e7   :  { %3783 = vmatprep.subr.mxu0 %v4718_v1 }
 0x5e8   :  { %3784 = vmatpush3.msra.mxu0 %v2807_v6  ;;  %v5562_v6 = vld [vmem:[%s6700_s2] sm:$0xff] }
 0x5e9   :  { %3785 = vmatprep.subr.mxu0 %v4718_v1 }
 0x5ea   :  { %3786 = vmatpush3.msra.mxu0 %v2806_v8  ;;  %v1009_v8 = vld [vmem:[#allocation2 + $0x5] sm:$0x1] }
 0x5eb   :  { %3787 = vmatprep.subr.mxu0 %v4718_v1 }
 0x5ec   :  { %3788 = vmatpush3.msra.mxu0 %v2805_v21 }
 0x5ed   :  { %3789 = vmatprep.subr.mxu0 %v4718_v1 }
 0x5ee   :  { %3790 = vmatpush3.msra.mxu0 %v2804_v22 }
 0x5ef   :  { %3791 = vmatprep.subr.mxu0 %v4718_v1 }
 0x5f0   :  { %3792 = vmatpush3.msra.mxu0 %v2803_v23 }
 0x5f1   :  { %3831 = vmatprep.subr.mxu0 %v4718_v1 }
 0x682   :  { %v728_v44 = vpop.f32.mrf.mxu1 }
 0x683   :  { %v732_v45 = vadd.f32 %v728_v44, %v661_v42  ;;  %v2822_v42 = vld [vmem:[%s6702_s4 + $0x218] sm:$0xff]  ;;  %v2821_v44 = vld [vmem:[%s6702_s4 + $0x210] sm:$0xff] }
 0x684   :  { %v3760_v46 = vpop.f32.mrf.mxu1 }
 0x685   :  { %v733_v47 = vmul.f32 %v732_v45, %v4927_v29  ;;  %v2820_v45 = vld [vmem:[%s6702_s4 + $0x208] sm:$0xff]  ;;  %v2819_v46 = vld [vmem:[%s6702_s4 + $0x200] sm:$0xff] }
 0x687   :  { %4590 = vtanh.f32 %v733_v47 }
 0x690   :  { %v656_v49 = vpop.f32.mrf.mxu0 }
 0x691   :  { %v5264_v50 = vadd.f32 %v656_v49, %v484_v48 }
 0x692   :  { %v3725_v51 = vpop.f32.mrf.mxu0 }
 0x694   :  { %v4591_v52 = vpop.eup %4590 }
 0x695   :  { %v735_v53 = vmul.f32 %v4591_v52, %v4927_v29  ;;  %v5453_v52 = vld [vmem:[%s6700_s2 + $0x78] sm:$0xff] }
 0x697   :  { %v736_v54 = vadd.f32 %v735_v53, %v4930_v36  ;;  %v5462_v53 = vld [vmem:[%s6700_s2 + $0x70] sm:$0xff] }
 0x699   :  { %737 = vrot.lane.b32.xlu0 %v736_v54, %s4721_s3  ;;  %v742_v25 = vmul.f32 %v736_v54, %v5222_v38  ;;  %v2826_v38 = vld [vmem:[%s6702_s4 + $0x238] sm:$0xff] }
 0x70b   :  { %v738_v59 = vpop.permute.xlu0 %737 }
 0x70c   :  { %v739_v61 = vmul.f32 %v738_v59, %v736_v54  ;;  %v5469_v54 = vld [vmem:[%s6700_s2 + $0x68] sm:$0xff] }
 0x70e   :  { %740 = vrot.lane.b32.xlu1 %v739_v61, %s4722_s1  ;;  %v5527_v61 = vld [vmem:[%s6700_s2 + $0x28] sm:$0xff] }
 0x780   :  { %v741_v26 = vpop.permute.xlu1 %740 }
 0x781   :  { %v5335_v27 = vadd.f32 %v742_v25, %v741_v26 }
 0x783   :  { %4592 = vtanh.f32 %v5335_v27 }
 0x790   :  { %v4593_v28 = vpop.eup %4592 }
 0x791   :  { %v745_v30 = vmul.f32 %v4593_v28, %v738_v59  ;;  %v5513_v59 = vld [vmem:[%s6700_s2 + $0x38] sm:$0xff] }
 0x793   :  { %4594 = vtanh.f32 %v745_v30  ;;  %3829 = vmatmul.mubr.f32.vlgmr.msra.gmra.mxu1 %v745_v30 }
 0x794   :  { %3867 = vmatpush3.msra.mxu1 %v4762_v0  ;;  %3898 = vmatprep.mubr.msk.f32.mxu1 %vm4719_vm0, %v4718_v1 }
 0x795   :  { %3868 = vmatprep.subr.mxu1 %v4718_v1 }
 0x796   :  { %3869 = vmatpush3.msra.mxu1 %v4768_v2  ;;  %v835_v2 = vld [vmem:[#allocation2 + $0x4] sm:$0x1] }
 0x797   :  { %3870 = vmatprep.subr.mxu1 %v4718_v1 }
 0x798   :  { %3871 = vmatpush3.msra.mxu1 %v4780_v4 }
 0x799   :  { %3872 = vmatprep.subr.mxu1 %v4718_v1 }
 0x79a   :  { %3873 = vmatpush3.msra.mxu1 %v4793_v7 }
 0x79b   :  { %3874 = vmatprep.subr.mxu1 %v4718_v1 }
 0x79c   :  { %3875 = vmatpush3.msra.mxu1 %v4803_v9 }
 0x79d   :  { %3876 = vmatprep.subr.mxu1 %v4718_v1 }
 0x79e   :  { %3877 = vmatpush3.msra.mxu1 %v4810_v10 }
 0x79f   :  { %3878 = vmatprep.subr.mxu1 %v4718_v1 }
 0x7a0   :  { %v4595_v0 = vpop.eup %4594  ;;  %3879 = vmatpush3.msra.mxu1 %v4819_v11 }
 0x7a1   :  { %3794 = vmatmul.mubr.f32.vlgmr.msra.gmra.mxu0 %v4595_v0  ;;  %3880 = vmatprep.subr.mxu1 %v4718_v1 }
 0x7a2   :  { %3881 = vmatpush3.msra.mxu1 %v4828_v12  ;;  %3863 = vmatprep.mubr.msk.f32.mxu0 %vm4719_vm0, %v4718_v1 }
 0x7a3   :  { %3882 = vmatprep.subr.mxu1 %v4718_v1 }
 0x7a4   :  { %3883 = vmatpush3.msra.mxu1 %v4837_v13 }
 0x7a5   :  { %3884 = vmatprep.subr.mxu1 %v4718_v1 }
 0x7a6   :  { %3885 = vmatpush3.msra.mxu1 %v4846_v14 }
 0x7a7   :  { %3886 = vmatprep.subr.mxu1 %v4718_v1 }
 0x7a8   :  { %3887 = vmatpush3.msra.mxu1 %v4855_v15 }
 0x7a9   :  { %3888 = vmatprep.subr.mxu1 %v4718_v1 }
 0x7aa   :  { %3889 = vmatpush3.msra.mxu1 %v4864_v16 }
 0x7ab   :  { %3890 = vmatprep.subr.mxu1 %v4718_v1 }
 0x7ac   :  { %3891 = vmatpush3.msra.mxu1 %v4873_v17  ;;  %v2834_v17 = vld [vmem:[%s6702_s4 + $0x278] sm:$0xff] }
 0x7ad   :  { %3892 = vmatprep.subr.mxu1 %v4718_v1  ;;  %3832 = vmatpush3.msra.mxu0 %v2834_v17  ;;  %v2842_v17 = vld [vmem:[%s6702_s4 + $0x2b8] sm:$0xff] }
 0x7ae   :  { %3893 = vmatpush3.msra.mxu1 %v4882_v18  ;;  %3833 = vmatprep.subr.mxu0 %v4718_v1  ;;  %v2833_v18 = vld [vmem:[%s6702_s4 + $0x270] sm:$0xff] }
 0x7af   :  { %3894 = vmatprep.subr.mxu1 %v4718_v1  ;;  %3834 = vmatpush3.msra.mxu0 %v2833_v18  ;;  %v2841_v18 = vld [vmem:[%s6702_s4 + $0x2b0] sm:$0xff] }
 0x7b0   :  { %3895 = vmatpush3.msra.mxu1 %v4891_v19  ;;  %v2832_v19 = vld [vmem:[%s6702_s4 + $0x268] sm:$0xff]  ;;  %3835 = vmatprep.subr.mxu0 %v4718_v1 }
 0x7b1   :  { %3896 = vmatprep.subr.mxu1 %v4718_v1  ;;  %3836 = vmatpush3.msra.mxu0 %v2832_v19  ;;  %v2840_v19 = vld [vmem:[%s6702_s4 + $0x2a8] sm:$0xff] }
 0x7b2   :  { %3897 = vmatpush3.msra.mxu1 %v4900_v20  ;;  %v2831_v20 = vld [vmem:[%s6702_s4 + $0x260] sm:$0xff]  ;;  %3837 = vmatprep.subr.mxu0 %v4718_v1 }
 0x7b3   :  { %3936 = vmatprep.subr.mxu1 %v4718_v1  ;;  %3838 = vmatpush3.msra.mxu0 %v2831_v20  ;;  %v2839_v20 = vld [vmem:[%s6702_s4 + $0x2a0] sm:$0xff] }
 0x7b4   :  { %3839 = vmatprep.subr.mxu0 %v4718_v1 }
 0x7b5   :  { %3840 = vmatpush3.msra.mxu0 %v2830_v31  ;;  %v2838_v31 = vld [vmem:[%s6702_s4 + $0x298] sm:$0xff] }
 0x7b6   :  { %3841 = vmatprep.subr.mxu0 %v4718_v1 }
 0x7b7   :  { %3842 = vmatpush3.msra.mxu0 %v2829_v32  ;;  %v2837_v32 = vld [vmem:[%s6702_s4 + $0x290] sm:$0xff] }
 0x7b8   :  { %3843 = vmatprep.subr.mxu0 %v4718_v1 }
 0x7b9   :  { %3844 = vmatpush3.msra.mxu0 %v2828_v34  ;;  %v2835_v34 = vld [vmem:[%s6702_s4 + $0x280] sm:$0xff] }
 0x7ba   :  { %3845 = vmatprep.subr.mxu0 %v4718_v1 }
 0x7bb   :  { %3846 = vmatpush3.msra.mxu0 %v2827_v37 }
 0x7bc   :  { %3847 = vmatprep.subr.mxu0 %v4718_v1 }
 0x7bd   :  { %3848 = vmatpush3.msra.mxu0 %v2826_v38 }
 0x7be   :  { %3849 = vmatprep.subr.mxu0 %v4718_v1 }
 0x7bf   :  { %3850 = vmatpush3.msra.mxu0 %v2825_v39 }
 0x7c0   :  { %3851 = vmatprep.subr.mxu0 %v4718_v1 }
 0x7c1   :  { %3852 = vmatpush3.msra.mxu0 %v2824_v40 }
 0x7c2   :  { %3853 = vmatprep.subr.mxu0 %v4718_v1 }
 0x7c3   :  { %3854 = vmatpush3.msra.mxu0 %v2823_v41 }
 0x7c4   :  { %3855 = vmatprep.subr.mxu0 %v4718_v1 }
 0x7c5   :  { %3856 = vmatpush3.msra.mxu0 %v2822_v42  ;;  %v1183_v42 = vld [vmem:[#allocation2 + $0x6] sm:$0x1] }
 0x7c6   :  { %3857 = vmatprep.subr.mxu0 %v4718_v1 }
 0x7c7   :  { %3858 = vmatpush3.msra.mxu0 %v2821_v44 }
 0x7c8   :  { %3859 = vmatprep.subr.mxu0 %v4718_v1 }
 0x7c9   :  { %3860 = vmatpush3.msra.mxu0 %v2820_v45 }
 0x7ca   :  { %3861 = vmatprep.subr.mxu0 %v4718_v1 }
 0x7cb   :  { %3862 = vmatpush3.msra.mxu0 %v2819_v46 }
 0x7cc   :  { %3901 = vmatprep.subr.mxu0 %v4718_v1 }
 0x853   :  { %v902_v4 = vpop.f32.mrf.mxu1 }
 0x854   :  { %v906_v7 = vadd.f32 %v902_v4, %v835_v2  ;;  %v2850_v4 = vld [vmem:[%s6702_s4 + $0x2f8] sm:$0xff] }
 0x855   :  { %v3830_v9 = vpop.f32.mrf.mxu1 }
 0x856   :  { %v907_v10 = vmul.f32 %v906_v7, %v4927_v29  ;;  %v2849_v7 = vld [vmem:[%s6702_s4 + $0x2f0] sm:$0xff]  ;;  %v2848_v9 = vld [vmem:[%s6702_s4 + $0x2e8] sm:$0xff] }
 0x858   :  { %4596 = vtanh.f32 %v907_v10  ;;  %v2847_v10 = vld [vmem:[%s6702_s4 + $0x2e0] sm:$0xff] }
 0x861   :  { %v830_v11 = vpop.f32.mrf.mxu0 }
 0x862   :  { %v5376_v12 = vadd.f32 %v830_v11, %v5264_v50  ;;  %v2846_v11 = vld [vmem:[%s6702_s4 + $0x2d8] sm:$0xff] }
 0x863   :  { %v3795_v13 = vpop.f32.mrf.mxu0 }
 0x865   :  { %v4597_v14 = vpop.eup %4596 }
 0x866   :  { %v909_v15 = vmul.f32 %v4597_v14, %v4927_v29  ;;  %v2844_v14 = vld [vmem:[%s6702_s4 + $0x2c8] sm:$0xff] }
 0x868   :  { %v910_v16 = vadd.f32 %v909_v15, %v4930_v36 }
 0x86a   :  { %911 = vrot.lane.b32.xlu0 %v910_v16, %s4721_s3  ;;  %v916_v47 = vmul.f32 %v910_v16, %v5335_v27 }
 0x8dc   :  { %v912_v33 = vpop.permute.xlu0 %911 }
 0x8dd   :  { %v913_v35 = vmul.f32 %v912_v33, %v910_v16  ;;  %v2843_v16 = vld [vmem:[%s6702_s4 + $0x2c0] sm:$0xff] }
 0x8df   :  { %914 = vrot.lane.b32.xlu1 %v913_v35, %s4722_s1 }
 0x951   :  { %v915_v48 = vpop.permute.xlu1 %914 }
 0x952   :  { %v5447_v49 = vadd.f32 %v916_v47, %v915_v48 }
 0x954   :  { %4598 = vtanh.f32 %v5447_v49 }
 0x961   :  { %v4599_v50 = vpop.eup %4598 }
 0x962   :  { %v919_v51 = vmul.f32 %v4599_v50, %v912_v33  ;;  %v2836_v33 = vld [vmem:[%s6702_s4 + $0x288] sm:$0xff] }
 0x964   :  { %4600 = vtanh.f32 %v919_v51  ;;  %3899 = vmatmul.mubr.f32.vlgmr.msra.gmra.mxu1 %v919_v51 }
 0x965   :  { %3937 = vmatpush3.msra.mxu1 %v5453_v52  ;;  %3968 = vmatprep.mubr.msk.f32.mxu1 %vm4719_vm0, %v4718_v1 }
 0x966   :  { %3938 = vmatprep.subr.mxu1 %v4718_v1 }
 0x967   :  { %3939 = vmatpush3.msra.mxu1 %v5462_v53 }
 0x968   :  { %3940 = vmatprep.subr.mxu1 %v4718_v1 }
 0x969   :  { %3941 = vmatpush3.msra.mxu1 %v5469_v54 }
 0x96a   :  { %3942 = vmatprep.subr.mxu1 %v4718_v1 }
 0x96b   :  { %3943 = vmatpush3.msra.mxu1 %v5476_v55 }
 0x96c   :  { %3944 = vmatprep.subr.mxu1 %v4718_v1 }
 0x96d   :  { %3945 = vmatpush3.msra.mxu1 %v5483_v24 }
 0x96e   :  { %3946 = vmatprep.subr.mxu1 %v4718_v1 }
 0x96f   :  { %3947 = vmatpush3.msra.mxu1 %v5490_v43 }
 0x970   :  { %3948 = vmatprep.subr.mxu1 %v4718_v1 }
 0x971   :  { %v4601_v56 = vpop.eup %4600  ;;  %3949 = vmatpush3.msra.mxu1 %v5497_v57 }
 0x972   :  { %3864 = vmatmul.mubr.f32.vlgmr.msra.gmra.mxu0 %v4601_v56  ;;  %3950 = vmatprep.subr.mxu1 %v4718_v1 }
 0x973   :  { %3951 = vmatpush3.msra.mxu1 %v5504_v58  ;;  %3933 = vmatprep.mubr.msk.f32.mxu0 %vm4719_vm0, %v4718_v1 }
 0x974   :  { %3952 = vmatprep.subr.mxu1 %v4718_v1  ;;  %3902 = vmatpush3.msra.mxu0 %v2850_v4  ;;  %v2858_v4 = vld [vmem:[%s6702_s4 + $0x338] sm:$0xff] }
 0x975   :  { %3953 = vmatpush3.msra.mxu1 %v5513_v59  ;;  %3903 = vmatprep.subr.mxu0 %v4718_v1 }
 0x976   :  { %3954 = vmatprep.subr.mxu1 %v4718_v1  ;;  %3904 = vmatpush3.msra.mxu0 %v2849_v7  ;;  %v2857_v7 = vld [vmem:[%s6702_s4 + $0x330] sm:$0xff] }
 0x977   :  { %3955 = vmatpush3.msra.mxu1 %v5520_v60  ;;  %3905 = vmatprep.subr.mxu0 %v4718_v1 }
 0x978   :  { %3956 = vmatprep.subr.mxu1 %v4718_v1  ;;  %3906 = vmatpush3.msra.mxu0 %v2848_v9  ;;  %v2856_v9 = vld [vmem:[%s6702_s4 + $0x328] sm:$0xff] }
 0x979   :  { %3957 = vmatpush3.msra.mxu1 %v5527_v61  ;;  %3907 = vmatprep.subr.mxu0 %v4718_v1 }
 0x97a   :  { %3958 = vmatprep.subr.mxu1 %v4718_v1  ;;  %3908 = vmatpush3.msra.mxu0 %v2847_v10  ;;  %v2855_v10 = vld [vmem:[%s6702_s4 + $0x320] sm:$0xff] }
 0x97b   :  { %3959 = vmatpush3.msra.mxu1 %v5534_v62  ;;  %3909 = vmatprep.subr.mxu0 %v4718_v1 }
 0x97c   :  { %3960 = vmatprep.subr.mxu1 %v4718_v1  ;;  %3910 = vmatpush3.msra.mxu0 %v2846_v11  ;;  %v2854_v11 = vld [vmem:[%s6702_s4 + $0x318] sm:$0xff] }
 0x97d   :  { %3961 = vmatpush3.msra.mxu1 %v5541_v63  ;;  %3911 = vmatprep.subr.mxu0 %v4718_v1 }
 0x97e   :  { %3962 = vmatprep.subr.mxu1 %v4718_v1 }
 0x97f   :  { %3963 = vmatpush3.msra.mxu1 %v5548_v3 }
 0x980   :  { %3964 = vmatprep.subr.mxu1 %v4718_v1 }
 0x981   :  { %3965 = vmatpush3.msra.mxu1 %v5555_v5 }
 0x982   :  { %3966 = vmatprep.subr.mxu1 %v4718_v1 }
 0x983   :  { %3967 = vmatpush3.msra.mxu1 %v5562_v6 }
 0x984   :  { %4006 = vmatprep.subr.mxu1 %v4718_v1 }
 0xa24   :  { %v1076_v21 = vpop.f32.mrf.mxu1 }
 0xa25   :  { %v1080_v22 = vadd.f32 %v1076_v21, %v1009_v8  ;;  %v2866_v21 = vld [vmem:[%s6702_s4 + $0x378] sm:$0xff] }
 0xa26   :  { %v3900_v23 = vpop.f32.mrf.mxu1 }
 0xa27   :  { %v1081_v25 = vmul.f32 %v1080_v22, %v4927_v29  ;;  %v2865_v22 = vld [vmem:[%s6702_s4 + $0x370] sm:$0xff]  ;;  %v2864_v23 = vld [vmem:[%s6702_s4 + $0x368] sm:$0xff] }
 0xa29   :  { %4602 = vtanh.f32 %v1081_v25  ;;  %v2863_v25 = vld [vmem:[%s6702_s4 + $0x360] sm:$0xff] }
 0xa32   :  { %v1004_v26 = vpop.f32.mrf.mxu0 }
 0xa33   :  { %v5568_v27 = vadd.f32 %v1004_v26, %v5376_v12  ;;  %v2845_v12 = vld [vmem:[%s6702_s4 + $0x2d0] sm:$0xff]  ;;  %v2862_v26 = vld [vmem:[%s6702_s4 + $0x358] sm:$0xff] }
 0xa34   :  { %v3865_v28 = vpop.f32.mrf.mxu0  ;;  %3912 = vmatpush3.msra.mxu0 %v2845_v12  ;;  %v2853_v12 = vld [vmem:[%s6702_s4 + $0x310] sm:$0xff] }
 0xa35   :  { %3913 = vmatprep.subr.mxu0 %v4718_v1 }
 0xa36   :  { %v4603_v30 = vpop.eup %4602  ;;  %3914 = vmatpush3.msra.mxu0 %v2844_v14  ;;  %v2851_v14 = vld [vmem:[%s6702_s4 + $0x300] sm:$0xff] }
 0xa37   :  { %v1083_v0 = vmul.f32 %v4603_v30, %v4927_v29  ;;  %3915 = vmatprep.subr.mxu0 %v4718_v1  ;;  %v2860_v30 = vld [vmem:[%s6702_s4 + $0x348] sm:$0xff] }
 0xa38   :  { %3916 = vmatpush3.msra.mxu0 %v2843_v16 }
 0xa39   :  { %v1084_v2 = vadd.f32 %v1083_v0, %v4930_v36  ;;  %3917 = vmatprep.subr.mxu0 %v4718_v1 }
 0xa3a   :  { %3918 = vmatpush3.msra.mxu0 %v2842_v17 }
 0xa3b   :  { %1085 = vrot.lane.b32.xlu0 %v1084_v2, %s4721_s3  ;;  %3919 = vmatprep.subr.mxu0 %v4718_v1  ;;  %v1090_v35 = vmul.f32 %v1084_v2, %v5447_v49 }
 0xa3c   :  { %3920 = vmatpush3.msra.mxu0 %v2841_v18 }
 0xa3d   :  { %3921 = vmatprep.subr.mxu0 %v4718_v1 }
 0xa3e   :  { %3922 = vmatpush3.msra.mxu0 %v2840_v19 }
 0xa3f   :  { %3923 = vmatprep.subr.mxu0 %v4718_v1 }
 0xa40   :  { %3924 = vmatpush3.msra.mxu0 %v2839_v20 }
 0xa41   :  { %3925 = vmatprep.subr.mxu0 %v4718_v1 }
 0xa42   :  { %3926 = vmatpush3.msra.mxu0 %v2838_v31  ;;  %v1357_v31 = vld [vmem:[#allocation2 + $0x7] sm:$0x1] }
 0xa43   :  { %3927 = vmatprep.subr.mxu0 %v4718_v1 }
 0xa44   :  { %3928 = vmatpush3.msra.mxu0 %v2837_v32 }
 0xa45   :  { %3929 = vmatprep.subr.mxu0 %v4718_v1 }
 0xa46   :  { %3930 = vmatpush3.msra.mxu0 %v2836_v33 }
 0xa47   :  { %3931 = vmatprep.subr.mxu0 %v4718_v1 }
 0xa48   :  { %3932 = vmatpush3.msra.mxu0 %v2835_v34 }
 0xa49   :  { %3971 = vmatprep.subr.mxu0 %v4718_v1 }
 0xaad   :  { %v1086_v13 = vpop.permute.xlu0 %1085 }
 0xaae   :  { %v1087_v15 = vmul.f32 %v1086_v13, %v1084_v2  ;;  %v2859_v2 = vld [vmem:[%s6702_s4 + $0x340] sm:$0xff] }
 0xab0   :  { %1088 = vrot.lane.b32.xlu1 %v1087_v15, %s4722_s1 }
 0xb22   :  { %v1089_v37 = vpop.permute.xlu1 %1088 }
 0xb23   :  { %v5639_v38 = vadd.f32 %v1090_v35, %v1089_v37 }
 0xb25   :  { %4604 = vtanh.f32 %v5639_v38 }
 0xb32   :  { %v4605_v39 = vpop.eup %4604 }
 0xb33   :  { %v1093_v40 = vmul.f32 %v4605_v39, %v1086_v13  ;;  %v2852_v13 = vld [vmem:[%s6702_s4 + $0x308] sm:$0xff] }
 0xb35   :  { %4606 = vtanh.f32 %v1093_v40  ;;  %3969 = vmatmul.mubr.f32.vlgmr.msra.gmra.mxu1 %v1093_v40 }
 0xb36   :  { %4007 = vmatpush3.msra.mxu1 %v5453_v52  ;;  %4038 = vmatprep.mubr.msk.f32.mxu1 %vm4719_vm0, %v4718_v1 }
 0xb37   :  { %4008 = vmatprep.subr.mxu1 %v4718_v1 }
 0xb38   :  { %4009 = vmatpush3.msra.mxu1 %v5462_v53 }
 0xb39   :  { %4010 = vmatprep.subr.mxu1 %v4718_v1 }
 0xb3a   :  { %4011 = vmatpush3.msra.mxu1 %v5469_v54 }
 0xb3b   :  { %4012 = vmatprep.subr.mxu1 %v4718_v1 }
 0xb3c   :  { %4013 = vmatpush3.msra.mxu1 %v5476_v55 }
 0xb3d   :  { %4014 = vmatprep.subr.mxu1 %v4718_v1 }
 0xb3e   :  { %4015 = vmatpush3.msra.mxu1 %v5483_v24 }
 0xb3f   :  { %4016 = vmatprep.subr.mxu1 %v4718_v1 }
 0xb40   :  { %4017 = vmatpush3.msra.mxu1 %v5490_v43 }
 0xb41   :  { %4018 = vmatprep.subr.mxu1 %v4718_v1 }
 0xb42   :  { %v4607_v41 = vpop.eup %4606  ;;  %4019 = vmatpush3.msra.mxu1 %v5497_v57 }
 0xb43   :  { %3934 = vmatmul.mubr.f32.vlgmr.msra.gmra.mxu0 %v4607_v41  ;;  %4020 = vmatprep.subr.mxu1 %v4718_v1 }
 0xb44   :  { %4021 = vmatpush3.msra.mxu1 %v5504_v58  ;;  %4003 = vmatprep.mubr.msk.f32.mxu0 %vm4719_vm0, %v4718_v1 }
 0xb45   :  { %4022 = vmatprep.subr.mxu1 %v4718_v1  ;;  %3972 = vmatpush3.msra.mxu0 %v2866_v21  ;;  %v2874_v21 = vld [vmem:[%s6702_s4 + $0x3b8] sm:$0xff] }
 0xb46   :  { %4023 = vmatpush3.msra.mxu1 %v5513_v59  ;;  %3973 = vmatprep.subr.mxu0 %v4718_v1 }
 0xb47   :  { %4024 = vmatprep.subr.mxu1 %v4718_v1  ;;  %3974 = vmatpush3.msra.mxu0 %v2865_v22  ;;  %v2873_v22 = vld [vmem:[%s6702_s4 + $0x3b0] sm:$0xff] }
 0xb48   :  { %4025 = vmatpush3.msra.mxu1 %v5520_v60  ;;  %3975 = vmatprep.subr.mxu0 %v4718_v1 }
 0xb49   :  { %4026 = vmatprep.subr.mxu1 %v4718_v1  ;;  %3976 = vmatpush3.msra.mxu0 %v2864_v23  ;;  %v2872_v23 = vld [vmem:[%s6702_s4 + $0x3a8] sm:$0xff] }
 0xb4a   :  { %4027 = vmatpush3.msra.mxu1 %v5527_v61  ;;  %3977 = vmatprep.subr.mxu0 %v4718_v1 }
 0xb4b   :  { %4028 = vmatprep.subr.mxu1 %v4718_v1  ;;  %3978 = vmatpush3.msra.mxu0 %v2863_v25  ;;  %v2871_v25 = vld [vmem:[%s6702_s4 + $0x3a0] sm:$0xff] }
 0xb4c   :  { %4029 = vmatpush3.msra.mxu1 %v5534_v62  ;;  %3979 = vmatprep.subr.mxu0 %v4718_v1 }
 0xb4d   :  { %4030 = vmatprep.subr.mxu1 %v4718_v1  ;;  %3980 = vmatpush3.msra.mxu0 %v2862_v26  ;;  %v2870_v26 = vld [vmem:[%s6702_s4 + $0x398] sm:$0xff] }
 0xb4e   :  { %4031 = vmatpush3.msra.mxu1 %v5541_v63  ;;  %3981 = vmatprep.subr.mxu0 %v4718_v1 }
 0xb4f   :  { %4032 = vmatprep.subr.mxu1 %v4718_v1 }
 0xb50   :  { %4033 = vmatpush3.msra.mxu1 %v5548_v3 }
 0xb51   :  { %4034 = vmatprep.subr.mxu1 %v4718_v1 }
 0xb52   :  { %4035 = vmatpush3.msra.mxu1 %v5555_v5 }
 0xb53   :  { %4036 = vmatprep.subr.mxu1 %v4718_v1 }
 0xb54   :  { %4037 = vmatpush3.msra.mxu1 %v5562_v6 }
 0xb55   :  { %4076 = vmatprep.subr.mxu1 %v4718_v1 }
 0xbf5   :  { %v1250_v44 = vpop.f32.mrf.mxu1 }
 0xbf6   :  { %v1254_v45 = vadd.f32 %v1250_v44, %v1183_v42  ;;  %v2882_v44 = vld [vmem:[%s6702_s4 + $0x3f8] sm:$0xff] }
 0xbf7   :  { %v3970_v46 = vpop.f32.mrf.mxu1 }
 0xbf8   :  { %v1255_v47 = vmul.f32 %v1254_v45, %v4927_v29  ;;  %v2881_v45 = vld [vmem:[%s6702_s4 + $0x3f0] sm:$0xff]  ;;  %v2880_v46 = vld [vmem:[%s6702_s4 + $0x3e8] sm:$0xff] }
 0xbfa   :  { %4608 = vtanh.f32 %v1255_v47  ;;  %v2879_v47 = vld [vmem:[%s6702_s4 + $0x3e0] sm:$0xff] }
 0xc03   :  { %v1178_v48 = vpop.f32.mrf.mxu0 }
 0xc04   :  { %v5680_v49 = vadd.f32 %v1178_v48, %v5568_v27  ;;  %v2861_v27 = vld [vmem:[%s6702_s4 + $0x350] sm:$0xff]  ;;  %v2878_v48 = vld [vmem:[%s6702_s4 + $0x3d8] sm:$0xff] }
 0xc05   :  { %v3935_v50 = vpop.f32.mrf.mxu0  ;;  %3982 = vmatpush3.msra.mxu0 %v2861_v27  ;;  %v2869_v27 = vld [vmem:[%s6702_s4 + $0x390] sm:$0xff] }
 0xc06   :  { %3983 = vmatprep.subr.mxu0 %v4718_v1 }
 0xc07   :  { %v4609_v51 = vpop.eup %4608  ;;  %3984 = vmatpush3.msra.mxu0 %v2860_v30  ;;  %v2867_v30 = vld [vmem:[%s6702_s4 + $0x380] sm:$0xff] }
 0xc08   :  { %v1257_v56 = vmul.f32 %v4609_v51, %v4927_v29  ;;  %3985 = vmatprep.subr.mxu0 %v4718_v1  ;;  %v2876_v51 = vld [vmem:[%s6702_s4 + $0x3c8] sm:$0xff] }
 0xc09   :  { %3986 = vmatpush3.msra.mxu0 %v2859_v2 }
 0xc0a   :  { %v1258_v8 = vadd.f32 %v1257_v56, %v4930_v36  ;;  %3987 = vmatprep.subr.mxu0 %v4718_v1 }
 0xc0b   :  { %3988 = vmatpush3.msra.mxu0 %v2858_v4 }
 0xc0c   :  { %1259 = vrot.lane.b32.xlu0 %v1258_v8, %s4721_s3  ;;  %3989 = vmatprep.subr.mxu0 %v4718_v1  ;;  %v1264_v15 = vmul.f32 %v1258_v8, %v5639_v38 }
 0xc0d   :  { %3990 = vmatpush3.msra.mxu0 %v2857_v7 }
 0xc0e   :  { %3991 = vmatprep.subr.mxu0 %v4718_v1 }
 0xc0f   :  { %3992 = vmatpush3.msra.mxu0 %v2856_v9 }
 0xc10   :  { %3993 = vmatprep.subr.mxu0 %v4718_v1 }
 0xc11   :  { %3994 = vmatpush3.msra.mxu0 %v2855_v10 }
 0xc12   :  { %3995 = vmatprep.subr.mxu0 %v4718_v1 }
 0xc13   :  { %3996 = vmatpush3.msra.mxu0 %v2854_v11  ;;  %v1531_v11 = vld [vmem:[#allocation2 + $0x8] sm:$0x1] }
 0xc14   :  { %3997 = vmatprep.subr.mxu0 %v4718_v1 }
 0xc15   :  { %3998 = vmatpush3.msra.mxu0 %v2853_v12 }
 0xc16   :  { %3999 = vmatprep.subr.mxu0 %v4718_v1 }
 0xc17   :  { %4000 = vmatpush3.msra.mxu0 %v2852_v13 }
 0xc18   :  { %4001 = vmatprep.subr.mxu0 %v4718_v1 }
 0xc19   :  { %4002 = vmatpush3.msra.mxu0 %v2851_v14 }
 0xc1a   :  { %4041 = vmatprep.subr.mxu0 %v4718_v1 }
 0xc7e   :  { %v1260_v28 = vpop.permute.xlu0 %1259 }
 0xc7f   :  { %v1261_v0 = vmul.f32 %v1260_v28, %v1258_v8  ;;  %v2875_v8 = vld [vmem:[%s6702_s4 + $0x3c0] sm:$0xff] }
 0xc81   :  { %1262 = vrot.lane.b32.xlu1 %v1261_v0, %s4722_s1 }
 0xcf3   :  { %v1263_v16 = vpop.permute.xlu1 %1262 }
 0xcf4   :  { %v5751_v17 = vadd.f32 %v1264_v15, %v1263_v16 }
 0xcf6   :  { %4610 = vtanh.f32 %v5751_v17 }
 0xd03   :  { %v4611_v18 = vpop.eup %4610 }
 0xd04   :  { %v1267_v19 = vmul.f32 %v4611_v18, %v1260_v28  ;;  %v2868_v28 = vld [vmem:[%s6702_s4 + $0x388] sm:$0xff] }
 0xd06   :  { %4612 = vtanh.f32 %v1267_v19  ;;  %4039 = vmatmul.mubr.f32.vlgmr.msra.gmra.mxu1 %v1267_v19 }
 0xd07   :  { %4077 = vmatpush3.msra.mxu1 %v5453_v52  ;;  %4108 = vmatprep.mubr.msk.f32.mxu1 %vm4719_vm0, %v4718_v1 }
 0xd08   :  { %4078 = vmatprep.subr.mxu1 %v4718_v1 }
 0xd09   :  { %4079 = vmatpush3.msra.mxu1 %v5462_v53 }
 0xd0a   :  { %4080 = vmatprep.subr.mxu1 %v4718_v1 }
 0xd0b   :  { %4081 = vmatpush3.msra.mxu1 %v5469_v54 }
 0xd0c   :  { %4082 = vmatprep.subr.mxu1 %v4718_v1 }
 0xd0d   :  { %4083 = vmatpush3.msra.mxu1 %v5476_v55 }
 0xd0e   :  { %4084 = vmatprep.subr.mxu1 %v4718_v1 }
 0xd0f   :  { %4085 = vmatpush3.msra.mxu1 %v5483_v24 }
 0xd10   :  { %4086 = vmatprep.subr.mxu1 %v4718_v1 }
 0xd11   :  { %4087 = vmatpush3.msra.mxu1 %v5490_v43 }
 0xd12   :  { %4088 = vmatprep.subr.mxu1 %v4718_v1 }
 0xd13   :  { %v4613_v20 = vpop.eup %4612  ;;  %4089 = vmatpush3.msra.mxu1 %v5497_v57 }
 0xd14   :  { %4004 = vmatmul.mubr.f32.vlgmr.msra.gmra.mxu0 %v4613_v20  ;;  %4090 = vmatprep.subr.mxu1 %v4718_v1 }
 0xd15   :  { %4091 = vmatpush3.msra.mxu1 %v5504_v58  ;;  %4073 = vmatprep.mubr.msk.f32.mxu0 %vm4719_vm0, %v4718_v1 }
 0xd16   :  { %4092 = vmatprep.subr.mxu1 %v4718_v1  ;;  %4042 = vmatpush3.msra.mxu0 %v2882_v44  ;;  %v2890_v44 = vld [vmem:[%s6702_s4 + $0x438] sm:$0xff] }
 0xd17   :  { %4093 = vmatpush3.msra.mxu1 %v5513_v59  ;;  %4043 = vmatprep.subr.mxu0 %v4718_v1 }
 0xd18   :  { %4094 = vmatprep.subr.mxu1 %v4718_v1  ;;  %4044 = vmatpush3.msra.mxu0 %v2881_v45  ;;  %v2889_v45 = vld [vmem:[%s6702_s4 + $0x430] sm:$0xff] }
 0xd19   :  { %4095 = vmatpush3.msra.mxu1 %v5520_v60  ;;  %4045 = vmatprep.subr.mxu0 %v4718_v1 }
 0xd1a   :  { %4096 = vmatprep.subr.mxu1 %v4718_v1  ;;  %4046 = vmatpush3.msra.mxu0 %v2880_v46  ;;  %v2888_v46 = vld [vmem:[%s6702_s4 + $0x428] sm:$0xff] }
 0xd1b   :  { %4097 = vmatpush3.msra.mxu1 %v5527_v61  ;;  %4047 = vmatprep.subr.mxu0 %v4718_v1 }
 0xd1c   :  { %4098 = vmatprep.subr.mxu1 %v4718_v1  ;;  %4048 = vmatpush3.msra.mxu0 %v2879_v47  ;;  %v2887_v47 = vld [vmem:[%s6702_s4 + $0x420] sm:$0xff] }
 0xd1d   :  { %4099 = vmatpush3.msra.mxu1 %v5534_v62  ;;  %4049 = vmatprep.subr.mxu0 %v4718_v1 }
 0xd1e   :  { %4100 = vmatprep.subr.mxu1 %v4718_v1  ;;  %4050 = vmatpush3.msra.mxu0 %v2878_v48  ;;  %v2886_v48 = vld [vmem:[%s6702_s4 + $0x418] sm:$0xff] }
 0xd1f   :  { %4101 = vmatpush3.msra.mxu1 %v5541_v63  ;;  %4051 = vmatprep.subr.mxu0 %v4718_v1 }
 0xd20   :  { %4102 = vmatprep.subr.mxu1 %v4718_v1 }
 0xd21   :  { %4103 = vmatpush3.msra.mxu1 %v5548_v3 }
 0xd22   :  { %4104 = vmatprep.subr.mxu1 %v4718_v1 }
 0xd23   :  { %4105 = vmatpush3.msra.mxu1 %v5555_v5 }
 0xd24   :  { %4106 = vmatprep.subr.mxu1 %v4718_v1 }
 0xd25   :  { %4107 = vmatpush3.msra.mxu1 %v5562_v6 }
 0xd26   :  { %4146 = vmatprep.subr.mxu1 %v4718_v1 }
 0xdc6   :  { %v1424_v32 = vpop.f32.mrf.mxu1 }
 0xdc7   :  { %v1428_v33 = vadd.f32 %v1424_v32, %v1357_v31  ;;  %v2898_v32 = vld [vmem:[%s6702_s4 + $0x478] sm:$0xff] }
 0xdc8   :  { %v4040_v34 = vpop.f32.mrf.mxu1 }
 0xdc9   :  { %v1429_v35 = vmul.f32 %v1428_v33, %v4927_v29  ;;  %v2897_v33 = vld [vmem:[%s6702_s4 + $0x470] sm:$0xff]  ;;  %v2896_v34 = vld [vmem:[%s6702_s4 + $0x468] sm:$0xff] }
 0xdcb   :  { %4614 = vtanh.f32 %v1429_v35  ;;  %v2895_v35 = vld [vmem:[%s6702_s4 + $0x460] sm:$0xff] }
 0xdd4   :  { %v1352_v37 = vpop.f32.mrf.mxu0 }
 0xdd5   :  { %v5792_v38 = vadd.f32 %v1352_v37, %v5680_v49  ;;  %v2877_v49 = vld [vmem:[%s6702_s4 + $0x3d0] sm:$0xff]  ;;  %v2894_v37 = vld [vmem:[%s6702_s4 + $0x458] sm:$0xff] }
 0xdd6   :  { %v4005_v39 = vpop.f32.mrf.mxu0  ;;  %4052 = vmatpush3.msra.mxu0 %v2877_v49  ;;  %v2885_v49 = vld [vmem:[%s6702_s4 + $0x410] sm:$0xff] }
 0xdd7   :  { %4053 = vmatprep.subr.mxu0 %v4718_v1 }
 0xdd8   :  { %v4615_v40 = vpop.eup %4614  ;;  %4054 = vmatpush3.msra.mxu0 %v2876_v51  ;;  %v2883_v51 = vld [vmem:[%s6702_s4 + $0x400] sm:$0xff] }
 0xdd9   :  { %v1431_v41 = vmul.f32 %v4615_v40, %v4927_v29  ;;  %4055 = vmatprep.subr.mxu0 %v4718_v1  ;;  %v2892_v40 = vld [vmem:[%s6702_s4 + $0x448] sm:$0xff] }
 0xdda   :  { %4056 = vmatpush3.msra.mxu0 %v2875_v8 }
 0xddb   :  { %v1432_v42 = vadd.f32 %v1431_v41, %v4930_v36  ;;  %4057 = vmatprep.subr.mxu0 %v4718_v1 }
 0xddc   :  { %4058 = vmatpush3.msra.mxu0 %v2874_v21 }
 0xddd   :  { %1433 = vrot.lane.b32.xlu0 %v1432_v42, %s4721_s3  ;;  %4059 = vmatprep.subr.mxu0 %v4718_v1  ;;  %v1438_v0 = vmul.f32 %v1432_v42, %v5751_v17 }
 0xdde   :  { %4060 = vmatpush3.msra.mxu0 %v2873_v22 }
 0xddf   :  { %4061 = vmatprep.subr.mxu0 %v4718_v1 }
 0xde0   :  { %4062 = vmatpush3.msra.mxu0 %v2872_v23 }
 0xde1   :  { %4063 = vmatprep.subr.mxu0 %v4718_v1 }
 0xde2   :  { %4064 = vmatpush3.msra.mxu0 %v2871_v25  ;;  %v2910_v25 = vld [vmem:[%s6702_s4 + $0x4d8] sm:$0xff] }
 0xde3   :  { %4065 = vmatprep.subr.mxu0 %v4718_v1 }
 0xde4   :  { %4066 = vmatpush3.msra.mxu0 %v2870_v26  ;;  %v2909_v26 = vld [vmem:[%s6702_s4 + $0x4d0] sm:$0xff] }
 0xde5   :  { %4067 = vmatprep.subr.mxu0 %v4718_v1 }
 0xde6   :  { %4068 = vmatpush3.msra.mxu0 %v2869_v27 }
 0xde7   :  { %4069 = vmatprep.subr.mxu0 %v4718_v1 }
 0xde8   :  { %4070 = vmatpush3.msra.mxu0 %v2868_v28  ;;  %v2908_v28 = vld [vmem:[%s6702_s4 + $0x4c8] sm:$0xff] }
 0xde9   :  { %4071 = vmatprep.subr.mxu0 %v4718_v1 }
 0xdea   :  { %4072 = vmatpush3.msra.mxu0 %v2867_v30 }
 0xdeb   :  { %4111 = vmatprep.subr.mxu0 %v4718_v1 }
 0xe4f   :  { %v1434_v50 = vpop.permute.xlu0 %1433 }
 0xe50   :  { %v1435_v56 = vmul.f32 %v1434_v50, %v1432_v42  ;;  %v2891_v42 = vld [vmem:[%s6702_s4 + $0x440] sm:$0xff] }
 0xe52   :  { %1436 = vrot.lane.b32.xlu1 %v1435_v56, %s4722_s1 }
 0xec4   :  { %v1437_v2 = vpop.permute.xlu1 %1436 }
 0xec5   :  { %v5863_v4 = vadd.f32 %v1438_v0, %v1437_v2  ;;  %v2907_v0 = vld [vmem:[%s6702_s4 + $0x4c0] sm:$0xff]  ;;  %v2906_v2 = vld [vmem:[%s6702_s4 + $0x4b8] sm:$0xff] }
 0xec7   :  { %4616 = vtanh.f32 %v5863_v4 }
 0xed4   :  { %v4617_v7 = vpop.eup %4616 }
 0xed5   :  { %v1441_v9 = vmul.f32 %v4617_v7, %v1434_v50  ;;  %v2884_v50 = vld [vmem:[%s6702_s4 + $0x408] sm:$0xff] }
 0xed6   :  { %v2904_v7 = vld [vmem:[%s6702_s4 + $0x4a8] sm:$0xff] }
 0xed7   :  { %4618 = vtanh.f32 %v1441_v9  ;;  %4109 = vmatmul.mubr.f32.vlgmr.msra.gmra.mxu1 %v1441_v9  ;;  %v2903_v9 = vld [vmem:[%s6702_s4 + $0x4a0] sm:$0xff] }
 0xed8   :  { %4147 = vmatpush3.msra.mxu1 %v5453_v52  ;;  %4178 = vmatprep.mubr.msk.f32.mxu1 %vm4719_vm0, %v4718_v1 }
 0xed9   :  { %4148 = vmatprep.subr.mxu1 %v4718_v1 }
 0xeda   :  { %4149 = vmatpush3.msra.mxu1 %v5462_v53 }
 0xedb   :  { %4150 = vmatprep.subr.mxu1 %v4718_v1 }
 0xedc   :  { %4151 = vmatpush3.msra.mxu1 %v5469_v54 }
 0xedd   :  { %4152 = vmatprep.subr.mxu1 %v4718_v1 }
 0xede   :  { %4153 = vmatpush3.msra.mxu1 %v5476_v55 }
 0xedf   :  { %4154 = vmatprep.subr.mxu1 %v4718_v1 }
 0xee0   :  { %4155 = vmatpush3.msra.mxu1 %v5483_v24 }
 0xee1   :  { %4156 = vmatprep.subr.mxu1 %v4718_v1 }
 0xee2   :  { %4157 = vmatpush3.msra.mxu1 %v5490_v43 }
 0xee3   :  { %4158 = vmatprep.subr.mxu1 %v4718_v1 }
 0xee4   :  { %v4619_v10 = vpop.eup %4618  ;;  %4159 = vmatpush3.msra.mxu1 %v5497_v57 }
 0xee5   :  { %4074 = vmatmul.mubr.f32.vlgmr.msra.gmra.mxu0 %v4619_v10  ;;  %4160 = vmatprep.subr.mxu1 %v4718_v1  ;;  %v2902_v10 = vld [vmem:[%s6702_s4 + $0x498] sm:$0xff] }
 0xee6   :  { %4161 = vmatpush3.msra.mxu1 %v5504_v58  ;;  %4143 = vmatprep.mubr.msk.f32.mxu0 %vm4719_vm0, %v4718_v1 }
 0xee7   :  { %4162 = vmatprep.subr.mxu1 %v4718_v1  ;;  %4112 = vmatpush3.msra.mxu0 %v2898_v32  ;;  %v6116_v32 = vld [vmem:[%s6700_s2 + $0x60] sm:$0xff] }
 0xee8   :  { %4163 = vmatpush3.msra.mxu1 %v5513_v59  ;;  %4113 = vmatprep.subr.mxu0 %v4718_v1 }
 0xee9   :  { %4164 = vmatprep.subr.mxu1 %v4718_v1  ;;  %4114 = vmatpush3.msra.mxu0 %v2897_v33  ;;  %v6123_v33 = vld [vmem:[%s6700_s2 + $0x58] sm:$0xff] }
 0xeea   :  { %4165 = vmatpush3.msra.mxu1 %v5520_v60  ;;  %4115 = vmatprep.subr.mxu0 %v4718_v1 }
 0xeeb   :  { %4166 = vmatprep.subr.mxu1 %v4718_v1  ;;  %4116 = vmatpush3.msra.mxu0 %v2896_v34  ;;  %v6130_v34 = vld [vmem:[%s6700_s2 + $0x50] sm:$0xff] }
 0xeec   :  { %4167 = vmatpush3.msra.mxu1 %v5527_v61  ;;  %4117 = vmatprep.subr.mxu0 %v4718_v1 }
 0xeed   :  { %4168 = vmatprep.subr.mxu1 %v4718_v1  ;;  %4118 = vmatpush3.msra.mxu0 %v2895_v35 }
 0xeee   :  { %4169 = vmatpush3.msra.mxu1 %v5534_v62  ;;  %4119 = vmatprep.subr.mxu0 %v4718_v1 }
 0xeef   :  { %4170 = vmatprep.subr.mxu1 %v4718_v1  ;;  %4120 = vmatpush3.msra.mxu0 %v2894_v37  ;;  %v6137_v37 = vld [vmem:[%s6700_s2 + $0x48] sm:$0xff] }
 0xef0   :  { %4171 = vmatpush3.msra.mxu1 %v5541_v63  ;;  %4121 = vmatprep.subr.mxu0 %v4718_v1 }
 0xef1   :  { %4172 = vmatprep.subr.mxu1 %v4718_v1 }
 0xef2   :  { %4173 = vmatpush3.msra.mxu1 %v5548_v3 }
 0xef3   :  { %4174 = vmatprep.subr.mxu1 %v4718_v1 }
 0xef4   :  { %4175 = vmatpush3.msra.mxu1 %v5555_v5 }
 0xef5   :  { %4176 = vmatprep.subr.mxu1 %v4718_v1 }
 0xef6   :  { %4177 = vmatpush3.msra.mxu1 %v5562_v6 }
 0xef7   :  { %4216 = vmatprep.subr.mxu1 %v4718_v1 }
 0xf97   :  { %v1598_v12 = vpop.f32.mrf.mxu1 }
 0xf98   :  { %v1602_v13 = vadd.f32 %v1598_v12, %v1531_v11  ;;  %v2901_v11 = vld [vmem:[%s6702_s4 + $0x490] sm:$0xff]  ;;  %v2900_v12 = vld [vmem:[%s6702_s4 + $0x488] sm:$0xff] }
 0xf99   :  { %v4110_v14 = vpop.f32.mrf.mxu1 }
 0xf9a   :  { %v1603_v15 = vmul.f32 %v1602_v13, %v4927_v29  ;;  %v2899_v13 = vld [vmem:[%s6702_s4 + $0x480] sm:$0xff] }
 0xf9c   :  { %4620 = vtanh.f32 %v1603_v15 }
 0xfa5   :  { %v1526_v16 = vpop.f32.mrf.mxu0 }
 0xfa6   :  { %v5904_v17 = vadd.f32 %v1526_v16, %v5792_v38  ;;  %v2893_v38 = vld [vmem:[%s6702_s4 + $0x450] sm:$0xff] }
 0xfa7   :  { %v4075_v18 = vpop.f32.mrf.mxu0  ;;  %4122 = vmatpush3.msra.mxu0 %v2893_v38  ;;  %v6144_v38 = vld [vmem:[%s6700_s2 + $0x40] sm:$0xff] }
 0xfa8   :  { %4123 = vmatprep.subr.mxu0 %v4718_v1 }
 0xfa9   :  { %v4621_v19 = vpop.eup %4620  ;;  %4124 = vmatpush3.msra.mxu0 %v2892_v40  ;;  %v6160_v40 = vld [vmem:[%s6700_s2 + $0x30] sm:$0xff] }
 0xfaa   :  { %v1605_v20 = vmul.f32 %v4621_v19, %v4927_v29  ;;  %4125 = vmatprep.subr.mxu0 %v4718_v1  ;;  %v6093_v19 = vld [vmem:[%s6700_s2 + $0x78] sm:$0xff] }
 0xfab   :  { %4126 = vmatpush3.msra.mxu0 %v2891_v42  ;;  %v6174_v42 = vld [vmem:[%s6700_s2 + $0x20] sm:$0xff] }
 0xfac   :  { %v1606_v31 = vadd.f32 %v1605_v20, %v4930_v36  ;;  %4127 = vmatprep.subr.mxu0 %v4718_v1  ;;  %v6102_v20 = vld [vmem:[%s6700_s2 + $0x70] sm:$0xff] }
 0xfad   :  { %4128 = vmatpush3.msra.mxu0 %v2890_v44  ;;  %v6181_v44 = vld [vmem:[%s6700_s2 + $0x18] sm:$0xff] }
 0xfae   :  { %1607 = vrot.lane.b32.xlu0 %v1606_v31, %s4721_s3  ;;  %4129 = vmatprep.subr.mxu0 %v4718_v1  ;;  %v1612_v56 = vmul.f32 %v1606_v31, %v5863_v4  ;;  %v2905_v4 = vld [vmem:[%s6702_s4 + $0x4b0] sm:$0xff] }
 0xfaf   :  { %4130 = vmatpush3.msra.mxu0 %v2889_v45  ;;  %v6188_v45 = vld [vmem:[%s6700_s2 + $0x10] sm:$0xff] }
 0xfb0   :  { %4131 = vmatprep.subr.mxu0 %v4718_v1 }
 0xfb1   :  { %4132 = vmatpush3.msra.mxu0 %v2888_v46  ;;  %v6195_v46 = vld [vmem:[%s6700_s2 + $0x8] sm:$0xff] }
 0xfb2   :  { %4133 = vmatprep.subr.mxu0 %v4718_v1 }
 0xfb3   :  { %4134 = vmatpush3.msra.mxu0 %v2887_v47  ;;  %v6202_v47 = vld [vmem:[%s6700_s2] sm:$0xff] }
 0xfb4   :  { %4135 = vmatprep.subr.mxu0 %v4718_v1 }
 0xfb5   :  { %4136 = vmatpush3.msra.mxu0 %v2886_v48  ;;  %v1879_v48 = vld [vmem:[#allocation2 + $0xa] sm:$0x1] }
 0xfb6   :  { %4137 = vmatprep.subr.mxu0 %v4718_v1 }
 0xfb7   :  { %4138 = vmatpush3.msra.mxu0 %v2885_v49 }
 0xfb8   :  { %4139 = vmatprep.subr.mxu0 %v4718_v1 }
 0xfb9   :  { %4140 = vmatpush3.msra.mxu0 %v2884_v50 }
 0xfba   :  { %4141 = vmatprep.subr.mxu0 %v4718_v1 }
 0xfbb   :  { %4142 = vmatpush3.msra.mxu0 %v2883_v51 }
 0xfbc   :  { %4181 = vmatprep.subr.mxu0 %v4718_v1 }
0x1020   :  { %v1608_v39 = vpop.permute.xlu0 %1607 }
0x1021   :  { %v1609_v41 = vmul.f32 %v1608_v39, %v1606_v31  ;;  %v6109_v31 = vld [vmem:[%s6700_s2 + $0x68] sm:$0xff] }
0x1023   :  { %1610 = vrot.lane.b32.xlu1 %v1609_v41, %s4722_s1  ;;  %v6167_v41 = vld [vmem:[%s6700_s2 + $0x28] sm:$0xff] }
0x1095   :  { %v1611_v8 = vpop.permute.xlu1 %1610 }
0x1096   :  { %v5975_v21 = vadd.f32 %v1612_v56, %v1611_v8 }
0x1098   :  { %4622 = vtanh.f32 %v5975_v21 }
0x10a5   :  { %v4623_v22 = vpop.eup %4622 }
0x10a6   :  { %v1615_v23 = vmul.f32 %v4623_v22, %v1608_v39  ;;  %v6153_v39 = vld [vmem:[%s6700_s2 + $0x38] sm:$0xff] }
0x10a8   :  { %4624 = vtanh.f32 %v1615_v23  ;;  %4179 = vmatmul.mubr.f32.vlgmr.msra.gmra.mxu1 %v1615_v23 }
0x10a9   :  { %4217 = vmatpush3.msra.mxu1 %v5453_v52  ;;  %4248 = vmatprep.mubr.msk.f32.mxu1 %vm4719_vm0, %v4718_v1 }
0x10aa   :  { %4218 = vmatprep.subr.mxu1 %v4718_v1 }
0x10ab   :  { %4219 = vmatpush3.msra.mxu1 %v5462_v53  ;;  %v1705_v53 = vld [vmem:[#allocation2 + $0x9] sm:$0x1] }
0x10ac   :  { %4220 = vmatprep.subr.mxu1 %v4718_v1 }
0x10ad   :  { %4221 = vmatpush3.msra.mxu1 %v5469_v54 }
0x10ae   :  { %4222 = vmatprep.subr.mxu1 %v4718_v1 }
0x10af   :  { %4223 = vmatpush3.msra.mxu1 %v5476_v55 }
0x10b0   :  { %4224 = vmatprep.subr.mxu1 %v4718_v1 }
0x10b1   :  { %4225 = vmatpush3.msra.mxu1 %v5483_v24 }
0x10b2   :  { %4226 = vmatprep.subr.mxu1 %v4718_v1 }
0x10b3   :  { %4227 = vmatpush3.msra.mxu1 %v5490_v43 }
0x10b4   :  { %4228 = vmatprep.subr.mxu1 %v4718_v1 }
0x10b5   :  { %v4625_v52 = vpop.eup %4624  ;;  %4229 = vmatpush3.msra.mxu1 %v5497_v57 }
0x10b6   :  { %4144 = vmatmul.mubr.f32.vlgmr.msra.gmra.mxu0 %v4625_v52  ;;  %4230 = vmatprep.subr.mxu1 %v4718_v1 }
0x10b7   :  { %4231 = vmatpush3.msra.mxu1 %v5504_v58  ;;  %4213 = vmatprep.mubr.msk.f32.mxu0 %vm4719_vm0, %v4718_v1 }
0x10b8   :  { %4232 = vmatprep.subr.mxu1 %v4718_v1 }
0x10b9   :  { %4233 = vmatpush3.msra.mxu1 %v5513_v59 }
0x10ba   :  { %4234 = vmatprep.subr.mxu1 %v4718_v1 }
0x10bb   :  { %4235 = vmatpush3.msra.mxu1 %v5520_v60 }
0x10bc   :  { %4236 = vmatprep.subr.mxu1 %v4718_v1 }
0x10bd   :  { %4237 = vmatpush3.msra.mxu1 %v5527_v61 }
0x10be   :  { %4238 = vmatprep.subr.mxu1 %v4718_v1 }
0x10bf   :  { %4239 = vmatpush3.msra.mxu1 %v5534_v62 }
0x10c0   :  { %4240 = vmatprep.subr.mxu1 %v4718_v1 }
0x10c1   :  { %4241 = vmatpush3.msra.mxu1 %v5541_v63  ;;  %v2914_v63 = vld [vmem:[%s6702_s4 + $0x4f8] sm:$0xff] }
0x10c2   :  { %4242 = vmatprep.subr.mxu1 %v4718_v1  ;;  %4182 = vmatpush3.msra.mxu0 %v2914_v63  ;;  %v2922_v63 = vld [vmem:[%s6702_s4 + $0x538] sm:$0xff] }
0x10c3   :  { %4243 = vmatpush3.msra.mxu1 %v5548_v3  ;;  %4183 = vmatprep.subr.mxu0 %v4718_v1  ;;  %v2913_v3 = vld [vmem:[%s6702_s4 + $0x4f0] sm:$0xff] }
0x10c4   :  { %4244 = vmatprep.subr.mxu1 %v4718_v1  ;;  %4184 = vmatpush3.msra.mxu0 %v2913_v3  ;;  %v2921_v3 = vld [vmem:[%s6702_s4 + $0x530] sm:$0xff] }
0x10c5   :  { %4245 = vmatpush3.msra.mxu1 %v5555_v5  ;;  %v2912_v5 = vld [vmem:[%s6702_s4 + $0x4e8] sm:$0xff]  ;;  %4185 = vmatprep.subr.mxu0 %v4718_v1 }
0x10c6   :  { %4246 = vmatprep.subr.mxu1 %v4718_v1  ;;  %4186 = vmatpush3.msra.mxu0 %v2912_v5  ;;  %v2920_v5 = vld [vmem:[%s6702_s4 + $0x528] sm:$0xff] }
0x10c7   :  { %4247 = vmatpush3.msra.mxu1 %v5562_v6  ;;  %v2911_v6 = vld [vmem:[%s6702_s4 + $0x4e0] sm:$0xff]  ;;  %4187 = vmatprep.subr.mxu0 %v4718_v1 }
0x10c8   :  { %4286 = vmatprep.subr.mxu1 %v4718_v1  ;;  %4188 = vmatpush3.msra.mxu0 %v2911_v6  ;;  %v2919_v6 = vld [vmem:[%s6702_s4 + $0x520] sm:$0xff] }
0x10c9   :  { %4189 = vmatprep.subr.mxu0 %v4718_v1 }
0x10ca   :  { %4190 = vmatpush3.msra.mxu0 %v2910_v25  ;;  %v2918_v25 = vld [vmem:[%s6702_s4 + $0x518] sm:$0xff] }
0x10cb   :  { %4191 = vmatprep.subr.mxu0 %v4718_v1 }
0x10cc   :  { %4192 = vmatpush3.msra.mxu0 %v2909_v26  ;;  %v2917_v26 = vld [vmem:[%s6702_s4 + $0x510] sm:$0xff] }
0x10cd   :  { %4193 = vmatprep.subr.mxu0 %v4718_v1 }
0x10ce   :  { %4194 = vmatpush3.msra.mxu0 %v2908_v28  ;;  %v2915_v28 = vld [vmem:[%s6702_s4 + $0x500] sm:$0xff] }
0x10cf   :  { %4195 = vmatprep.subr.mxu0 %v4718_v1 }
0x10d0   :  { %4196 = vmatpush3.msra.mxu0 %v2907_v0 }
0x10d1   :  { %4197 = vmatprep.subr.mxu0 %v4718_v1 }
0x10d2   :  { %4198 = vmatpush3.msra.mxu0 %v2906_v2 }
0x10d3   :  { %4199 = vmatprep.subr.mxu0 %v4718_v1 }
0x10d4   :  { %4200 = vmatpush3.msra.mxu0 %v2905_v4 }
0x10d5   :  { %4201 = vmatprep.subr.mxu0 %v4718_v1 }
0x10d6   :  { %4202 = vmatpush3.msra.mxu0 %v2904_v7 }
0x10d7   :  { %4203 = vmatprep.subr.mxu0 %v4718_v1 }
0x10d8   :  { %4204 = vmatpush3.msra.mxu0 %v2903_v9 }
0x10d9   :  { %4205 = vmatprep.subr.mxu0 %v4718_v1 }
0x10da   :  { %4206 = vmatpush3.msra.mxu0 %v2902_v10  ;;  %v2053_v10 = vld [vmem:[#allocation2 + $0xb] sm:$0x1] }
0x10db   :  { %4207 = vmatprep.subr.mxu0 %v4718_v1 }
0x10dc   :  { %4208 = vmatpush3.msra.mxu0 %v2901_v11 }
0x10dd   :  { %4209 = vmatprep.subr.mxu0 %v4718_v1 }
0x10de   :  { %4210 = vmatpush3.msra.mxu0 %v2900_v12 }
0x10df   :  { %4211 = vmatprep.subr.mxu0 %v4718_v1 }
0x10e0   :  { %4212 = vmatpush3.msra.mxu0 %v2899_v13 }
0x10e1   :  { %4251 = vmatprep.subr.mxu0 %v4718_v1 }
0x1168   :  { %v1772_v54 = vpop.f32.mrf.mxu1 }
0x1169   :  { %v1776_v55 = vadd.f32 %v1772_v54, %v1705_v53  ;;  %v2930_v54 = vld [vmem:[%s6702_s4 + $0x578] sm:$0xff] }
0x116a   :  { %v4180_v24 = vpop.f32.mrf.mxu1 }
0x116b   :  { %v1777_v43 = vmul.f32 %v1776_v55, %v4927_v29  ;;  %v2929_v55 = vld [vmem:[%s6702_s4 + $0x570] sm:$0xff]  ;;  %v2928_v24 = vld [vmem:[%s6702_s4 + $0x568] sm:$0xff] }
0x116d   :  { %4626 = vtanh.f32 %v1777_v43  ;;  %v2927_v43 = vld [vmem:[%s6702_s4 + $0x560] sm:$0xff] }
0x1176   :  { %v1700_v57 = vpop.f32.mrf.mxu0 }
0x1177   :  { %v6016_v58 = vadd.f32 %v1700_v57, %v5904_v17  ;;  %v2926_v57 = vld [vmem:[%s6702_s4 + $0x558] sm:$0xff] }
0x1178   :  { %v4145_v59 = vpop.f32.mrf.mxu0 }
0x117a   :  { %v4627_v60 = vpop.eup %4626 }
0x117b   :  { %v1779_v61 = vmul.f32 %v4627_v60, %v4927_v29  ;;  %v2924_v60 = vld [vmem:[%s6702_s4 + $0x548] sm:$0xff] }
0x117d   :  { %v1780_v62 = vadd.f32 %v1779_v61, %v4930_v36 }
0x117f   :  { %1781 = vrot.lane.b32.xlu0 %v1780_v62, %s4721_s3  ;;  %v1786_v14 = vmul.f32 %v1780_v62, %v5975_v21 }
0x11f1   :  { %v1782_v27 = vpop.permute.xlu0 %1781 }
0x11f2   :  { %v1783_v30 = vmul.f32 %v1782_v27, %v1780_v62  ;;  %v2923_v62 = vld [vmem:[%s6702_s4 + $0x540] sm:$0xff] }
0x11f4   :  { %1784 = vrot.lane.b32.xlu1 %v1783_v30, %s4722_s1 }
0x1266   :  { %v1785_v15 = vpop.permute.xlu1 %1784 }
0x1267   :  { %v6087_v16 = vadd.f32 %v1786_v14, %v1785_v15 }
0x1269   :  { %4628 = vtanh.f32 %v6087_v16 }
0x1276   :  { %v4629_v17 = vpop.eup %4628 }
0x1277   :  { %v1789_v18 = vmul.f32 %v4629_v17, %v1782_v27  ;;  %v2916_v27 = vld [vmem:[%s6702_s4 + $0x508] sm:$0xff] }
0x1279   :  { %4630 = vtanh.f32 %v1789_v18  ;;  %4249 = vmatmul.mubr.f32.vlgmr.msra.gmra.mxu1 %v1789_v18 }
0x127a   :  { %4287 = vmatpush3.msra.mxu1 %v6093_v19  ;;  %4318 = vmatprep.mubr.msk.f32.mxu1 %vm4719_vm0, %v4718_v1 }
0x127b   :  { %4288 = vmatprep.subr.mxu1 %v4718_v1 }
0x127c   :  { %4289 = vmatpush3.msra.mxu1 %v6102_v20 }
0x127d   :  { %4290 = vmatprep.subr.mxu1 %v4718_v1 }
0x127e   :  { %4291 = vmatpush3.msra.mxu1 %v6109_v31 }
0x127f   :  { %4292 = vmatprep.subr.mxu1 %v4718_v1 }
0x1280   :  { %4293 = vmatpush3.msra.mxu1 %v6116_v32 }
0x1281   :  { %4294 = vmatprep.subr.mxu1 %v4718_v1 }
0x1282   :  { %4295 = vmatpush3.msra.mxu1 %v6123_v33 }
0x1283   :  { %4296 = vmatprep.subr.mxu1 %v4718_v1 }
0x1284   :  { %4297 = vmatpush3.msra.mxu1 %v6130_v34 }
0x1285   :  { %4298 = vmatprep.subr.mxu1 %v4718_v1 }
0x1286   :  { %v4631_v35 = vpop.eup %4630  ;;  %4299 = vmatpush3.msra.mxu1 %v6137_v37 }
0x1287   :  { %4214 = vmatmul.mubr.f32.vlgmr.msra.gmra.mxu0 %v4631_v35  ;;  %4300 = vmatprep.subr.mxu1 %v4718_v1 }
0x1288   :  { %4301 = vmatpush3.msra.mxu1 %v6144_v38  ;;  %4283 = vmatprep.mubr.msk.f32.mxu0 %vm4719_vm0, %v4718_v1 }
0x1289   :  { %4302 = vmatprep.subr.mxu1 %v4718_v1  ;;  %4252 = vmatpush3.msra.mxu0 %v2930_v54  ;;  %v2938_v54 = vld [vmem:[%s6702_s4 + $0x5b8] sm:$0xff] }
0x128a   :  { %4303 = vmatpush3.msra.mxu1 %v6153_v39  ;;  %4253 = vmatprep.subr.mxu0 %v4718_v1 }
0x128b   :  { %4304 = vmatprep.subr.mxu1 %v4718_v1  ;;  %4254 = vmatpush3.msra.mxu0 %v2929_v55  ;;  %v2937_v55 = vld [vmem:[%s6702_s4 + $0x5b0] sm:$0xff] }
0x128c   :  { %4305 = vmatpush3.msra.mxu1 %v6160_v40  ;;  %4255 = vmatprep.subr.mxu0 %v4718_v1 }
0x128d   :  { %4306 = vmatprep.subr.mxu1 %v4718_v1  ;;  %4256 = vmatpush3.msra.mxu0 %v2928_v24  ;;  %v2936_v24 = vld [vmem:[%s6702_s4 + $0x5a8] sm:$0xff] }
0x128e   :  { %4307 = vmatpush3.msra.mxu1 %v6167_v41  ;;  %4257 = vmatprep.subr.mxu0 %v4718_v1 }
0x128f   :  { %4308 = vmatprep.subr.mxu1 %v4718_v1  ;;  %4258 = vmatpush3.msra.mxu0 %v2927_v43  ;;  %v2935_v43 = vld [vmem:[%s6702_s4 + $0x5a0] sm:$0xff] }
0x1290   :  { %4309 = vmatpush3.msra.mxu1 %v6174_v42  ;;  %4259 = vmatprep.subr.mxu0 %v4718_v1 }
0x1291   :  { %4310 = vmatprep.subr.mxu1 %v4718_v1  ;;  %4260 = vmatpush3.msra.mxu0 %v2926_v57  ;;  %v2934_v57 = vld [vmem:[%s6702_s4 + $0x598] sm:$0xff] }
0x1292   :  { %4311 = vmatpush3.msra.mxu1 %v6181_v44  ;;  %4261 = vmatprep.subr.mxu0 %v4718_v1 }
0x1293   :  { %4312 = vmatprep.subr.mxu1 %v4718_v1 }
0x1294   :  { %4313 = vmatpush3.msra.mxu1 %v6188_v45 }
0x1295   :  { %4314 = vmatprep.subr.mxu1 %v4718_v1 }
0x1296   :  { %4315 = vmatpush3.msra.mxu1 %v6195_v46 }
0x1297   :  { %4316 = vmatprep.subr.mxu1 %v4718_v1 }
0x1298   :  { %4317 = vmatpush3.msra.mxu1 %v6202_v47 }
0x1299   :  { %4356 = vmatprep.subr.mxu1 %v4718_v1 }
0x1339   :  { %v1946_v49 = vpop.f32.mrf.mxu1 }
0x133a   :  { %v1950_v50 = vadd.f32 %v1946_v49, %v1879_v48  ;;  %v2946_v49 = vld [vmem:[%s6702_s4 + $0x5f8] sm:$0xff] }
0x133b   :  { %v4250_v51 = vpop.f32.mrf.mxu1 }
0x133c   :  { %v1951_v56 = vmul.f32 %v1950_v50, %v4927_v29  ;;  %v2945_v50 = vld [vmem:[%s6702_s4 + $0x5f0] sm:$0xff]  ;;  %v2944_v51 = vld [vmem:[%s6702_s4 + $0x5e8] sm:$0xff] }
0x133e   :  { %4632 = vtanh.f32 %v1951_v56  ;;  %v2943_v56 = vld [vmem:[%s6702_s4 + $0x5e0] sm:$0xff] }
0x1347   :  { %v1874_v8 = vpop.f32.mrf.mxu0 }
0x1348   :  { %v6208_v21 = vadd.f32 %v1874_v8, %v6016_v58  ;;  %v2925_v58 = vld [vmem:[%s6702_s4 + $0x550] sm:$0xff]  ;;  %v2942_v8 = vld [vmem:[%s6702_s4 + $0x5d8] sm:$0xff] }
0x1349   :  { %v4215_v22 = vpop.f32.mrf.mxu0  ;;  %4262 = vmatpush3.msra.mxu0 %v2925_v58  ;;  %v2933_v58 = vld [vmem:[%s6702_s4 + $0x590] sm:$0xff] }
0x134a   :  { %4263 = vmatprep.subr.mxu0 %v4718_v1 }
0x134b   :  { %v4633_v23 = vpop.eup %4632  ;;  %4264 = vmatpush3.msra.mxu0 %v2924_v60  ;;  %v2931_v60 = vld [vmem:[%s6702_s4 + $0x580] sm:$0xff] }
0x134c   :  { %v1953_v52 = vmul.f32 %v4633_v23, %v4927_v29  ;;  %4265 = vmatprep.subr.mxu0 %v4718_v1  ;;  %v2940_v23 = vld [vmem:[%s6702_s4 + $0x5c8] sm:$0xff] }
0x134d   :  { %4266 = vmatpush3.msra.mxu0 %v2923_v62 }
0x134e   :  { %v1954_v53 = vadd.f32 %v1953_v52, %v4930_v36  ;;  %4267 = vmatprep.subr.mxu0 %v4718_v1 }
0x134f   :  { %4268 = vmatpush3.msra.mxu0 %v2922_v63 }
0x1350   :  { %1955 = vrot.lane.b32.xlu0 %v1954_v53, %s4721_s3  ;;  %4269 = vmatprep.subr.mxu0 %v4718_v1  ;;  %v1960_v30 = vmul.f32 %v1954_v53, %v6087_v16 }
0x1351   :  { %4270 = vmatpush3.msra.mxu0 %v2921_v3 }
0x1352   :  { %4271 = vmatprep.subr.mxu0 %v4718_v1 }
0x1353   :  { %4272 = vmatpush3.msra.mxu0 %v2920_v5 }
0x1354   :  { %4273 = vmatprep.subr.mxu0 %v4718_v1 }
0x1355   :  { %4274 = vmatpush3.msra.mxu0 %v2919_v6 }
0x1356   :  { %4275 = vmatprep.subr.mxu0 %v4718_v1 }
0x1357   :  { %4276 = vmatpush3.msra.mxu0 %v2918_v25  ;;  %v2227_v25 = vld [vmem:[#allocation2 + $0xc] sm:$0x1] }
0x1358   :  { %4277 = vmatprep.subr.mxu0 %v4718_v1 }
0x1359   :  { %4278 = vmatpush3.msra.mxu0 %v2917_v26 }
0x135a   :  { %4279 = vmatprep.subr.mxu0 %v4718_v1 }
0x135b   :  { %4280 = vmatpush3.msra.mxu0 %v2916_v27 }
0x135c   :  { %4281 = vmatprep.subr.mxu0 %v4718_v1 }
0x135d   :  { %4282 = vmatpush3.msra.mxu0 %v2915_v28 }
0x135e   :  { %4321 = vmatprep.subr.mxu0 %v4718_v1 }
0x13c2   :  { %v1956_v59 = vpop.permute.xlu0 %1955 }
0x13c3   :  { %v1957_v61 = vmul.f32 %v1956_v59, %v1954_v53  ;;  %v2939_v53 = vld [vmem:[%s6702_s4 + $0x5c0] sm:$0xff] }
0x13c5   :  { %1958 = vrot.lane.b32.xlu1 %v1957_v61, %s4722_s1 }
0x1437   :  { %v1959_v0 = vpop.permute.xlu1 %1958 }
0x1438   :  { %v6279_v2 = vadd.f32 %v1960_v30, %v1959_v0 }
0x143a   :  { %4634 = vtanh.f32 %v6279_v2 }
0x1447   :  { %v4635_v4 = vpop.eup %4634 }
0x1448   :  { %v1963_v7 = vmul.f32 %v4635_v4, %v1956_v59  ;;  %v2932_v59 = vld [vmem:[%s6702_s4 + $0x588] sm:$0xff] }
0x144a   :  { %4636 = vtanh.f32 %v1963_v7  ;;  %4319 = vmatmul.mubr.f32.vlgmr.msra.gmra.mxu1 %v1963_v7 }
0x144b   :  { %4357 = vmatpush3.msra.mxu1 %v6093_v19  ;;  %4388 = vmatprep.mubr.msk.f32.mxu1 %vm4719_vm0, %v4718_v1 }
0x144c   :  { %4358 = vmatprep.subr.mxu1 %v4718_v1 }
0x144d   :  { %4359 = vmatpush3.msra.mxu1 %v6102_v20 }
0x144e   :  { %4360 = vmatprep.subr.mxu1 %v4718_v1 }
0x144f   :  { %4361 = vmatpush3.msra.mxu1 %v6109_v31 }
0x1450   :  { %4362 = vmatprep.subr.mxu1 %v4718_v1 }
0x1451   :  { %4363 = vmatpush3.msra.mxu1 %v6116_v32 }
0x1452   :  { %4364 = vmatprep.subr.mxu1 %v4718_v1 }
0x1453   :  { %4365 = vmatpush3.msra.mxu1 %v6123_v33 }
0x1454   :  { %4366 = vmatprep.subr.mxu1 %v4718_v1 }
0x1455   :  { %4367 = vmatpush3.msra.mxu1 %v6130_v34 }
0x1456   :  { %4368 = vmatprep.subr.mxu1 %v4718_v1 }
0x1457   :  { %v4637_v9 = vpop.eup %4636  ;;  %4369 = vmatpush3.msra.mxu1 %v6137_v37 }
0x1458   :  { %4284 = vmatmul.mubr.f32.vlgmr.msra.gmra.mxu0 %v4637_v9  ;;  %4370 = vmatprep.subr.mxu1 %v4718_v1 }
0x1459   :  { %4371 = vmatpush3.msra.mxu1 %v6144_v38  ;;  %4353 = vmatprep.mubr.msk.f32.mxu0 %vm4719_vm0, %v4718_v1 }
0x145a   :  { %4372 = vmatprep.subr.mxu1 %v4718_v1  ;;  %4322 = vmatpush3.msra.mxu0 %v2946_v49  ;;  %v2954_v49 = vld [vmem:[%s6702_s4 + $0x638] sm:$0xff] }
0x145b   :  { %4373 = vmatpush3.msra.mxu1 %v6153_v39  ;;  %4323 = vmatprep.subr.mxu0 %v4718_v1 }
0x145c   :  { %4374 = vmatprep.subr.mxu1 %v4718_v1  ;;  %4324 = vmatpush3.msra.mxu0 %v2945_v50  ;;  %v2953_v50 = vld [vmem:[%s6702_s4 + $0x630] sm:$0xff] }
0x145d   :  { %4375 = vmatpush3.msra.mxu1 %v6160_v40  ;;  %4325 = vmatprep.subr.mxu0 %v4718_v1 }
0x145e   :  { %4376 = vmatprep.subr.mxu1 %v4718_v1  ;;  %4326 = vmatpush3.msra.mxu0 %v2944_v51  ;;  %v2952_v51 = vld [vmem:[%s6702_s4 + $0x628] sm:$0xff] }
0x145f   :  { %4377 = vmatpush3.msra.mxu1 %v6167_v41  ;;  %4327 = vmatprep.subr.mxu0 %v4718_v1 }
0x1460   :  { %4378 = vmatprep.subr.mxu1 %v4718_v1  ;;  %4328 = vmatpush3.msra.mxu0 %v2943_v56  ;;  %v2951_v56 = vld [vmem:[%s6702_s4 + $0x620] sm:$0xff] }
0x1461   :  { %4379 = vmatpush3.msra.mxu1 %v6174_v42  ;;  %4329 = vmatprep.subr.mxu0 %v4718_v1 }
0x1462   :  { %4380 = vmatprep.subr.mxu1 %v4718_v1  ;;  %4330 = vmatpush3.msra.mxu0 %v2942_v8  ;;  %v2950_v8 = vld [vmem:[%s6702_s4 + $0x618] sm:$0xff] }
0x1463   :  { %4381 = vmatpush3.msra.mxu1 %v6181_v44  ;;  %4331 = vmatprep.subr.mxu0 %v4718_v1 }
0x1464   :  { %4382 = vmatprep.subr.mxu1 %v4718_v1 }
0x1465   :  { %4383 = vmatpush3.msra.mxu1 %v6188_v45 }
0x1466   :  { %4384 = vmatprep.subr.mxu1 %v4718_v1 }
0x1467   :  { %4385 = vmatpush3.msra.mxu1 %v6195_v46 }
0x1468   :  { %4386 = vmatprep.subr.mxu1 %v4718_v1 }
0x1469   :  { %4387 = vmatpush3.msra.mxu1 %v6202_v47 }
0x146a   :  { %4426 = vmatprep.subr.mxu1 %v4718_v1 }
0x150a   :  { %v2120_v11 = vpop.f32.mrf.mxu1 }
0x150b   :  { %v2124_v12 = vadd.f32 %v2120_v11, %v2053_v10  ;;  %v2962_v11 = vld [vmem:[%s6702_s4 + $0x678] sm:$0xff] }
0x150c   :  { %v4320_v13 = vpop.f32.mrf.mxu1 }
0x150d   :  { %v2125_v14 = vmul.f32 %v2124_v12, %v4927_v29  ;;  %v2961_v12 = vld [vmem:[%s6702_s4 + $0x670] sm:$0xff]  ;;  %v2960_v13 = vld [vmem:[%s6702_s4 + $0x668] sm:$0xff] }
0x150f   :  { %4638 = vtanh.f32 %v2125_v14  ;;  %v2959_v14 = vld [vmem:[%s6702_s4 + $0x660] sm:$0xff] }
0x1518   :  { %v2048_v15 = vpop.f32.mrf.mxu0 }
0x1519   :  { %v6320_v16 = vadd.f32 %v2048_v15, %v6208_v21  ;;  %v2941_v21 = vld [vmem:[%s6702_s4 + $0x5d0] sm:$0xff]  ;;  %v2958_v15 = vld [vmem:[%s6702_s4 + $0x658] sm:$0xff] }
0x151a   :  { %v4285_v17 = vpop.f32.mrf.mxu0  ;;  %4332 = vmatpush3.msra.mxu0 %v2941_v21  ;;  %v2949_v21 = vld [vmem:[%s6702_s4 + $0x610] sm:$0xff] }
0x151b   :  { %4333 = vmatprep.subr.mxu0 %v4718_v1 }
0x151c   :  { %v4639_v18 = vpop.eup %4638  ;;  %4334 = vmatpush3.msra.mxu0 %v2940_v23  ;;  %v2947_v23 = vld [vmem:[%s6702_s4 + $0x600] sm:$0xff] }
0x151d   :  { %v2127_v35 = vmul.f32 %v4639_v18, %v4927_v29  ;;  %4335 = vmatprep.subr.mxu0 %v4718_v1  ;;  %v2956_v18 = vld [vmem:[%s6702_s4 + $0x648] sm:$0xff] }
0x151e   :  { %4336 = vmatpush3.msra.mxu0 %v2939_v53 }
0x151f   :  { %v2128_v48 = vadd.f32 %v2127_v35, %v4930_v36  ;;  %4337 = vmatprep.subr.mxu0 %v4718_v1 }
0x1520   :  { %4338 = vmatpush3.msra.mxu0 %v2938_v54 }
0x1521   :  { %2129 = vrot.lane.b32.xlu0 %v2128_v48, %s4721_s3  ;;  %4339 = vmatprep.subr.mxu0 %v4718_v1  ;;  %v2134_v61 = vmul.f32 %v2128_v48, %v6279_v2 }
0x1522   :  { %4340 = vmatpush3.msra.mxu0 %v2937_v55 }
0x1523   :  { %4341 = vmatprep.subr.mxu0 %v4718_v1 }
0x1524   :  { %4342 = vmatpush3.msra.mxu0 %v2936_v24 }
0x1525   :  { %4343 = vmatprep.subr.mxu0 %v4718_v1 }
0x1526   :  { %4344 = vmatpush3.msra.mxu0 %v2935_v43  ;;  %v2974_v43 = vld [vmem:[%s6702_s4 + $0x6d8] sm:$0xff] }
0x1527   :  { %4345 = vmatprep.subr.mxu0 %v4718_v1 }
0x1528   :  { %4346 = vmatpush3.msra.mxu0 %v2934_v57  ;;  %v2973_v57 = vld [vmem:[%s6702_s4 + $0x6d0] sm:$0xff] }
0x1529   :  { %4347 = vmatprep.subr.mxu0 %v4718_v1 }
0x152a   :  { %4348 = vmatpush3.msra.mxu0 %v2933_v58 }
0x152b   :  { %4349 = vmatprep.subr.mxu0 %v4718_v1 }
0x152c   :  { %4350 = vmatpush3.msra.mxu0 %v2932_v59  ;;  %v2972_v59 = vld [vmem:[%s6702_s4 + $0x6c8] sm:$0xff] }
0x152d   :  { %4351 = vmatprep.subr.mxu0 %v4718_v1 }
0x152e   :  { %4352 = vmatpush3.msra.mxu0 %v2931_v60 }
0x152f   :  { %4391 = vmatprep.subr.mxu0 %v4718_v1 }
0x1593   :  { %v2130_v22 = vpop.permute.xlu0 %2129 }
0x1594   :  { %v2131_v52 = vmul.f32 %v2130_v22, %v2128_v48  ;;  %v2955_v48 = vld [vmem:[%s6702_s4 + $0x640] sm:$0xff] }
0x1596   :  { %2132 = vrot.lane.b32.xlu1 %v2131_v52, %s4722_s1 }
0x1608   :  { %v2133_v62 = vpop.permute.xlu1 %2132 }
0x1609   :  { %v6391_v63 = vadd.f32 %v2134_v61, %v2133_v62  ;;  %v2971_v61 = vld [vmem:[%s6702_s4 + $0x6c0] sm:$0xff]  ;;  %v2970_v62 = vld [vmem:[%s6702_s4 + $0x6b8] sm:$0xff] }
0x160b   :  { %4640 = vtanh.f32 %v6391_v63 }
0x1618   :  { %v4641_v3 = vpop.eup %4640 }
0x1619   :  { %v2137_v5 = vmul.f32 %v4641_v3, %v2130_v22  ;;  %v2948_v22 = vld [vmem:[%s6702_s4 + $0x608] sm:$0xff] }
0x161a   :  { %v2968_v3 = vld [vmem:[%s6702_s4 + $0x6a8] sm:$0xff] }
0x161b   :  { %4642 = vtanh.f32 %v2137_v5  ;;  %4389 = vmatmul.mubr.f32.vlgmr.msra.gmra.mxu1 %v2137_v5  ;;  %v2967_v5 = vld [vmem:[%s6702_s4 + $0x6a0] sm:$0xff] }
0x161c   :  { %4427 = vmatpush3.msra.mxu1 %v6093_v19  ;;  %4458 = vmatprep.mubr.msk.f32.mxu1 %vm4719_vm0, %v4718_v1 }
0x161d   :  { %4428 = vmatprep.subr.mxu1 %v4718_v1 }
0x161e   :  { %4429 = vmatpush3.msra.mxu1 %v6102_v20 }
0x161f   :  { %4430 = vmatprep.subr.mxu1 %v4718_v1 }
0x1620   :  { %4431 = vmatpush3.msra.mxu1 %v6109_v31 }
0x1621   :  { %4432 = vmatprep.subr.mxu1 %v4718_v1 }
0x1622   :  { %4433 = vmatpush3.msra.mxu1 %v6116_v32 }
0x1623   :  { %4434 = vmatprep.subr.mxu1 %v4718_v1 }
0x1624   :  { %4435 = vmatpush3.msra.mxu1 %v6123_v33 }
0x1625   :  { %4436 = vmatprep.subr.mxu1 %v4718_v1 }
0x1626   :  { %4437 = vmatpush3.msra.mxu1 %v6130_v34 }
0x1627   :  { %4438 = vmatprep.subr.mxu1 %v4718_v1 }
0x1628   :  { %v4643_v6 = vpop.eup %4642  ;;  %4439 = vmatpush3.msra.mxu1 %v6137_v37 }
0x1629   :  { %4354 = vmatmul.mubr.f32.vlgmr.msra.gmra.mxu0 %v4643_v6  ;;  %4440 = vmatprep.subr.mxu1 %v4718_v1  ;;  %v2966_v6 = vld [vmem:[%s6702_s4 + $0x698] sm:$0xff] }
0x162a   :  { %4441 = vmatpush3.msra.mxu1 %v6144_v38  ;;  %4423 = vmatprep.mubr.msk.f32.mxu0 %vm4719_vm0, %v4718_v1 }
0x162b   :  { %4442 = vmatprep.subr.mxu1 %v4718_v1  ;;  %4392 = vmatpush3.msra.mxu0 %v2962_v11 }
0x162c   :  { %4443 = vmatpush3.msra.mxu1 %v6153_v39  ;;  %4393 = vmatprep.subr.mxu0 %v4718_v1 }
0x162d   :  { %4444 = vmatprep.subr.mxu1 %v4718_v1  ;;  %4394 = vmatpush3.msra.mxu0 %v2961_v12 }
0x162e   :  { %4445 = vmatpush3.msra.mxu1 %v6160_v40  ;;  %4395 = vmatprep.subr.mxu0 %v4718_v1 }
0x162f   :  { %4446 = vmatprep.subr.mxu1 %v4718_v1  ;;  %4396 = vmatpush3.msra.mxu0 %v2960_v13 }
0x1630   :  { %4447 = vmatpush3.msra.mxu1 %v6167_v41  ;;  %4397 = vmatprep.subr.mxu0 %v4718_v1 }
0x1631   :  { %4448 = vmatprep.subr.mxu1 %v4718_v1  ;;  %4398 = vmatpush3.msra.mxu0 %v2959_v14 }
0x1632   :  { %4449 = vmatpush3.msra.mxu1 %v6174_v42  ;;  %4399 = vmatprep.subr.mxu0 %v4718_v1 }
0x1633   :  { %4450 = vmatprep.subr.mxu1 %v4718_v1  ;;  %4400 = vmatpush3.msra.mxu0 %v2958_v15 }
0x1634   :  { %4451 = vmatpush3.msra.mxu1 %v6181_v44  ;;  %4401 = vmatprep.subr.mxu0 %v4718_v1 }
0x1635   :  { %4452 = vmatprep.subr.mxu1 %v4718_v1 }
0x1636   :  { %4453 = vmatpush3.msra.mxu1 %v6188_v45 }
0x1637   :  { %4454 = vmatprep.subr.mxu1 %v4718_v1 }
0x1638   :  { %4455 = vmatpush3.msra.mxu1 %v6195_v46 }
0x1639   :  { %4456 = vmatprep.subr.mxu1 %v4718_v1 }
0x163a   :  { %4457 = vmatpush3.msra.mxu1 %v6202_v47 }
0x163b   :  { %4496 = vmatprep.subr.mxu1 %v4718_v1 }
0x16db   :  { %v2294_v26 = vpop.f32.mrf.mxu1 }
0x16dc   :  { %v2298_v27 = vadd.f32 %v2294_v26, %v2227_v25  ;;  %v2965_v25 = vld [vmem:[%s6702_s4 + $0x690] sm:$0xff]  ;;  %v2964_v26 = vld [vmem:[%s6702_s4 + $0x688] sm:$0xff] }
0x16dd   :  { %v4390_v28 = vpop.f32.mrf.mxu1 }
0x16de   :  { %v2299_v30 = vmul.f32 %v2298_v27, %v4927_v29  ;;  %v2963_v27 = vld [vmem:[%s6702_s4 + $0x680] sm:$0xff] }
0x16e0   :  { %4644 = vtanh.f32 %v2299_v30 }
0x16e9   :  { %v2222_v0 = vpop.f32.mrf.mxu0 }
0x16ea   :  { %v6432_v2 = vadd.f32 %v2222_v0, %v6320_v16  ;;  %v2957_v16 = vld [vmem:[%s6702_s4 + $0x650] sm:$0xff] }
0x16eb   :  { %v4355_v4 = vpop.f32.mrf.mxu0  ;;  %4402 = vmatpush3.msra.mxu0 %v2957_v16 }
0x16ec   :  { %4403 = vmatprep.subr.mxu0 %v4718_v1 }
0x16ed   :  { %v4645_v7 = vpop.eup %4644  ;;  %4404 = vmatpush3.msra.mxu0 %v2956_v18 }
0x16ee   :  { %v2301_v9 = vmul.f32 %v4645_v7, %v4927_v29  ;;  %4405 = vmatprep.subr.mxu0 %v4718_v1 }
0x16ef   :  { %4406 = vmatpush3.msra.mxu0 %v2955_v48  ;;  %v2994_v48 = vld [vmem:[%s6702_s4 + $0x778] sm:$0xff] }
0x16f0   :  { %v2302_v10 = vadd.f32 %v2301_v9, %v4930_v36  ;;  %4407 = vmatprep.subr.mxu0 %v4718_v1  ;;  %v2575_v9 = vld [vmem:[#allocation2 + $0xe] sm:$0x1] }
0x16f1   :  { %4408 = vmatpush3.msra.mxu0 %v2954_v49  ;;  %v2993_v49 = vld [vmem:[%s6702_s4 + $0x770] sm:$0xff] }
0x16f2   :  { %2303 = vrot.lane.b32.xlu0 %v2302_v10, %s4721_s3  ;;  %4409 = vmatprep.subr.mxu0 %v4718_v1  ;;  %v2308_v52 = vmul.f32 %v2302_v10, %v6391_v63  ;;  %v2969_v63 = vld [vmem:[%s6702_s4 + $0x6b0] sm:$0xff] }
0x16f3   :  { %4410 = vmatpush3.msra.mxu0 %v2953_v50  ;;  %v2990_v50 = vld [vmem:[%s6702_s4 + $0x758] sm:$0xff] }
0x16f4   :  { %4411 = vmatprep.subr.mxu0 %v4718_v1 }
0x16f5   :  { %4412 = vmatpush3.msra.mxu0 %v2952_v51 }
0x16f6   :  { %4413 = vmatprep.subr.mxu0 %v4718_v1 }
0x16f7   :  { %4414 = vmatpush3.msra.mxu0 %v2951_v56  ;;  %v2989_v56 = vld [vmem:[%s6702_s4 + $0x750] sm:$0xff] }
0x16f8   :  { %4415 = vmatprep.subr.mxu0 %v4718_v1 }
0x16f9   :  { %4416 = vmatpush3.msra.mxu0 %v2950_v8 }
0x16fa   :  { %4417 = vmatprep.subr.mxu0 %v4718_v1 }
0x16fb   :  { %4418 = vmatpush3.msra.mxu0 %v2949_v21  ;;  %v2988_v21 = vld [vmem:[%s6702_s4 + $0x748] sm:$0xff] }
0x16fc   :  { %4419 = vmatprep.subr.mxu0 %v4718_v1 }
0x16fd   :  { %4420 = vmatpush3.msra.mxu0 %v2948_v22  ;;  %v2987_v22 = vld [vmem:[%s6702_s4 + $0x740] sm:$0xff] }
0x16fe   :  { %4421 = vmatprep.subr.mxu0 %v4718_v1 }
0x16ff   :  { %4422 = vmatpush3.msra.mxu0 %v2947_v23  ;;  %v2986_v23 = vld [vmem:[%s6702_s4 + $0x738] sm:$0xff] }
0x1700   :  { %4461 = vmatprep.subr.mxu0 %v4718_v1 }
0x1764   :  { %v2304_v17 = vpop.permute.xlu0 %2303 }
0x1765   :  { %v2305_v35 = vmul.f32 %v2304_v17, %v2302_v10 }
0x1767   :  { %2306 = vrot.lane.b32.xlu1 %v2305_v35, %s4722_s1 }
0x17d9   :  { %v2307_v53 = vpop.permute.xlu1 %2306 }
0x17da   :  { %v6503_v54 = vadd.f32 %v2308_v52, %v2307_v53  ;;  %v2985_v52 = vld [vmem:[%s6702_s4 + $0x730] sm:$0xff]  ;;  %v2984_v53 = vld [vmem:[%s6702_s4 + $0x728] sm:$0xff] }
0x17dc   :  { %4646 = vtanh.f32 %v6503_v54 }
0x17e9   :  { %v4647_v55 = vpop.eup %4646 }
0x17ea   :  { %v2311_v24 = vmul.f32 %v4647_v55, %v2304_v17  ;;  %v2982_v55 = vld [vmem:[%s6702_s4 + $0x718] sm:$0xff] }
0x17ec   :  { %4648 = vtanh.f32 %v2311_v24  ;;  %4459 = vmatmul.mubr.f32.vlgmr.msra.gmra.mxu1 %v2311_v24  ;;  %v2981_v24 = vld [vmem:[%s6702_s4 + $0x710] sm:$0xff] }
0x17ed   :  { %4497 = vmatpush3.msra.mxu1 %v6093_v19  ;;  %4528 = vmatprep.mubr.msk.f32.mxu1 %vm4719_vm0, %v4718_v1 }
0x17ee   :  { %4498 = vmatprep.subr.mxu1 %v4718_v1 }
0x17ef   :  { %4499 = vmatpush3.msra.mxu1 %v6102_v20  ;;  %v2401_v20 = vld [vmem:[#allocation2 + $0xd] sm:$0x1] }
0x17f0   :  { %4500 = vmatprep.subr.mxu1 %v4718_v1 }
0x17f1   :  { %4501 = vmatpush3.msra.mxu1 %v6109_v31 }
0x17f2   :  { %4502 = vmatprep.subr.mxu1 %v4718_v1 }
0x17f3   :  { %4503 = vmatpush3.msra.mxu1 %v6116_v32 }
0x17f4   :  { %4504 = vmatprep.subr.mxu1 %v4718_v1 }
0x17f5   :  { %4505 = vmatpush3.msra.mxu1 %v6123_v33 }
0x17f6   :  { %4506 = vmatprep.subr.mxu1 %v4718_v1 }
0x17f7   :  { %4507 = vmatpush3.msra.mxu1 %v6130_v34 }
0x17f8   :  { %4508 = vmatprep.subr.mxu1 %v4718_v1 }
0x17f9   :  { %v4649_v19 = vpop.eup %4648  ;;  %4509 = vmatpush3.msra.mxu1 %v6137_v37 }
0x17fa   :  { %4424 = vmatmul.mubr.f32.vlgmr.msra.gmra.mxu0 %v4649_v19  ;;  %4510 = vmatprep.subr.mxu1 %v4718_v1  ;;  %v2980_v19 = vld [vmem:[%s6702_s4 + $0x708] sm:$0xff] }
0x17fb   :  { %4511 = vmatpush3.msra.mxu1 %v6144_v38  ;;  %4493 = vmatprep.mubr.msk.f32.mxu0 %vm4719_vm0, %v4718_v1 }
0x17fc   :  { %4512 = vmatprep.subr.mxu1 %v4718_v1 }
0x17fd   :  { %4513 = vmatpush3.msra.mxu1 %v6153_v39 }
0x17fe   :  { %4514 = vmatprep.subr.mxu1 %v4718_v1 }
0x17ff   :  { %4515 = vmatpush3.msra.mxu1 %v6160_v40 }
0x1800   :  { %4516 = vmatprep.subr.mxu1 %v4718_v1 }
0x1801   :  { %4517 = vmatpush3.msra.mxu1 %v6167_v41 }
0x1802   :  { %4518 = vmatprep.subr.mxu1 %v4718_v1 }
0x1803   :  { %4519 = vmatpush3.msra.mxu1 %v6174_v42 }
0x1804   :  { %4520 = vmatprep.subr.mxu1 %v4718_v1 }
0x1805   :  { %4521 = vmatpush3.msra.mxu1 %v6181_v44  ;;  %v2978_v44 = vld [vmem:[%s6702_s4 + $0x6f8] sm:$0xff] }
0x1806   :  { %4522 = vmatprep.subr.mxu1 %v4718_v1  ;;  %4462 = vmatpush3.msra.mxu0 %v2978_v44 }
0x1807   :  { %4523 = vmatpush3.msra.mxu1 %v6188_v45  ;;  %4463 = vmatprep.subr.mxu0 %v4718_v1  ;;  %v2977_v45 = vld [vmem:[%s6702_s4 + $0x6f0] sm:$0xff] }
0x1808   :  { %4524 = vmatprep.subr.mxu1 %v4718_v1  ;;  %4464 = vmatpush3.msra.mxu0 %v2977_v45 }
0x1809   :  { %4525 = vmatpush3.msra.mxu1 %v6195_v46  ;;  %v2976_v46 = vld [vmem:[%s6702_s4 + $0x6e8] sm:$0xff]  ;;  %4465 = vmatprep.subr.mxu0 %v4718_v1 }
0x180a   :  { %4526 = vmatprep.subr.mxu1 %v4718_v1  ;;  %4466 = vmatpush3.msra.mxu0 %v2976_v46 }
0x180b   :  { %4527 = vmatpush3.msra.mxu1 %v6202_v47  ;;  %v2975_v47 = vld [vmem:[%s6702_s4 + $0x6e0] sm:$0xff]  ;;  %4467 = vmatprep.subr.mxu0 %v4718_v1 }
0x180c   :  { %4468 = vmatpush3.msra.mxu0 %v2975_v47 }
0x180d   :  { %4469 = vmatprep.subr.mxu0 %v4718_v1 }
0x180e   :  { %4470 = vmatpush3.msra.mxu0 %v2974_v43 }
0x180f   :  { %4471 = vmatprep.subr.mxu0 %v4718_v1 }
0x1810   :  { %4472 = vmatpush3.msra.mxu0 %v2973_v57 }
0x1811   :  { %4473 = vmatprep.subr.mxu0 %v4718_v1 }
0x1812   :  { %4474 = vmatpush3.msra.mxu0 %v2972_v59 }
0x1813   :  { %4475 = vmatprep.subr.mxu0 %v4718_v1 }
0x1814   :  { %4476 = vmatpush3.msra.mxu0 %v2971_v61 }
0x1815   :  { %4477 = vmatprep.subr.mxu0 %v4718_v1 }
0x1816   :  { %4478 = vmatpush3.msra.mxu0 %v2970_v62 }
0x1817   :  { %4479 = vmatprep.subr.mxu0 %v4718_v1 }
0x1818   :  { %4480 = vmatpush3.msra.mxu0 %v2969_v63 }
0x1819   :  { %4481 = vmatprep.subr.mxu0 %v4718_v1 }
0x181a   :  { %4482 = vmatpush3.msra.mxu0 %v2968_v3 }
0x181b   :  { %4483 = vmatprep.subr.mxu0 %v4718_v1 }
0x181c   :  { %4484 = vmatpush3.msra.mxu0 %v2967_v5 }
0x181d   :  { %4485 = vmatprep.subr.mxu0 %v4718_v1 }
0x181e   :  { %4486 = vmatpush3.msra.mxu0 %v2966_v6 }
0x181f   :  { %4487 = vmatprep.subr.mxu0 %v4718_v1 }
0x1820   :  { %4488 = vmatpush3.msra.mxu0 %v2965_v25 }
0x1821   :  { %4489 = vmatprep.subr.mxu0 %v4718_v1 }
0x1822   :  { %4490 = vmatpush3.msra.mxu0 %v2964_v26 }
0x1823   :  { %4491 = vmatprep.subr.mxu0 %v4718_v1 }
0x1824   :  { %4492 = vmatpush3.msra.mxu0 %v2963_v27 }
0x1825   :  { %4531 = vmatprep.subr.mxu0 %v4718_v1 }
0x18ac   :  { %v2468_v31 = vpop.f32.mrf.mxu1 }
0x18ad   :  { %v2472_v32 = vadd.f32 %v2468_v31, %v2401_v20  ;;  %v2979_v20 = vld [vmem:[%s6702_s4 + $0x700] sm:$0xff] }
0x18ae   :  { %v4460_v33 = vpop.f32.mrf.mxu1 }
0x18af   :  { %v2473_v34 = vmul.f32 %v2472_v32, %v4927_v29 }
0x18b1   :  { %4650 = vtanh.f32 %v2473_v34 }
0x18ba   :  { %v2396_v37 = vpop.f32.mrf.mxu0 }
0x18bb   :  { %v6543_v38 = vadd.f32 %v2396_v37, %v6432_v2 }
0x18bc   :  { %v4425_v39 = vpop.f32.mrf.mxu0 }
0x18be   :  { %v4651_v40 = vpop.eup %4650 }
0x18bf   :  { %v2475_v41 = vmul.f32 %v4651_v40, %v4927_v29  ;;  %v2749_v40 = vld [vmem:[%s6703_s5] sm:$0x1] }
0x18c1   :  { %v2476_v42 = vadd.f32 %v2475_v41, %v4930_v36 }
0x18c3   :  { %2477 = vrot.lane.b32.xlu0 %v2476_v42, %s4721_s3  ;;  %v2482_v28 = vmul.f32 %v2476_v42, %v6503_v54  ;;  %v2983_v54 = vld [vmem:[%s6702_s4 + $0x720] sm:$0xff] }
0x1935   :  { %v2478_v58 = vpop.permute.xlu0 %2477 }
0x1936   :  { %v2479_v60 = vmul.f32 %v2478_v58, %v2476_v42 }
0x1938   :  { %2480 = vrot.lane.b32.xlu1 %v2479_v60, %s4722_s1 }
0x19aa   :  { %v2481_v30 = vpop.permute.xlu1 %2480 }
0x19ab   :  { %v6614_v0 = vadd.f32 %v2482_v28, %v2481_v30 }
0x19ad   :  { %4652 = vtanh.f32 %v6614_v0 }
0x19ba   :  { %v4653_v2 = vpop.eup %4652 }
0x19bb   :  { %v2485_v4 = vmul.f32 %v4653_v2, %v2478_v58 }
0x19bd   :  { %4654 = vtanh.f32 %v2485_v4  ;;  %4529 = vmatmul.mubr.f32.vlgmr.msra.gmra.mxu1 %v2485_v4 }
0x19ca   :  { %v4655_v7 = vpop.eup %4654 }
0x19cb   :  { %4494 = vmatmul.mubr.f32.vlgmr.msra.gmra.mxu0 %v4655_v7 }
0x19cc   :  { %4563 = vmatprep.mubr.msk.f32.mxu0 %vm4719_vm0, %v4718_v1  ;;  %4532 = vmatpush3.msra.mxu0 %v2994_v48 }
0x19cd   :  { %4533 = vmatprep.subr.mxu0 %v4718_v1 }
0x19ce   :  { %4534 = vmatpush3.msra.mxu0 %v2993_v49 }
0x19cf   :  { %4535 = vmatprep.subr.mxu0 %v4718_v1 }
0x1a7d   :  { %v2642_v10 = vpop.f32.mrf.mxu1 }
0x1a7e   :  { %v2646_v11 = vadd.f32 %v2642_v10, %v2575_v9 }
0x1a7f   :  { %v4530_v12 = vpop.f32.mrf.mxu1 }
0x1a80   :  { %v2647_v13 = vmul.f32 %v2646_v11, %v4927_v29 }
0x1a82   :  { %4656 = vtanh.f32 %v2647_v13 }
0x1a8b   :  { %v2570_v14 = vpop.f32.mrf.mxu0 }
0x1a8c   :  { %v6621_v15 = vadd.f32 %v2570_v14, %v6543_v38 }
0x1a8d   :  { %v4495_v16 = vpop.f32.mrf.mxu0 }
0x1a8f   :  { %v4657_v17 = vpop.eup %4656 }
0x1a90   :  { %v2649_v18 = vmul.f32 %v4657_v17, %v4927_v29  ;;  %v2992_v29 = vld [vmem:[%s6702_s4 + $0x768] sm:$0xff] }
0x1a91   :  { %4536 = vmatpush3.msra.mxu0 %v2992_v29 }
0x1a92   :  { %v2650_v35 = vadd.f32 %v2649_v18, %v4930_v36  ;;  %4537 = vmatprep.subr.mxu0 %v4718_v1  ;;  %v2991_v36 = vld [vmem:[%s6702_s4 + $0x760] sm:$0xff]  ;;  %s4723_s4 = smov [#allocation3]  }
0x1a93   :  { %4538 = vmatpush3.msra.mxu0 %v2991_v36 }
0x1a94   :  { %2651 = vrot.lane.b32.xlu0 %v2650_v35, %s4721_s3  ;;  %4539 = vmatprep.subr.mxu0 %v4718_v1  ;;  %v2656_v31 = vmul.f32 %v2650_v35, %v6614_v0  ;;  %s2760_s3 = sshll.u32 %s4723_s4, 4  ;;  %s2761_s3 = int_to_ptr.vmem [resolvable:$true] %s2760_s3 }
0x1a95   :  { %4540 = vmatpush3.msra.mxu0 %v2990_v50  ;;  %s4696_s24 = scalar_lea.vmem %s2761_s3, 16  ;;  %s4700_s25 = scalar_lea.vmem %s2761_s3, 32 }
0x1a96   :  { %4541 = vmatprep.subr.mxu0 %v4718_v1  ;;  %p4697_p0 = scmp.ne.s32.totalorder %s2761_s3, %s4696_s24  ;;  %p4701_p1 = scmp.lt.s32.totalorder %s2761_s3, %s2761_s3 }
0x1a97   :  { %4542 = vmatpush3.msra.mxu0 %v2989_v56  ;;  %p4702_p2 = scmp.lt.s32.totalorder %s4700_s25, %s4696_s24 }
0x1a98   :  { %4543 = vmatprep.subr.mxu0 %v4718_v1 }
0x1a99   :  { %4544 = vmatpush3.msra.mxu0 %v2988_v21  ;;  %p4703_p3 = por %p4702_p2, %p4701_p1 }
0x1a9a   :  { %4545 = vmatprep.subr.mxu0 %v4718_v1 }
0x1a9b   :  { %4546 = vmatpush3.msra.mxu0 %v2987_v22  ;;  %p4704_p4 = pnand %p4703_p3, %p4697_p0 }
0x1a9c   :  { %4547 = vmatprep.subr.mxu0 %v4718_v1 }
0x1a9d   :  { %4548 = vmatpush3.msra.mxu0 %v2986_v23 }
0x1a9e   :  { %4549 = vmatprep.subr.mxu0 %v4718_v1 }
0x1a9f   :  { %4550 = vmatpush3.msra.mxu0 %v2985_v52 }
0x1aa0   :  { %4551 = vmatprep.subr.mxu0 %v4718_v1 }
0x1aa1   :  { %4552 = vmatpush3.msra.mxu0 %v2984_v53 }
0x1aa2   :  { %4553 = vmatprep.subr.mxu0 %v4718_v1 }
0x1aa3   :  { %4554 = vmatpush3.msra.mxu0 %v2983_v54 }
0x1aa4   :  { %4555 = vmatprep.subr.mxu0 %v4718_v1 }
0x1aa5   :  { %4556 = vmatpush3.msra.mxu0 %v2982_v55 }
0x1aa6   :  { %4557 = vmatprep.subr.mxu0 %v4718_v1 }
0x1aa7   :  { %4558 = vmatpush3.msra.mxu0 %v2981_v24 }
0x1aa8   :  { %4559 = vmatprep.subr.mxu0 %v4718_v1 }
0x1aa9   :  { %4560 = vmatpush3.msra.mxu0 %v2980_v19 }
0x1aaa   :  { %4561 = vmatprep.subr.mxu0 %v4718_v1 }
0x1aab   :  { %4562 = vmatpush3.msra.mxu0 %v2979_v20 }
0x1b06   :  { %v2652_v51 = vpop.permute.xlu0 %2651 }
0x1b07   :  { %v2653_v8 = vmul.f32 %v2652_v51, %v2650_v35 }
0x1b09   :  { %2654 = vrot.lane.b32.xlu1 %v2653_v8, %s4722_s1 }
0x1b7b   :  { %v2655_v32 = vpop.permute.xlu1 %2654 }
0x1b7c   :  { %v2657_v33 = vadd.f32 %v2656_v31, %v2655_v32 }
0x1b7e   :  { %4658 = vtanh.f32 %v2657_v33 }
0x1b8b   :  { %v4659_v34 = vpop.eup %4658 }
0x1b8c   :  { %v2659_v37 = vmul.f32 %v4659_v34, %v2652_v51 }
0x1b8e   :  { %4660 = vtanh.f32 %v2659_v37 }
0x1b9b   :  { %v4661_v38 = vpop.eup %4660 }
0x1b9c   :  { %4564 = vmatmul.mubr.f32.vlgmr.msra.gmra.mxu0 %v4661_v38 }
0x1c5c   :  { %v2744_v39 = vpop.f32.mrf.mxu0 }
0x1c5d   :  { %v2748_v41 = vadd.f32 %v2744_v39, %v6621_v15 }
0x1c5e   :  { %v4565_v42 = vpop.f32.mrf.mxu0 }
0x1c5f   :  { %v2750_v1 = vadd.f32 %v2749_v40, %v2748_v41 }
0x1c61   :  { %4662 = vtanh.f32 %v2750_v1 }
0x1c6e   :  { %v4663_v44 = vpop.eup %4662 }
0x1c6f   :  { %2753 = vst.msk [vmem:[#allocation3] sm:$0x1] %vm2752_vm5, %v4663_v44 }
0x1c70   :  { %4707 = shalt.err (!%p4704_p4)
}
0x1c71   :  { %2763 = dma.vmem_to_hbm [thread:$0]  %s2761_s3, 16, %s6704_s6, [#allocation4]  }
0x1c72   :  { %4716 = dma.done.wait [#allocation4], 16  }
0x1c73   :  { %4717 = vsyncadd [#allocation4], 4294967280 }
0x1c74   :  { %2767 = vsyncpa [#allocation4], 1 }

</bundles_post_ra>
